<compile_context>
chip_gen: v6e
topology: v6e:2x2x1
jax: 0.10.0
libtpu: 0.0.40
codegen_flags: <defaults>
</compile_context>

<pallas_src>
import math

import jax
import jax.numpy as jnp
import numpy as np
from jax.experimental import pallas as pl
from jax.experimental.pallas import tpu as pltpu  # noqa: F401  (TPU backend assumed)

# ----- model hyper-parameters (small, consistent with the module) -----
BATCH = 2
SEQ = 8
INPUT_DIM = 16
MODEL_DIM = 32
NUM_HEADS = 4
NUM_LAYERS = 2
FFN_DIM = 2048           # PyTorch TransformerEncoderLayer default dim_feedforward
OUTPUT_DIM = 1
NUM_EXPERTS = 8
MAX_SEQ_LEN = 16
LN_EPS = 1e-5
FFN_CHUNKS = 4           # 4 chunks of 512 along the FFN hidden axis
FFN_CHUNK = FFN_DIM // FFN_CHUNKS


def _layer_norm(v, w, b):
    mu = jnp.mean(v, axis=-1, keepdims=True)
    var = jnp.mean((v - mu) ** 2, axis=-1, keepdims=True)
    return (v - mu) * jax.lax.rsqrt(var + LN_EPS) * w + b


# --------------------------------------------------------------------------------------
# Pallas kernel
# --------------------------------------------------------------------------------------
def moetr_kernel(
    x_ref, pe_ref, mask_ref,
    emb_w_ref,
    inproj_w_ref, inproj_b_ref, outproj_w_ref, outproj_b_ref,
    ln1_w_ref, ln1_b_ref, ln2_w_ref, ln2_b_ref,
    lin1_w_ref, lin1_b_ref, lin2_w_ref, lin2_b_ref,
    gate_w_ref, gate_b_ref, moefc_w_ref, moefc_c_ref,
    out_ref,
):
    f32, bf16 = jnp.float32, jnp.bfloat16
    BS = BATCH * SEQ
    D, H, Dh = MODEL_DIM, NUM_HEADS, MODEL_DIM // NUM_HEADS

    # ---- embedding + positional encoding (emb bias pre-folded into pe table) ----
    x = x_ref[...].astype(bf16)
    h = jnp.dot(x, emb_w_ref[...], preferred_element_type=f32) + pe_ref[...]

    mask = mask_ref[...]                                  # (BS, BS) block-diagonal additive mask

    for l in range(NUM_LAYERS):                           # static unroll over encoder layers
        # ---- fused-QKV self-attention (1/sqrt(Dh) pre-folded into q) ----
        hb = h.astype(bf16)
        qkv = jnp.dot(hb, inproj_w_ref[l], preferred_element_type=f32) + inproj_b_ref[l]

        attn = jnp.zeros((BS, D), f32)
        for hh in range(H):                               # static unroll over heads (2-D ops only)
            o0 = hh * Dh
            qh = qkv[:, o0:o0 + Dh].astype(bf16)
            kh = qkv[:, D + o0:D + o0 + Dh].astype(bf16)
            vh = qkv[:, 2 * D + o0:2 * D + o0 + Dh].astype(bf16)

            s = jnp.einsum("qd,kd->qk", qh, kh, preferred_element_type=f32) + mask
            s = s - jnp.max(s, axis=-1, keepdims=True)
            p = jnp.exp(s)
            p = p / jnp.sum(p, axis=-1, keepdims=True)
            oh = jnp.dot(p.astype(bf16), vh, preferred_element_type=f32)
            # out_proj folded per head: out_proj(concat_h o_h) == sum_h o_h @ W_o_slice_h
            attn = attn + jnp.dot(oh.astype(bf16), outproj_w_ref[l * H + hh],
                                  preferred_element_type=f32)
        attn = attn + outproj_b_ref[l]
        h = _layer_norm(h + attn, ln1_w_ref[l], ln1_b_ref[l])

        # ---- feed-forward, chunked along the 2048-wide hidden axis ----
        hb = h.astype(bf16)

        def ffn_chunk(c, acc):
            idx = l * FFN_CHUNKS + c
            z = jnp.dot(hb, lin1_w_ref[idx], preferred_element_type=f32) + lin1_b_ref[idx]
            z = jnp.maximum(z, 0.0).astype(bf16)
            return acc + jnp.dot(z, lin2_w_ref[idx], preferred_element_type=f32)

        ff = jax.lax.fori_loop(0, FFN_CHUNKS, ffn_chunk,
                               jnp.zeros((BS, D), f32), unroll=True)
        ff = ff + lin2_b_ref[l]
        h = _layer_norm(h + ff, ln2_w_ref[l], ln2_b_ref[l])

    # ---- last token per batch ----
    last = h.reshape(BATCH, SEQ, D)[:, SEQ - 1, :]        # (B, D)
    lastb = last.astype(bf16)

    # ---- MoE gate (softmax over experts) ----
    g = jnp.dot(lastb, gate_w_ref[...], preferred_element_type=f32) + gate_b_ref[...]
    g = g - jnp.max(g, axis=-1, keepdims=True)
    g = jnp.exp(g)
    g = g / jnp.sum(g, axis=-1, keepdims=True)            # (B, E), rows sum to 1

    # ---- experts + output head, pre-folded:  out = rowsum(g * (last @ W_fold + c_fold)) ----
    z = jnp.dot(lastb, moefc_w_ref[...], preferred_element_type=f32) + moefc_c_ref[...]  # (B, E)
    out_ref[...] = jnp.sum(g * z, axis=-1, keepdims=True)  # (B, 1)


@jax.jit
def moetr_forward(x, pp):
    # Whole problem (~0.6 MiB of bf16 weights + tiny activations) fits in VMEM:
    # one ungridded kernel invocation, full-array blocks, no vmem_limit override.
    out = pl.pallas_call(
        moetr_kernel,
        out_shape=jax.ShapeDtypeStruct((BATCH, OUTPUT_DIM), jnp.float32),
    )(
        x.reshape(BATCH * SEQ, INPUT_DIM),
        pp["pe"], pp["mask"],
        pp["emb_w"],
        pp["inproj_w"], pp["inproj_b"], pp["outproj_w"], pp["outproj_b"],
        pp["ln1_w"], pp["ln1_b"], pp["ln2_w"], pp["ln2_b"],
        pp["lin1_w"], pp["lin1_b"], pp["lin2_w"], pp["lin2_b"],
        pp["gate_w"], pp["gate_b"], pp["moefc_w"], pp["moefc_c"],
    )
    return jnp.squeeze(out, axis=-1)                      # matches .squeeze(-1).squeeze(-1) -> (B,)


# --------------------------------------------------------------------------------------
# Parameters
# --------------------------------------------------------------------------------------
def init_params(key):
    """f32 parameters in PyTorch nn.Linear (out_features, in_features) layout."""
    D, L, FF, E = MODEL_DIM, NUM_LAYERS, FFN_DIM, NUM_EXPERTS
    ks = jax.random.split(key, 13)
    s = 0.05
    return {
        "emb_w": s * jax.random.normal(ks[0], (D, INPUT_DIM), jnp.float32),
        "emb_b": s * jax.random.normal(ks[1], (D,), jnp.float32),
        "inproj_w": s * jax.random.normal(ks[2], (L, 3 * D, D), jnp.float32),
        "inproj_b": s * jax.random.normal(ks[3], (L, 3 * D), jnp.float32),
        "outproj_w": s * jax.random.normal(ks[4], (L, D, D), jnp.float32),
        "outproj_b": jnp.zeros((L, D), jnp.float32),
        "ln1_w": jnp.ones((L, D), jnp.float32),
        "ln1_b": jnp.zeros((L, D), jnp.float32),
        "ln2_w": jnp.ones((L, D), jnp.float32),
        "ln2_b": jnp.zeros((L, D), jnp.float32),
        "lin1_w": s * jax.random.normal(ks[5], (L, FF, D), jnp.float32),
        "lin1_b": s * jax.random.normal(ks[6], (L, FF), jnp.float32),
        "lin2_w": s * jax.random.normal(ks[7], (L, D, FF), jnp.float32),
        "lin2_b": jnp.zeros((L, D), jnp.float32),
        "gate_w": s * jax.random.normal(ks[8], (E, D), jnp.float32),
        "gate_b": jnp.zeros((E,), jnp.float32),
        "moe_w": s * jax.random.normal(ks[9], (E, D, D), jnp.float32),
        "moe_b": s * jax.random.normal(ks[10], (E, D), jnp.float32),
        "fc_w": s * jax.random.normal(ks[11], (OUTPUT_DIM, D), jnp.float32),
        "fc_b": s * jax.random.normal(ks[12], (OUTPUT_DIM,), jnp.float32),
    }


def prepare_params(p):
    """One-time layout/precision transform for the kernel:
       * transpose every Linear weight to (in, out) so the MXU gets K on sublanes, N on lanes
       * fold the 1/sqrt(Dh) attention scale into the q part of in_proj
       * split out_proj per head (removes the lane-axis concat of attention heads)
       * chunk the FFN weights along the 2048-wide axis (FFN_CHUNKS x 512)
       * fold the embedding bias into the pre-tiled positional-encoding table
       * fold the final Linear(D,1) head into the MoE experts:
           moefc_w[d,e] = sum_o moe_w[e,o,d] * fc_w[0,o]
           moefc_c[e]   = moe_b[e] . fc_w[0] + fc_b          (exact: gates sum to 1)
       * cast matmul weights to bf16 (biases / LayerNorm / masks stay f32)
       * build the block-diagonal attention mask over the flattened token axis.
    """
    D, L, E, H = MODEL_DIM, NUM_LAYERS, NUM_EXPERTS, NUM_HEADS
    Dh = D // H
    NCH, FC = FFN_CHUNKS, FFN_CHUNK
    bf16 = jnp.bfloat16
    scale = 1.0 / math.sqrt(Dh)

    inproj_w = p["inproj_w"].at[:, :D, :].multiply(scale)       # fold q scale into weights
    inproj_b = p["inproj_b"].at[:, :D].multiply(scale)          # ... and bias

    # out_proj: (L, D, D) torch (out,in) -> (L*H, Dh, D) per-head (in-chunk, out)
    outproj_w = jnp.transpose(p["outproj_w"], (0, 2, 1)).reshape(L * H, Dh, D)

    # FFN chunking: lin1 -> (L*NCH, D, FC), lin2 -> (L*NCH, FC, D)
    lin1_w = jnp.transpose(p["lin1_w"].reshape(L, NCH, FC, D), (0, 1, 3, 2)).reshape(L * NCH, D, FC)
    lin1_b = p["lin1_b"].reshape(L * NCH, 1, FC)
    lin2_w = jnp.transpose(p["lin2_w"], (0, 2, 1)).reshape(L * NCH, FC, D)

    # sinusoidal positional encoding (PyTorch formula), pre-tiled over flat tokens,
    # with the embedding bias folded in.
    pos = np.arange(MAX_SEQ_LEN, dtype=np.float32)[:, None]
    div = np.exp(np.arange(0, D, 2, dtype=np.float32) * (-math.log(10000.0) / D))
    pe = np.zeros((MAX_SEQ_LEN, D), dtype=np.float32)
    pe[:, 0::2] = np.sin(pos * div)
    pe[:, 1::2] = np.cos(pos * div)
    pe_flat = jnp.asarray(np.tile(pe[:SEQ], (BATCH, 1))) + p["emb_b"].reshape(1, D)   # (B*S, D)

    # block-diagonal additive attention mask over flattened tokens
    tok_batch = np.arange(BATCH * SEQ) // SEQ
    mask = np.where(tok_batch[:, None] == tok_batch[None, :], 0.0, -1e9).astype(np.float32)

    # MoE experts folded with the final Linear(D, 1) head
    w_fc = p["fc_w"][0]                                                # (D,)
    moefc_w = jnp.einsum("eod,o->de", p["moe_w"], w_fc)                # (D, E)
    moefc_c = (p["moe_b"] @ w_fc + p["fc_b"][0]).reshape(1, E)         # (1, E)

    return {
        "pe": pe_flat,
        "mask": jnp.asarray(mask),
        "emb_w": p["emb_w"].T.astype(bf16),                     # (IN, D)
        "inproj_w": jnp.transpose(inproj_w, (0, 2, 1)).astype(bf16),   # (L, D, 3D)
        "inproj_b": inproj_b.reshape(L, 1, 3 * D),
        "outproj_w": outproj_w.astype(bf16),                    # (L*H, Dh, D)
        "outproj_b": p["outproj_b"].reshape(L, 1, D),
        "ln1_w": p["ln1_w"].reshape(L, 1, D), "ln1_b": p["ln1_b"].reshape(L, 1, D),
        "ln2_w": p["ln2_w"].reshape(L, 1, D), "ln2_b": p["ln2_b"].reshape(L, 1, D),
        "lin1_w": lin1_w.astype(bf16), "lin1_b": lin1_b,
        "lin2_w": lin2_w.astype(bf16), "lin2_b": p["lin2_b"].reshape(L, 1, D),
        "gate_w": p["gate_w"].T.astype(bf16),                   # (D, E)
        "gate_b": p["gate_b"].reshape(1, E),
        "moefc_w": moefc_w.astype(bf16),                        # (D, E)
        "moefc_c": moefc_c,                                     # (1, E) f32
    }


# --------------------------------------------------------------------------------------
# Pure-JAX reference (same math / same prepared bf16 weights, f32 accumulation)
# --------------------------------------------------------------------------------------
def reference_forward(x, pp):
    f32, bf16 = jnp.float32, jnp.bfloat16
    BS = BATCH * SEQ
    D, H, Dh = MODEL_DIM, NUM_HEADS, MODEL_DIM // NUM_HEADS

    h = jnp.dot(x.reshape(BS, INPUT_DIM).astype(bf16), pp["emb_w"],
                preferred_element_type=f32) + pp["pe"]
    mask = pp["mask"]

    for l in range(NUM_LAYERS):
        hb = h.astype(bf16)
        qkv = jnp.dot(hb, pp["inproj_w"][l], preferred_element_type=f32) + pp["inproj_b"][l]
        attn = jnp.zeros((BS, D), f32)
        for hh in range(H):
            o0 = hh * Dh
            qh = qkv[:, o0:o0 + Dh].astype(bf16)
            kh = qkv[:, D + o0:D + o0 + Dh].astype(bf16)
            vh = qkv[:, 2 * D + o0:2 * D + o0 + Dh].astype(bf16)
            s = jnp.einsum("qd,kd->qk", qh, kh, preferred_element_type=f32) + mask
            s = s - jnp.max(s, axis=-1, keepdims=True)
            p = jnp.exp(s)
            p = p / jnp.sum(p, axis=-1, keepdims=True)
            oh = jnp.dot(p.astype(bf16), vh, preferred_element_type=f32)
            attn = attn + jnp.dot(oh.astype(bf16), pp["outproj_w"][l * H + hh],
                                  preferred_element_type=f32)
        attn = attn + pp["outproj_b"][l]
        h = _layer_norm(h + attn, pp["ln1_w"][l], pp["ln1_b"][l])

        hb = h.astype(bf16)
        ff = jnp.zeros((BS, D), f32)
        for c in range(FFN_CHUNKS):
            idx = l * FFN_CHUNKS + c
            z = jnp.dot(hb, pp["lin1_w"][idx], preferred_element_type=f32) + pp["lin1_b"][idx]
            z = jnp.maximum(z, 0.0).astype(bf16)
            ff = ff + jnp.dot(z, pp["lin2_w"][idx], preferred_element_type=f32)
        ff = ff + pp["lin2_b"][l]
        h = _layer_norm(h + ff, pp["ln2_w"][l], pp["ln2_b"][l])

    last = h.reshape(BATCH, SEQ, D)[:, SEQ - 1, :]
    lastb = last.astype(bf16)
    g = jnp.dot(lastb, pp["gate_w"], preferred_element_type=f32) + pp["gate_b"]
    g = jax.nn.softmax(g, axis=-1)
    z = jnp.dot(lastb, pp["moefc_w"], preferred_element_type=f32) + pp["moefc_c"]
    out = jnp.sum(g * z, axis=-1, keepdims=True)
    return jnp.squeeze(out, axis=-1)


if __name__ == "__main__":
    key = jax.random.PRNGKey(0)
    kx, kp = jax.random.split(key)
    x = jax.random.normal(kx, (BATCH, SEQ, INPUT_DIM), jnp.float32)

    params = init_params(kp)
    pp = prepare_params(params)

    out = jax.block_until_ready(moetr_forward(x, pp))
    ref = jax.block_until_ready(reference_forward(x, pp))

    assert out.shape == (BATCH,)
    np.testing.assert_allclose(np.asarray(out), np.asarray(ref), rtol=2e-3, atol=2e-3)

    print("KERNEL_OK")
</pallas_src>

<mosaic_0001>
module attributes {stable_mosaic.version = 11 : i64} {
  func.func @moetr_kernel(%arg0: memref<16x16xf32, #tpu.memory_space<vmem>>, %arg1: memref<16x32xf32, #tpu.memory_space<vmem>>, %arg2: memref<16x16xf32, #tpu.memory_space<vmem>>, %arg3: memref<16x32xbf16, #tpu.memory_space<vmem>>, %arg4: memref<2x32x96xbf16, #tpu.memory_space<vmem>>, %arg5: memref<2x1x96xf32, #tpu.memory_space<vmem>>, %arg6: memref<8x8x32xbf16, #tpu.memory_space<vmem>>, %arg7: memref<2x1x32xf32, #tpu.memory_space<vmem>>, %arg8: memref<2x1x32xf32, #tpu.memory_space<vmem>>, %arg9: memref<2x1x32xf32, #tpu.memory_space<vmem>>, %arg10: memref<2x1x32xf32, #tpu.memory_space<vmem>>, %arg11: memref<2x1x32xf32, #tpu.memory_space<vmem>>, %arg12: memref<8x32x512xbf16, #tpu.memory_space<vmem>>, %arg13: memref<8x1x512xf32, #tpu.memory_space<vmem>>, %arg14: memref<8x512x32xbf16, #tpu.memory_space<vmem>>, %arg15: memref<2x1x32xf32, #tpu.memory_space<vmem>>, %arg16: memref<32x8xbf16, #tpu.memory_space<vmem>>, %arg17: memref<1x8xf32, #tpu.memory_space<vmem>>, %arg18: memref<32x8xbf16, #tpu.memory_space<vmem>>, %arg19: memref<1x8xf32, #tpu.memory_space<vmem>>, %arg20: memref<2x1xf32, #tpu.memory_space<vmem>>) attributes {dimension_semantics = [], scalar_prefetch = 0 : i64, scratch_operands = 0 : i64, tpu.core_type = #tpu.core_type<tc>} {
    %c0 = arith.constant 0 : index
    %c0_0 = arith.constant 0 : index
    %0 = vector.load %arg0[%c0, %c0_0] : memref<16x16xf32, #tpu.memory_space<vmem>>, vector<16x16xf32>
    %1 = arith.truncf %0 : vector<16x16xf32> to vector<16x16xbf16>
    %c0_1 = arith.constant 0 : index
    %c0_2 = arith.constant 0 : index
    %2 = vector.load %arg3[%c0_1, %c0_2] : memref<16x32xbf16, #tpu.memory_space<vmem>>, vector<16x32xbf16>
    %cst = arith.constant dense<0.000000e+00> : vector<16x32xf32>
    %3 = tpu.matmul %1, %2, %cst {dimension_numbers = #tpu.dot_dimension_numbers<[1], [0], [0], [1], [0, 0, 1, 1], [], []>} : vector<16x16xbf16>, vector<16x32xbf16>, vector<16x32xf32> -> vector<16x32xf32>
    %c0_3 = arith.constant 0 : index
    %c0_4 = arith.constant 0 : index
    %4 = vector.load %arg1[%c0_3, %c0_4] : memref<16x32xf32, #tpu.memory_space<vmem>>, vector<16x32xf32>
    %5 = arith.addf %3, %4 : vector<16x32xf32>
    %c0_5 = arith.constant 0 : index
    %c0_6 = arith.constant 0 : index
    %6 = vector.load %arg2[%c0_5, %c0_6] : memref<16x16xf32, #tpu.memory_space<vmem>>, vector<16x16xf32>
    %7 = arith.truncf %5 : vector<16x32xf32> to vector<16x32xbf16>
    %c0_7 = arith.constant 0 : index
    %c0_8 = arith.constant 0 : index
    %c0_9 = arith.constant 0 : index
    %8 = vector.load %arg4[%c0_7, %c0_8, %c0_9] : memref<2x32x96xbf16, #tpu.memory_space<vmem>>, vector<1x32x96xbf16>
    %9 = vector.shape_cast %8 : vector<1x32x96xbf16> to vector<32x96xbf16>
    %cst_10 = arith.constant dense<0.000000e+00> : vector<16x96xf32>
    %10 = tpu.matmul %7, %9, %cst_10 {dimension_numbers = #tpu.dot_dimension_numbers<[1], [0], [0], [1], [0, 0, 1, 1], [], []>} : vector<16x32xbf16>, vector<32x96xbf16>, vector<16x96xf32> -> vector<16x96xf32>
    %c0_11 = arith.constant 0 : index
    %c0_12 = arith.constant 0 : index
    %c0_13 = arith.constant 0 : index
    %11 = vector.load %arg5[%c0_11, %c0_12, %c0_13] : memref<2x1x96xf32, #tpu.memory_space<vmem>>, vector<1x1x96xf32>
    %12 = vector.shape_cast %11 : vector<1x1x96xf32> to vector<1x96xf32>
    %13 = vector.broadcast %12 : vector<1x96xf32> to vector<16x96xf32>
    %14 = arith.addf %10, %13 : vector<16x96xf32>
    %cst_14 = arith.constant 0.000000e+00 : f32
    %15 = vector.broadcast %cst_14 : f32 to vector<16x32xf32>
    %16 = vector.extract_strided_slice %14 {offsets = [0, 0], sizes = [16, 8], strides = [1, 1]} : vector<16x96xf32> to vector<16x8xf32>
    %17 = arith.truncf %16 : vector<16x8xf32> to vector<16x8xbf16>
    %18 = vector.extract_strided_slice %14 {offsets = [0, 32], sizes = [16, 8], strides = [1, 1]} : vector<16x96xf32> to vector<16x8xf32>
    %19 = arith.truncf %18 : vector<16x8xf32> to vector<16x8xbf16>
    %20 = vector.extract_strided_slice %14 {offsets = [0, 64], sizes = [16, 8], strides = [1, 1]} : vector<16x96xf32> to vector<16x8xf32>
    %21 = arith.truncf %20 : vector<16x8xf32> to vector<16x8xbf16>
    "tpu.trace_start"() <{level = 10 : i32, message = "qd,kd->qk"}> : () -> ()
    %cst_15 = arith.constant dense<0.000000e+00> : vector<16x16xf32>
    %22 = tpu.matmul %17, %19, %cst_15 {dimension_numbers = #tpu.dot_dimension_numbers<[1], [1], [0], [0], [0, 0, 1, 0], [], []>} : vector<16x8xbf16>, vector<16x8xbf16>, vector<16x16xf32> -> vector<16x16xf32>
    "tpu.trace_stop"() : () -> ()
    %23 = arith.addf %22, %6 : vector<16x16xf32>
    %cst_16 = arith.constant dense<0xFF800000> : vector<16xf32>
    %24 = vector.multi_reduction <maximumf>, %23, %cst_16 [1] : vector<16x16xf32> to vector<16xf32>
    %25 = vector.shape_cast %24 : vector<16xf32> to vector<16x1xf32>
    %26 = vector.broadcast %25 : vector<16x1xf32> to vector<16x16xf32>
    %27 = arith.subf %23, %26 : vector<16x16xf32>
    %28 = math.exp %27 : vector<16x16xf32>
    %cst_17 = arith.constant dense<0.000000e+00> : vector<16xf32>
    %29 = vector.multi_reduction <add>, %28, %cst_17 [1] : vector<16x16xf32> to vector<16xf32>
    %30 = vector.shape_cast %29 : vector<16xf32> to vector<16x1xf32>
    %31 = vector.broadcast %30 : vector<16x1xf32> to vector<16x16xf32>
    %32 = arith.divf %28, %31 : vector<16x16xf32>
    %33 = arith.truncf %32 : vector<16x16xf32> to vector<16x16xbf16>
    %cst_18 = arith.constant dense<0.000000e+00> : vector<16x8xf32>
    %34 = tpu.matmul %33, %21, %cst_18 {dimension_numbers = #tpu.dot_dimension_numbers<[1], [0], [0], [1], [0, 0, 1, 1], [], []>} : vector<16x16xbf16>, vector<16x8xbf16>, vector<16x8xf32> -> vector<16x8xf32>
    %35 = arith.truncf %34 : vector<16x8xf32> to vector<16x8xbf16>
    %c0_19 = arith.constant 0 : index
    %c0_20 = arith.constant 0 : index
    %c0_21 = arith.constant 0 : index
    %36 = vector.load %arg6[%c0_19, %c0_20, %c0_21] : memref<8x8x32xbf16, #tpu.memory_space<vmem>>, vector<1x8x32xbf16>
    %37 = vector.shape_cast %36 : vector<1x8x32xbf16> to vector<8x32xbf16>
    %cst_22 = arith.constant dense<0.000000e+00> : vector<16x32xf32>
    %38 = tpu.matmul %35, %37, %cst_22 {dimension_numbers = #tpu.dot_dimension_numbers<[1], [0], [0], [1], [0, 0, 1, 1], [], []>} : vector<16x8xbf16>, vector<8x32xbf16>, vector<16x32xf32> -> vector<16x32xf32>
    %39 = arith.addf %15, %38 : vector<16x32xf32>
    %40 = vector.extract_strided_slice %14 {offsets = [0, 8], sizes = [16, 8], strides = [1, 1]} : vector<16x96xf32> to vector<16x8xf32>
    %41 = arith.truncf %40 : vector<16x8xf32> to vector<16x8xbf16>
    %42 = vector.extract_strided_slice %14 {offsets = [0, 40], sizes = [16, 8], strides = [1, 1]} : vector<16x96xf32> to vector<16x8xf32>
    %43 = arith.truncf %42 : vector<16x8xf32> to vector<16x8xbf16>
    %44 = vector.extract_strided_slice %14 {offsets = [0, 72], sizes = [16, 8], strides = [1, 1]} : vector<16x96xf32> to vector<16x8xf32>
    %45 = arith.truncf %44 : vector<16x8xf32> to vector<16x8xbf16>
    "tpu.trace_start"() <{level = 10 : i32, message = "qd,kd->qk"}> : () -> ()
    %cst_23 = arith.constant dense<0.000000e+00> : vector<16x16xf32>
    %46 = tpu.matmul %41, %43, %cst_23 {dimension_numbers = #tpu.dot_dimension_numbers<[1], [1], [0], [0], [0, 0, 1, 0], [], []>} : vector<16x8xbf16>, vector<16x8xbf16>, vector<16x16xf32> -> vector<16x16xf32>
    "tpu.trace_stop"() : () -> ()
    %47 = arith.addf %46, %6 : vector<16x16xf32>
    %cst_24 = arith.constant dense<0xFF800000> : vector<16xf32>
    %48 = vector.multi_reduction <maximumf>, %47, %cst_24 [1] : vector<16x16xf32> to vector<16xf32>
    %49 = vector.shape_cast %48 : vector<16xf32> to vector<16x1xf32>
    %50 = vector.broadcast %49 : vector<16x1xf32> to vector<16x16xf32>
    %51 = arith.subf %47, %50 : vector<16x16xf32>
    %52 = math.exp %51 : vector<16x16xf32>
    %cst_25 = arith.constant dense<0.000000e+00> : vector<16xf32>
    %53 = vector.multi_reduction <add>, %52, %cst_25 [1] : vector<16x16xf32> to vector<16xf32>
    %54 = vector.shape_cast %53 : vector<16xf32> to vector<16x1xf32>
    %55 = vector.broadcast %54 : vector<16x1xf32> to vector<16x16xf32>
    %56 = arith.divf %52, %55 : vector<16x16xf32>
    %57 = arith.truncf %56 : vector<16x16xf32> to vector<16x16xbf16>
    %cst_26 = arith.constant dense<0.000000e+00> : vector<16x8xf32>
    %58 = tpu.matmul %57, %45, %cst_26 {dimension_numbers = #tpu.dot_dimension_numbers<[1], [0], [0], [1], [0, 0, 1, 1], [], []>} : vector<16x16xbf16>, vector<16x8xbf16>, vector<16x8xf32> -> vector<16x8xf32>
    %59 = arith.truncf %58 : vector<16x8xf32> to vector<16x8xbf16>
    %c1 = arith.constant 1 : index
    %c0_27 = arith.constant 0 : index
    %c0_28 = arith.constant 0 : index
    %60 = vector.load %arg6[%c1, %c0_27, %c0_28] : memref<8x8x32xbf16, #tpu.memory_space<vmem>>, vector<1x8x32xbf16>
    %61 = vector.shape_cast %60 : vector<1x8x32xbf16> to vector<8x32xbf16>
    %cst_29 = arith.constant dense<0.000000e+00> : vector<16x32xf32>
    %62 = tpu.matmul %59, %61, %cst_29 {dimension_numbers = #tpu.dot_dimension_numbers<[1], [0], [0], [1], [0, 0, 1, 1], [], []>} : vector<16x8xbf16>, vector<8x32xbf16>, vector<16x32xf32> -> vector<16x32xf32>
    %63 = arith.addf %39, %62 : vector<16x32xf32>
    %64 = vector.extract_strided_slice %14 {offsets = [0, 16], sizes = [16, 8], strides = [1, 1]} : vector<16x96xf32> to vector<16x8xf32>
    %65 = arith.truncf %64 : vector<16x8xf32> to vector<16x8xbf16>
    %66 = vector.extract_strided_slice %14 {offsets = [0, 48], sizes = [16, 8], strides = [1, 1]} : vector<16x96xf32> to vector<16x8xf32>
    %67 = arith.truncf %66 : vector<16x8xf32> to vector<16x8xbf16>
    %68 = vector.extract_strided_slice %14 {offsets = [0, 80], sizes = [16, 8], strides = [1, 1]} : vector<16x96xf32> to vector<16x8xf32>
    %69 = arith.truncf %68 : vector<16x8xf32> to vector<16x8xbf16>
    "tpu.trace_start"() <{level = 10 : i32, message = "qd,kd->qk"}> : () -> ()
    %cst_30 = arith.constant dense<0.000000e+00> : vector<16x16xf32>
    %70 = tpu.matmul %65, %67, %cst_30 {dimension_numbers = #tpu.dot_dimension_numbers<[1], [1], [0], [0], [0, 0, 1, 0], [], []>} : vector<16x8xbf16>, vector<16x8xbf16>, vector<16x16xf32> -> vector<16x16xf32>
    "tpu.trace_stop"() : () -> ()
    %71 = arith.addf %70, %6 : vector<16x16xf32>
    %cst_31 = arith.constant dense<0xFF800000> : vector<16xf32>
    %72 = vector.multi_reduction <maximumf>, %71, %cst_31 [1] : vector<16x16xf32> to vector<16xf32>
    %73 = vector.shape_cast %72 : vector<16xf32> to vector<16x1xf32>
    %74 = vector.broadcast %73 : vector<16x1xf32> to vector<16x16xf32>
    %75 = arith.subf %71, %74 : vector<16x16xf32>
    %76 = math.exp %75 : vector<16x16xf32>
    %cst_32 = arith.constant dense<0.000000e+00> : vector<16xf32>
    %77 = vector.multi_reduction <add>, %76, %cst_32 [1] : vector<16x16xf32> to vector<16xf32>
    %78 = vector.shape_cast %77 : vector<16xf32> to vector<16x1xf32>
    %79 = vector.broadcast %78 : vector<16x1xf32> to vector<16x16xf32>
    %80 = arith.divf %76, %79 : vector<16x16xf32>
    %81 = arith.truncf %80 : vector<16x16xf32> to vector<16x16xbf16>
    %cst_33 = arith.constant dense<0.000000e+00> : vector<16x8xf32>
    %82 = tpu.matmul %81, %69, %cst_33 {dimension_numbers = #tpu.dot_dimension_numbers<[1], [0], [0], [1], [0, 0, 1, 1], [], []>} : vector<16x16xbf16>, vector<16x8xbf16>, vector<16x8xf32> -> vector<16x8xf32>
    %83 = arith.truncf %82 : vector<16x8xf32> to vector<16x8xbf16>
    %c2 = arith.constant 2 : index
    %c0_34 = arith.constant 0 : index
    %c0_35 = arith.constant 0 : index
    %84 = vector.load %arg6[%c2, %c0_34, %c0_35] : memref<8x8x32xbf16, #tpu.memory_space<vmem>>, vector<1x8x32xbf16>
    %85 = vector.shape_cast %84 : vector<1x8x32xbf16> to vector<8x32xbf16>
    %cst_36 = arith.constant dense<0.000000e+00> : vector<16x32xf32>
    %86 = tpu.matmul %83, %85, %cst_36 {dimension_numbers = #tpu.dot_dimension_numbers<[1], [0], [0], [1], [0, 0, 1, 1], [], []>} : vector<16x8xbf16>, vector<8x32xbf16>, vector<16x32xf32> -> vector<16x32xf32>
    %87 = arith.addf %63, %86 : vector<16x32xf32>
    %88 = vector.extract_strided_slice %14 {offsets = [0, 24], sizes = [16, 8], strides = [1, 1]} : vector<16x96xf32> to vector<16x8xf32>
    %89 = arith.truncf %88 : vector<16x8xf32> to vector<16x8xbf16>
    %90 = vector.extract_strided_slice %14 {offsets = [0, 56], sizes = [16, 8], strides = [1, 1]} : vector<16x96xf32> to vector<16x8xf32>
    %91 = arith.truncf %90 : vector<16x8xf32> to vector<16x8xbf16>
    %92 = vector.extract_strided_slice %14 {offsets = [0, 88], sizes = [16, 8], strides = [1, 1]} : vector<16x96xf32> to vector<16x8xf32>
    %93 = arith.truncf %92 : vector<16x8xf32> to vector<16x8xbf16>
    "tpu.trace_start"() <{level = 10 : i32, message = "qd,kd->qk"}> : () -> ()
    %cst_37 = arith.constant dense<0.000000e+00> : vector<16x16xf32>
    %94 = tpu.matmul %89, %91, %cst_37 {dimension_numbers = #tpu.dot_dimension_numbers<[1], [1], [0], [0], [0, 0, 1, 0], [], []>} : vector<16x8xbf16>, vector<16x8xbf16>, vector<16x16xf32> -> vector<16x16xf32>
    "tpu.trace_stop"() : () -> ()
    %95 = arith.addf %94, %6 : vector<16x16xf32>
    %cst_38 = arith.constant dense<0xFF800000> : vector<16xf32>
    %96 = vector.multi_reduction <maximumf>, %95, %cst_38 [1] : vector<16x16xf32> to vector<16xf32>
    %97 = vector.shape_cast %96 : vector<16xf32> to vector<16x1xf32>
    %98 = vector.broadcast %97 : vector<16x1xf32> to vector<16x16xf32>
    %99 = arith.subf %95, %98 : vector<16x16xf32>
    %100 = math.exp %99 : vector<16x16xf32>
    %cst_39 = arith.constant dense<0.000000e+00> : vector<16xf32>
    %101 = vector.multi_reduction <add>, %100, %cst_39 [1] : vector<16x16xf32> to vector<16xf32>
    %102 = vector.shape_cast %101 : vector<16xf32> to vector<16x1xf32>
    %103 = vector.broadcast %102 : vector<16x1xf32> to vector<16x16xf32>
    %104 = arith.divf %100, %103 : vector<16x16xf32>
    %105 = arith.truncf %104 : vector<16x16xf32> to vector<16x16xbf16>
    %cst_40 = arith.constant dense<0.000000e+00> : vector<16x8xf32>
    %106 = tpu.matmul %105, %93, %cst_40 {dimension_numbers = #tpu.dot_dimension_numbers<[1], [0], [0], [1], [0, 0, 1, 1], [], []>} : vector<16x16xbf16>, vector<16x8xbf16>, vector<16x8xf32> -> vector<16x8xf32>
    %107 = arith.truncf %106 : vector<16x8xf32> to vector<16x8xbf16>
    %c3 = arith.constant 3 : index
    %c0_41 = arith.constant 0 : index
    %c0_42 = arith.constant 0 : index
    %108 = vector.load %arg6[%c3, %c0_41, %c0_42] : memref<8x8x32xbf16, #tpu.memory_space<vmem>>, vector<1x8x32xbf16>
    %109 = vector.shape_cast %108 : vector<1x8x32xbf16> to vector<8x32xbf16>
    %cst_43 = arith.constant dense<0.000000e+00> : vector<16x32xf32>
    %110 = tpu.matmul %107, %109, %cst_43 {dimension_numbers = #tpu.dot_dimension_numbers<[1], [0], [0], [1], [0, 0, 1, 1], [], []>} : vector<16x8xbf16>, vector<8x32xbf16>, vector<16x32xf32> -> vector<16x32xf32>
    %111 = arith.addf %87, %110 : vector<16x32xf32>
    %c0_44 = arith.constant 0 : index
    %c0_45 = arith.constant 0 : index
    %c0_46 = arith.constant 0 : index
    %112 = vector.load %arg7[%c0_44, %c0_45, %c0_46] : memref<2x1x32xf32, #tpu.memory_space<vmem>>, vector<1x1x32xf32>
    %113 = vector.shape_cast %112 : vector<1x1x32xf32> to vector<1x32xf32>
    %114 = vector.broadcast %113 : vector<1x32xf32> to vector<16x32xf32>
    %115 = arith.addf %111, %114 : vector<16x32xf32>
    %116 = arith.addf %5, %115 : vector<16x32xf32>
    %c0_47 = arith.constant 0 : index
    %c0_48 = arith.constant 0 : index
    %c0_49 = arith.constant 0 : index
    %117 = vector.load %arg8[%c0_47, %c0_48, %c0_49] : memref<2x1x32xf32, #tpu.memory_space<vmem>>, vector<1x1x32xf32>
    %118 = vector.shape_cast %117 : vector<1x1x32xf32> to vector<1x32xf32>
    %c0_50 = arith.constant 0 : index
    %c0_51 = arith.constant 0 : index
    %c0_52 = arith.constant 0 : index
    %119 = vector.load %arg9[%c0_50, %c0_51, %c0_52] : memref<2x1x32xf32, #tpu.memory_space<vmem>>, vector<1x1x32xf32>
    %120 = vector.shape_cast %119 : vector<1x1x32xf32> to vector<1x32xf32>
    %cst_53 = arith.constant dense<0.000000e+00> : vector<16xf32>
    %121 = vector.multi_reduction <add>, %116, %cst_53 [1] : vector<16x32xf32> to vector<16xf32>
    %122 = vector.shape_cast %121 : vector<16xf32> to vector<16x1xf32>
    %cst_54 = arith.constant 3.200000e+01 : f32
    %123 = vector.broadcast %cst_54 : f32 to vector<16x1xf32>
    %124 = arith.divf %122, %123 : vector<16x1xf32>
    %125 = vector.broadcast %124 : vector<16x1xf32> to vector<16x32xf32>
    %126 = arith.subf %116, %125 : vector<16x32xf32>
    %127 = arith.mulf %126, %126 : vector<16x32xf32>
    %cst_55 = arith.constant dense<0.000000e+00> : vector<16xf32>
    %128 = vector.multi_reduction <add>, %127, %cst_55 [1] : vector<16x32xf32> to vector<16xf32>
    %129 = vector.shape_cast %128 : vector<16xf32> to vector<16x1xf32>
    %cst_56 = arith.constant 3.200000e+01 : f32
    %130 = vector.broadcast %cst_56 : f32 to vector<16x1xf32>
    %131 = arith.divf %129, %130 : vector<16x1xf32>
    %132 = vector.broadcast %124 : vector<16x1xf32> to vector<16x32xf32>
    %133 = arith.subf %116, %132 : vector<16x32xf32>
    %cst_57 = arith.constant 9.99999974E-6 : f32
    %134 = vector.broadcast %cst_57 : f32 to vector<16x1xf32>
    %135 = arith.addf %131, %134 : vector<16x1xf32>
    %136 = math.rsqrt %135 : vector<16x1xf32>
    %137 = vector.broadcast %136 : vector<16x1xf32> to vector<16x32xf32>
    %138 = arith.mulf %133, %137 : vector<16x32xf32>
    %139 = vector.broadcast %118 : vector<1x32xf32> to vector<16x32xf32>
    %140 = arith.mulf %138, %139 : vector<16x32xf32>
    %141 = vector.broadcast %120 : vector<1x32xf32> to vector<16x32xf32>
    %142 = arith.addf %140, %141 : vector<16x32xf32>
    %143 = arith.truncf %142 : vector<16x32xf32> to vector<16x32xbf16>
    %cst_58 = arith.constant 0.000000e+00 : f32
    %144 = vector.broadcast %cst_58 : f32 to vector<16x32xf32>
    %c0_i32 = arith.constant 0 : i32
    %c0_i32_59 = arith.constant 0 : i32
    %145 = arith.addi %c0_i32_59, %c0_i32 : i32
    %146 = arith.index_cast %145 : i32 to index
    %c0_60 = arith.constant 0 : index
    %c0_61 = arith.constant 0 : index
    %147 = vector.load %arg12[%146, %c0_60, %c0_61] : memref<8x32x512xbf16, #tpu.memory_space<vmem>>, vector<1x32x512xbf16>
    %148 = vector.shape_cast %147 : vector<1x32x512xbf16> to vector<32x512xbf16>
    %cst_62 = arith.constant dense<0.000000e+00> : vector<16x512xf32>
    %149 = tpu.matmul %143, %148, %cst_62 {dimension_numbers = #tpu.dot_dimension_numbers<[1], [0], [0], [1], [0, 0, 1, 1], [], []>} : vector<16x32xbf16>, vector<32x512xbf16>, vector<16x512xf32> -> vector<16x512xf32>
    %150 = arith.index_cast %145 : i32 to index
    %c0_63 = arith.constant 0 : index
    %c0_64 = arith.constant 0 : index
    %151 = vector.load %arg13[%150, %c0_63, %c0_64] : memref<8x1x512xf32, #tpu.memory_space<vmem>>, vector<1x1x512xf32>
    %152 = vector.shape_cast %151 : vector<1x1x512xf32> to vector<1x512xf32>
    %153 = vector.broadcast %152 : vector<1x512xf32> to vector<16x512xf32>
    %154 = arith.addf %149, %153 : vector<16x512xf32>
    %cst_65 = arith.constant 0.000000e+00 : f32
    %155 = vector.broadcast %cst_65 : f32 to vector<16x512xf32>
    %156 = arith.maximumf %154, %155 : vector<16x512xf32>
    %157 = arith.truncf %156 : vector<16x512xf32> to vector<16x512xbf16>
    %158 = arith.index_cast %145 : i32 to index
    %c0_66 = arith.constant 0 : index
    %c0_67 = arith.constant 0 : index
    %159 = vector.load %arg14[%158, %c0_66, %c0_67] : memref<8x512x32xbf16, #tpu.memory_space<vmem>>, vector<1x512x32xbf16>
    %160 = vector.shape_cast %159 : vector<1x512x32xbf16> to vector<512x32xbf16>
    %cst_68 = arith.constant dense<0.000000e+00> : vector<16x32xf32>
    %161 = tpu.matmul %157, %160, %cst_68 {dimension_numbers = #tpu.dot_dimension_numbers<[1], [0], [0], [1], [0, 0, 1, 1], [], []>} : vector<16x512xbf16>, vector<512x32xbf16>, vector<16x32xf32> -> vector<16x32xf32>
    %162 = arith.addf %144, %161 : vector<16x32xf32>
    %c1_i32 = arith.constant 1 : i32
    %c0_i32_69 = arith.constant 0 : i32
    %163 = arith.addi %c0_i32_69, %c1_i32 : i32
    %164 = arith.index_cast %163 : i32 to index
    %c0_70 = arith.constant 0 : index
    %c0_71 = arith.constant 0 : index
    %165 = vector.load %arg12[%164, %c0_70, %c0_71] : memref<8x32x512xbf16, #tpu.memory_space<vmem>>, vector<1x32x512xbf16>
    %166 = vector.shape_cast %165 : vector<1x32x512xbf16> to vector<32x512xbf16>
    %cst_72 = arith.constant dense<0.000000e+00> : vector<16x512xf32>
    %167 = tpu.matmul %143, %166, %cst_72 {dimension_numbers = #tpu.dot_dimension_numbers<[1], [0], [0], [1], [0, 0, 1, 1], [], []>} : vector<16x32xbf16>, vector<32x512xbf16>, vector<16x512xf32> -> vector<16x512xf32>
    %168 = arith.index_cast %163 : i32 to index
    %c0_73 = arith.constant 0 : index
    %c0_74 = arith.constant 0 : index
    %169 = vector.load %arg13[%168, %c0_73, %c0_74] : memref<8x1x512xf32, #tpu.memory_space<vmem>>, vector<1x1x512xf32>
    %170 = vector.shape_cast %169 : vector<1x1x512xf32> to vector<1x512xf32>
    %171 = vector.broadcast %170 : vector<1x512xf32> to vector<16x512xf32>
    %172 = arith.addf %167, %171 : vector<16x512xf32>
    %cst_75 = arith.constant 0.000000e+00 : f32
    %173 = vector.broadcast %cst_75 : f32 to vector<16x512xf32>
    %174 = arith.maximumf %172, %173 : vector<16x512xf32>
    %175 = arith.truncf %174 : vector<16x512xf32> to vector<16x512xbf16>
    %176 = arith.index_cast %163 : i32 to index
    %c0_76 = arith.constant 0 : index
    %c0_77 = arith.constant 0 : index
    %177 = vector.load %arg14[%176, %c0_76, %c0_77] : memref<8x512x32xbf16, #tpu.memory_space<vmem>>, vector<1x512x32xbf16>
    %178 = vector.shape_cast %177 : vector<1x512x32xbf16> to vector<512x32xbf16>
    %cst_78 = arith.constant dense<0.000000e+00> : vector<16x32xf32>
    %179 = tpu.matmul %175, %178, %cst_78 {dimension_numbers = #tpu.dot_dimension_numbers<[1], [0], [0], [1], [0, 0, 1, 1], [], []>} : vector<16x512xbf16>, vector<512x32xbf16>, vector<16x32xf32> -> vector<16x32xf32>
    %180 = arith.addf %162, %179 : vector<16x32xf32>
    %c2_i32 = arith.constant 2 : i32
    %c0_i32_79 = arith.constant 0 : i32
    %181 = arith.addi %c0_i32_79, %c2_i32 : i32
    %182 = arith.index_cast %181 : i32 to index
    %c0_80 = arith.constant 0 : index
    %c0_81 = arith.constant 0 : index
    %183 = vector.load %arg12[%182, %c0_80, %c0_81] : memref<8x32x512xbf16, #tpu.memory_space<vmem>>, vector<1x32x512xbf16>
    %184 = vector.shape_cast %183 : vector<1x32x512xbf16> to vector<32x512xbf16>
    %cst_82 = arith.constant dense<0.000000e+00> : vector<16x512xf32>
    %185 = tpu.matmul %143, %184, %cst_82 {dimension_numbers = #tpu.dot_dimension_numbers<[1], [0], [0], [1], [0, 0, 1, 1], [], []>} : vector<16x32xbf16>, vector<32x512xbf16>, vector<16x512xf32> -> vector<16x512xf32>
    %186 = arith.index_cast %181 : i32 to index
    %c0_83 = arith.constant 0 : index
    %c0_84 = arith.constant 0 : index
    %187 = vector.load %arg13[%186, %c0_83, %c0_84] : memref<8x1x512xf32, #tpu.memory_space<vmem>>, vector<1x1x512xf32>
    %188 = vector.shape_cast %187 : vector<1x1x512xf32> to vector<1x512xf32>
    %189 = vector.broadcast %188 : vector<1x512xf32> to vector<16x512xf32>
    %190 = arith.addf %185, %189 : vector<16x512xf32>
    %cst_85 = arith.constant 0.000000e+00 : f32
    %191 = vector.broadcast %cst_85 : f32 to vector<16x512xf32>
    %192 = arith.maximumf %190, %191 : vector<16x512xf32>
    %193 = arith.truncf %192 : vector<16x512xf32> to vector<16x512xbf16>
    %194 = arith.index_cast %181 : i32 to index
    %c0_86 = arith.constant 0 : index
    %c0_87 = arith.constant 0 : index
    %195 = vector.load %arg14[%194, %c0_86, %c0_87] : memref<8x512x32xbf16, #tpu.memory_space<vmem>>, vector<1x512x32xbf16>
    %196 = vector.shape_cast %195 : vector<1x512x32xbf16> to vector<512x32xbf16>
    %cst_88 = arith.constant dense<0.000000e+00> : vector<16x32xf32>
    %197 = tpu.matmul %193, %196, %cst_88 {dimension_numbers = #tpu.dot_dimension_numbers<[1], [0], [0], [1], [0, 0, 1, 1], [], []>} : vector<16x512xbf16>, vector<512x32xbf16>, vector<16x32xf32> -> vector<16x32xf32>
    %198 = arith.addf %180, %197 : vector<16x32xf32>
    %c3_i32 = arith.constant 3 : i32
    %c0_i32_89 = arith.constant 0 : i32
    %199 = arith.addi %c0_i32_89, %c3_i32 : i32
    %200 = arith.index_cast %199 : i32 to index
    %c0_90 = arith.constant 0 : index
    %c0_91 = arith.constant 0 : index
    %201 = vector.load %arg12[%200, %c0_90, %c0_91] : memref<8x32x512xbf16, #tpu.memory_space<vmem>>, vector<1x32x512xbf16>
    %202 = vector.shape_cast %201 : vector<1x32x512xbf16> to vector<32x512xbf16>
    %cst_92 = arith.constant dense<0.000000e+00> : vector<16x512xf32>
    %203 = tpu.matmul %143, %202, %cst_92 {dimension_numbers = #tpu.dot_dimension_numbers<[1], [0], [0], [1], [0, 0, 1, 1], [], []>} : vector<16x32xbf16>, vector<32x512xbf16>, vector<16x512xf32> -> vector<16x512xf32>
    %204 = arith.index_cast %199 : i32 to index
    %c0_93 = arith.constant 0 : index
    %c0_94 = arith.constant 0 : index
    %205 = vector.load %arg13[%204, %c0_93, %c0_94] : memref<8x1x512xf32, #tpu.memory_space<vmem>>, vector<1x1x512xf32>
    %206 = vector.shape_cast %205 : vector<1x1x512xf32> to vector<1x512xf32>
    %207 = vector.broadcast %206 : vector<1x512xf32> to vector<16x512xf32>
    %208 = arith.addf %203, %207 : vector<16x512xf32>
    %cst_95 = arith.constant 0.000000e+00 : f32
    %209 = vector.broadcast %cst_95 : f32 to vector<16x512xf32>
    %210 = arith.maximumf %208, %209 : vector<16x512xf32>
    %211 = arith.truncf %210 : vector<16x512xf32> to vector<16x512xbf16>
    %212 = arith.index_cast %199 : i32 to index
    %c0_96 = arith.constant 0 : index
    %c0_97 = arith.constant 0 : index
    %213 = vector.load %arg14[%212, %c0_96, %c0_97] : memref<8x512x32xbf16, #tpu.memory_space<vmem>>, vector<1x512x32xbf16>
    %214 = vector.shape_cast %213 : vector<1x512x32xbf16> to vector<512x32xbf16>
    %cst_98 = arith.constant dense<0.000000e+00> : vector<16x32xf32>
    %215 = tpu.matmul %211, %214, %cst_98 {dimension_numbers = #tpu.dot_dimension_numbers<[1], [0], [0], [1], [0, 0, 1, 1], [], []>} : vector<16x512xbf16>, vector<512x32xbf16>, vector<16x32xf32> -> vector<16x32xf32>
    %216 = arith.addf %198, %215 : vector<16x32xf32>
    %c4_i32 = arith.constant 4 : i32
    %c0_99 = arith.constant 0 : index
    %c0_100 = arith.constant 0 : index
    %c0_101 = arith.constant 0 : index
    %217 = vector.load %arg15[%c0_99, %c0_100, %c0_101] : memref<2x1x32xf32, #tpu.memory_space<vmem>>, vector<1x1x32xf32>
    %218 = vector.shape_cast %217 : vector<1x1x32xf32> to vector<1x32xf32>
    %219 = vector.broadcast %218 : vector<1x32xf32> to vector<16x32xf32>
    %220 = arith.addf %216, %219 : vector<16x32xf32>
    %221 = arith.addf %142, %220 : vector<16x32xf32>
    %c0_102 = arith.constant 0 : index
    %c0_103 = arith.constant 0 : index
    %c0_104 = arith.constant 0 : index
    %222 = vector.load %arg10[%c0_102, %c0_103, %c0_104] : memref<2x1x32xf32, #tpu.memory_space<vmem>>, vector<1x1x32xf32>
    %223 = vector.shape_cast %222 : vector<1x1x32xf32> to vector<1x32xf32>
    %c0_105 = arith.constant 0 : index
    %c0_106 = arith.constant 0 : index
    %c0_107 = arith.constant 0 : index
    %224 = vector.load %arg11[%c0_105, %c0_106, %c0_107] : memref<2x1x32xf32, #tpu.memory_space<vmem>>, vector<1x1x32xf32>
    %225 = vector.shape_cast %224 : vector<1x1x32xf32> to vector<1x32xf32>
    %cst_108 = arith.constant dense<0.000000e+00> : vector<16xf32>
    %226 = vector.multi_reduction <add>, %221, %cst_108 [1] : vector<16x32xf32> to vector<16xf32>
    %227 = vector.shape_cast %226 : vector<16xf32> to vector<16x1xf32>
    %cst_109 = arith.constant 3.200000e+01 : f32
    %228 = vector.broadcast %cst_109 : f32 to vector<16x1xf32>
    %229 = arith.divf %227, %228 : vector<16x1xf32>
    %230 = vector.broadcast %229 : vector<16x1xf32> to vector<16x32xf32>
    %231 = arith.subf %221, %230 : vector<16x32xf32>
    %232 = arith.mulf %231, %231 : vector<16x32xf32>
    %cst_110 = arith.constant dense<0.000000e+00> : vector<16xf32>
    %233 = vector.multi_reduction <add>, %232, %cst_110 [1] : vector<16x32xf32> to vector<16xf32>
    %234 = vector.shape_cast %233 : vector<16xf32> to vector<16x1xf32>
    %cst_111 = arith.constant 3.200000e+01 : f32
    %235 = vector.broadcast %cst_111 : f32 to vector<16x1xf32>
    %236 = arith.divf %234, %235 : vector<16x1xf32>
    %237 = vector.broadcast %229 : vector<16x1xf32> to vector<16x32xf32>
    %238 = arith.subf %221, %237 : vector<16x32xf32>
    %cst_112 = arith.constant 9.99999974E-6 : f32
    %239 = vector.broadcast %cst_112 : f32 to vector<16x1xf32>
    %240 = arith.addf %236, %239 : vector<16x1xf32>
    %241 = math.rsqrt %240 : vector<16x1xf32>
    %242 = vector.broadcast %241 : vector<16x1xf32> to vector<16x32xf32>
    %243 = arith.mulf %238, %242 : vector<16x32xf32>
    %244 = vector.broadcast %223 : vector<1x32xf32> to vector<16x32xf32>
    %245 = arith.mulf %243, %244 : vector<16x32xf32>
    %246 = vector.broadcast %225 : vector<1x32xf32> to vector<16x32xf32>
    %247 = arith.addf %245, %246 : vector<16x32xf32>
    %248 = arith.truncf %247 : vector<16x32xf32> to vector<16x32xbf16>
    %c1_113 = arith.constant 1 : index
    %c0_114 = arith.constant 0 : index
    %c0_115 = arith.constant 0 : index
    %249 = vector.load %arg4[%c1_113, %c0_114, %c0_115] : memref<2x32x96xbf16, #tpu.memory_space<vmem>>, vector<1x32x96xbf16>
    %250 = vector.shape_cast %249 : vector<1x32x96xbf16> to vector<32x96xbf16>
    %cst_116 = arith.constant dense<0.000000e+00> : vector<16x96xf32>
    %251 = tpu.matmul %248, %250, %cst_116 {dimension_numbers = #tpu.dot_dimension_numbers<[1], [0], [0], [1], [0, 0, 1, 1], [], []>} : vector<16x32xbf16>, vector<32x96xbf16>, vector<16x96xf32> -> vector<16x96xf32>
    %c1_117 = arith.constant 1 : index
    %c0_118 = arith.constant 0 : index
    %c0_119 = arith.constant 0 : index
    %252 = vector.load %arg5[%c1_117, %c0_118, %c0_119] : memref<2x1x96xf32, #tpu.memory_space<vmem>>, vector<1x1x96xf32>
    %253 = vector.shape_cast %252 : vector<1x1x96xf32> to vector<1x96xf32>
    %254 = vector.broadcast %253 : vector<1x96xf32> to vector<16x96xf32>
    %255 = arith.addf %251, %254 : vector<16x96xf32>
    %cst_120 = arith.constant 0.000000e+00 : f32
    %256 = vector.broadcast %cst_120 : f32 to vector<16x32xf32>
    %257 = vector.extract_strided_slice %255 {offsets = [0, 0], sizes = [16, 8], strides = [1, 1]} : vector<16x96xf32> to vector<16x8xf32>
    %258 = arith.truncf %257 : vector<16x8xf32> to vector<16x8xbf16>
    %259 = vector.extract_strided_slice %255 {offsets = [0, 32], sizes = [16, 8], strides = [1, 1]} : vector<16x96xf32> to vector<16x8xf32>
    %260 = arith.truncf %259 : vector<16x8xf32> to vector<16x8xbf16>
    %261 = vector.extract_strided_slice %255 {offsets = [0, 64], sizes = [16, 8], strides = [1, 1]} : vector<16x96xf32> to vector<16x8xf32>
    %262 = arith.truncf %261 : vector<16x8xf32> to vector<16x8xbf16>
    "tpu.trace_start"() <{level = 10 : i32, message = "qd,kd->qk"}> : () -> ()
    %cst_121 = arith.constant dense<0.000000e+00> : vector<16x16xf32>
    %263 = tpu.matmul %258, %260, %cst_121 {dimension_numbers = #tpu.dot_dimension_numbers<[1], [1], [0], [0], [0, 0, 1, 0], [], []>} : vector<16x8xbf16>, vector<16x8xbf16>, vector<16x16xf32> -> vector<16x16xf32>
    "tpu.trace_stop"() : () -> ()
    %264 = arith.addf %263, %6 : vector<16x16xf32>
    %cst_122 = arith.constant dense<0xFF800000> : vector<16xf32>
    %265 = vector.multi_reduction <maximumf>, %264, %cst_122 [1] : vector<16x16xf32> to vector<16xf32>
    %266 = vector.shape_cast %265 : vector<16xf32> to vector<16x1xf32>
    %267 = vector.broadcast %266 : vector<16x1xf32> to vector<16x16xf32>
    %268 = arith.subf %264, %267 : vector<16x16xf32>
    %269 = math.exp %268 : vector<16x16xf32>
    %cst_123 = arith.constant dense<0.000000e+00> : vector<16xf32>
    %270 = vector.multi_reduction <add>, %269, %cst_123 [1] : vector<16x16xf32> to vector<16xf32>
    %271 = vector.shape_cast %270 : vector<16xf32> to vector<16x1xf32>
    %272 = vector.broadcast %271 : vector<16x1xf32> to vector<16x16xf32>
    %273 = arith.divf %269, %272 : vector<16x16xf32>
    %274 = arith.truncf %273 : vector<16x16xf32> to vector<16x16xbf16>
    %cst_124 = arith.constant dense<0.000000e+00> : vector<16x8xf32>
    %275 = tpu.matmul %274, %262, %cst_124 {dimension_numbers = #tpu.dot_dimension_numbers<[1], [0], [0], [1], [0, 0, 1, 1], [], []>} : vector<16x16xbf16>, vector<16x8xbf16>, vector<16x8xf32> -> vector<16x8xf32>
    %276 = arith.truncf %275 : vector<16x8xf32> to vector<16x8xbf16>
    %c4 = arith.constant 4 : index
    %c0_125 = arith.constant 0 : index
    %c0_126 = arith.constant 0 : index
    %277 = vector.load %arg6[%c4, %c0_125, %c0_126] : memref<8x8x32xbf16, #tpu.memory_space<vmem>>, vector<1x8x32xbf16>
    %278 = vector.shape_cast %277 : vector<1x8x32xbf16> to vector<8x32xbf16>
    %cst_127 = arith.constant dense<0.000000e+00> : vector<16x32xf32>
    %279 = tpu.matmul %276, %278, %cst_127 {dimension_numbers = #tpu.dot_dimension_numbers<[1], [0], [0], [1], [0, 0, 1, 1], [], []>} : vector<16x8xbf16>, vector<8x32xbf16>, vector<16x32xf32> -> vector<16x32xf32>
    %280 = arith.addf %256, %279 : vector<16x32xf32>
    %281 = vector.extract_strided_slice %255 {offsets = [0, 8], sizes = [16, 8], strides = [1, 1]} : vector<16x96xf32> to vector<16x8xf32>
    %282 = arith.truncf %281 : vector<16x8xf32> to vector<16x8xbf16>
    %283 = vector.extract_strided_slice %255 {offsets = [0, 40], sizes = [16, 8], strides = [1, 1]} : vector<16x96xf32> to vector<16x8xf32>
    %284 = arith.truncf %283 : vector<16x8xf32> to vector<16x8xbf16>
    %285 = vector.extract_strided_slice %255 {offsets = [0, 72], sizes = [16, 8], strides = [1, 1]} : vector<16x96xf32> to vector<16x8xf32>
    %286 = arith.truncf %285 : vector<16x8xf32> to vector<16x8xbf16>
    "tpu.trace_start"() <{level = 10 : i32, message = "qd,kd->qk"}> : () -> ()
    %cst_128 = arith.constant dense<0.000000e+00> : vector<16x16xf32>
    %287 = tpu.matmul %282, %284, %cst_128 {dimension_numbers = #tpu.dot_dimension_numbers<[1], [1], [0], [0], [0, 0, 1, 0], [], []>} : vector<16x8xbf16>, vector<16x8xbf16>, vector<16x16xf32> -> vector<16x16xf32>
    "tpu.trace_stop"() : () -> ()
    %288 = arith.addf %287, %6 : vector<16x16xf32>
    %cst_129 = arith.constant dense<0xFF800000> : vector<16xf32>
    %289 = vector.multi_reduction <maximumf>, %288, %cst_129 [1] : vector<16x16xf32> to vector<16xf32>
    %290 = vector.shape_cast %289 : vector<16xf32> to vector<16x1xf32>
    %291 = vector.broadcast %290 : vector<16x1xf32> to vector<16x16xf32>
    %292 = arith.subf %288, %291 : vector<16x16xf32>
    %293 = math.exp %292 : vector<16x16xf32>
    %cst_130 = arith.constant dense<0.000000e+00> : vector<16xf32>
    %294 = vector.multi_reduction <add>, %293, %cst_130 [1] : vector<16x16xf32> to vector<16xf32>
    %295 = vector.shape_cast %294 : vector<16xf32> to vector<16x1xf32>
    %296 = vector.broadcast %295 : vector<16x1xf32> to vector<16x16xf32>
    %297 = arith.divf %293, %296 : vector<16x16xf32>
    %298 = arith.truncf %297 : vector<16x16xf32> to vector<16x16xbf16>
    %cst_131 = arith.constant dense<0.000000e+00> : vector<16x8xf32>
    %299 = tpu.matmul %298, %286, %cst_131 {dimension_numbers = #tpu.dot_dimension_numbers<[1], [0], [0], [1], [0, 0, 1, 1], [], []>} : vector<16x16xbf16>, vector<16x8xbf16>, vector<16x8xf32> -> vector<16x8xf32>
    %300 = arith.truncf %299 : vector<16x8xf32> to vector<16x8xbf16>
    %c5 = arith.constant 5 : index
    %c0_132 = arith.constant 0 : index
    %c0_133 = arith.constant 0 : index
    %301 = vector.load %arg6[%c5, %c0_132, %c0_133] : memref<8x8x32xbf16, #tpu.memory_space<vmem>>, vector<1x8x32xbf16>
    %302 = vector.shape_cast %301 : vector<1x8x32xbf16> to vector<8x32xbf16>
    %cst_134 = arith.constant dense<0.000000e+00> : vector<16x32xf32>
    %303 = tpu.matmul %300, %302, %cst_134 {dimension_numbers = #tpu.dot_dimension_numbers<[1], [0], [0], [1], [0, 0, 1, 1], [], []>} : vector<16x8xbf16>, vector<8x32xbf16>, vector<16x32xf32> -> vector<16x32xf32>
    %304 = arith.addf %280, %303 : vector<16x32xf32>
    %305 = vector.extract_strided_slice %255 {offsets = [0, 16], sizes = [16, 8], strides = [1, 1]} : vector<16x96xf32> to vector<16x8xf32>
    %306 = arith.truncf %305 : vector<16x8xf32> to vector<16x8xbf16>
    %307 = vector.extract_strided_slice %255 {offsets = [0, 48], sizes = [16, 8], strides = [1, 1]} : vector<16x96xf32> to vector<16x8xf32>
    %308 = arith.truncf %307 : vector<16x8xf32> to vector<16x8xbf16>
    %309 = vector.extract_strided_slice %255 {offsets = [0, 80], sizes = [16, 8], strides = [1, 1]} : vector<16x96xf32> to vector<16x8xf32>
    %310 = arith.truncf %309 : vector<16x8xf32> to vector<16x8xbf16>
    "tpu.trace_start"() <{level = 10 : i32, message = "qd,kd->qk"}> : () -> ()
    %cst_135 = arith.constant dense<0.000000e+00> : vector<16x16xf32>
    %311 = tpu.matmul %306, %308, %cst_135 {dimension_numbers = #tpu.dot_dimension_numbers<[1], [1], [0], [0], [0, 0, 1, 0], [], []>} : vector<16x8xbf16>, vector<16x8xbf16>, vector<16x16xf32> -> vector<16x16xf32>
    "tpu.trace_stop"() : () -> ()
    %312 = arith.addf %311, %6 : vector<16x16xf32>
    %cst_136 = arith.constant dense<0xFF800000> : vector<16xf32>
    %313 = vector.multi_reduction <maximumf>, %312, %cst_136 [1] : vector<16x16xf32> to vector<16xf32>
    %314 = vector.shape_cast %313 : vector<16xf32> to vector<16x1xf32>
    %315 = vector.broadcast %314 : vector<16x1xf32> to vector<16x16xf32>
    %316 = arith.subf %312, %315 : vector<16x16xf32>
    %317 = math.exp %316 : vector<16x16xf32>
    %cst_137 = arith.constant dense<0.000000e+00> : vector<16xf32>
    %318 = vector.multi_reduction <add>, %317, %cst_137 [1] : vector<16x16xf32> to vector<16xf32>
    %319 = vector.shape_cast %318 : vector<16xf32> to vector<16x1xf32>
    %320 = vector.broadcast %319 : vector<16x1xf32> to vector<16x16xf32>
    %321 = arith.divf %317, %320 : vector<16x16xf32>
    %322 = arith.truncf %321 : vector<16x16xf32> to vector<16x16xbf16>
    %cst_138 = arith.constant dense<0.000000e+00> : vector<16x8xf32>
    %323 = tpu.matmul %322, %310, %cst_138 {dimension_numbers = #tpu.dot_dimension_numbers<[1], [0], [0], [1], [0, 0, 1, 1], [], []>} : vector<16x16xbf16>, vector<16x8xbf16>, vector<16x8xf32> -> vector<16x8xf32>
    %324 = arith.truncf %323 : vector<16x8xf32> to vector<16x8xbf16>
    %c6 = arith.constant 6 : index
    %c0_139 = arith.constant 0 : index
    %c0_140 = arith.constant 0 : index
    %325 = vector.load %arg6[%c6, %c0_139, %c0_140] : memref<8x8x32xbf16, #tpu.memory_space<vmem>>, vector<1x8x32xbf16>
    %326 = vector.shape_cast %325 : vector<1x8x32xbf16> to vector<8x32xbf16>
    %cst_141 = arith.constant dense<0.000000e+00> : vector<16x32xf32>
    %327 = tpu.matmul %324, %326, %cst_141 {dimension_numbers = #tpu.dot_dimension_numbers<[1], [0], [0], [1], [0, 0, 1, 1], [], []>} : vector<16x8xbf16>, vector<8x32xbf16>, vector<16x32xf32> -> vector<16x32xf32>
    %328 = arith.addf %304, %327 : vector<16x32xf32>
    %329 = vector.extract_strided_slice %255 {offsets = [0, 24], sizes = [16, 8], strides = [1, 1]} : vector<16x96xf32> to vector<16x8xf32>
    %330 = arith.truncf %329 : vector<16x8xf32> to vector<16x8xbf16>
    %331 = vector.extract_strided_slice %255 {offsets = [0, 56], sizes = [16, 8], strides = [1, 1]} : vector<16x96xf32> to vector<16x8xf32>
    %332 = arith.truncf %331 : vector<16x8xf32> to vector<16x8xbf16>
    %333 = vector.extract_strided_slice %255 {offsets = [0, 88], sizes = [16, 8], strides = [1, 1]} : vector<16x96xf32> to vector<16x8xf32>
    %334 = arith.truncf %333 : vector<16x8xf32> to vector<16x8xbf16>
    "tpu.trace_start"() <{level = 10 : i32, message = "qd,kd->qk"}> : () -> ()
    %cst_142 = arith.constant dense<0.000000e+00> : vector<16x16xf32>
    %335 = tpu.matmul %330, %332, %cst_142 {dimension_numbers = #tpu.dot_dimension_numbers<[1], [1], [0], [0], [0, 0, 1, 0], [], []>} : vector<16x8xbf16>, vector<16x8xbf16>, vector<16x16xf32> -> vector<16x16xf32>
    "tpu.trace_stop"() : () -> ()
    %336 = arith.addf %335, %6 : vector<16x16xf32>
    %cst_143 = arith.constant dense<0xFF800000> : vector<16xf32>
    %337 = vector.multi_reduction <maximumf>, %336, %cst_143 [1] : vector<16x16xf32> to vector<16xf32>
    %338 = vector.shape_cast %337 : vector<16xf32> to vector<16x1xf32>
    %339 = vector.broadcast %338 : vector<16x1xf32> to vector<16x16xf32>
    %340 = arith.subf %336, %339 : vector<16x16xf32>
    %341 = math.exp %340 : vector<16x16xf32>
    %cst_144 = arith.constant dense<0.000000e+00> : vector<16xf32>
    %342 = vector.multi_reduction <add>, %341, %cst_144 [1] : vector<16x16xf32> to vector<16xf32>
    %343 = vector.shape_cast %342 : vector<16xf32> to vector<16x1xf32>
    %344 = vector.broadcast %343 : vector<16x1xf32> to vector<16x16xf32>
    %345 = arith.divf %341, %344 : vector<16x16xf32>
    %346 = arith.truncf %345 : vector<16x16xf32> to vector<16x16xbf16>
    %cst_145 = arith.constant dense<0.000000e+00> : vector<16x8xf32>
    %347 = tpu.matmul %346, %334, %cst_145 {dimension_numbers = #tpu.dot_dimension_numbers<[1], [0], [0], [1], [0, 0, 1, 1], [], []>} : vector<16x16xbf16>, vector<16x8xbf16>, vector<16x8xf32> -> vector<16x8xf32>
    %348 = arith.truncf %347 : vector<16x8xf32> to vector<16x8xbf16>
    %c7 = arith.constant 7 : index
    %c0_146 = arith.constant 0 : index
    %c0_147 = arith.constant 0 : index
    %349 = vector.load %arg6[%c7, %c0_146, %c0_147] : memref<8x8x32xbf16, #tpu.memory_space<vmem>>, vector<1x8x32xbf16>
    %350 = vector.shape_cast %349 : vector<1x8x32xbf16> to vector<8x32xbf16>
    %cst_148 = arith.constant dense<0.000000e+00> : vector<16x32xf32>
    %351 = tpu.matmul %348, %350, %cst_148 {dimension_numbers = #tpu.dot_dimension_numbers<[1], [0], [0], [1], [0, 0, 1, 1], [], []>} : vector<16x8xbf16>, vector<8x32xbf16>, vector<16x32xf32> -> vector<16x32xf32>
    %352 = arith.addf %328, %351 : vector<16x32xf32>
    %c1_149 = arith.constant 1 : index
    %c0_150 = arith.constant 0 : index
    %c0_151 = arith.constant 0 : index
    %353 = vector.load %arg7[%c1_149, %c0_150, %c0_151] : memref<2x1x32xf32, #tpu.memory_space<vmem>>, vector<1x1x32xf32>
    %354 = vector.shape_cast %353 : vector<1x1x32xf32> to vector<1x32xf32>
    %355 = vector.broadcast %354 : vector<1x32xf32> to vector<16x32xf32>
    %356 = arith.addf %352, %355 : vector<16x32xf32>
    %357 = arith.addf %247, %356 : vector<16x32xf32>
    %c1_152 = arith.constant 1 : index
    %c0_153 = arith.constant 0 : index
    %c0_154 = arith.constant 0 : index
    %358 = vector.load %arg8[%c1_152, %c0_153, %c0_154] : memref<2x1x32xf32, #tpu.memory_space<vmem>>, vector<1x1x32xf32>
    %359 = vector.shape_cast %358 : vector<1x1x32xf32> to vector<1x32xf32>
    %c1_155 = arith.constant 1 : index
    %c0_156 = arith.constant 0 : index
    %c0_157 = arith.constant 0 : index
    %360 = vector.load %arg9[%c1_155, %c0_156, %c0_157] : memref<2x1x32xf32, #tpu.memory_space<vmem>>, vector<1x1x32xf32>
    %361 = vector.shape_cast %360 : vector<1x1x32xf32> to vector<1x32xf32>
    %cst_158 = arith.constant dense<0.000000e+00> : vector<16xf32>
    %362 = vector.multi_reduction <add>, %357, %cst_158 [1] : vector<16x32xf32> to vector<16xf32>
    %363 = vector.shape_cast %362 : vector<16xf32> to vector<16x1xf32>
    %cst_159 = arith.constant 3.200000e+01 : f32
    %364 = vector.broadcast %cst_159 : f32 to vector<16x1xf32>
    %365 = arith.divf %363, %364 : vector<16x1xf32>
    %366 = vector.broadcast %365 : vector<16x1xf32> to vector<16x32xf32>
    %367 = arith.subf %357, %366 : vector<16x32xf32>
    %368 = arith.mulf %367, %367 : vector<16x32xf32>
    %cst_160 = arith.constant dense<0.000000e+00> : vector<16xf32>
    %369 = vector.multi_reduction <add>, %368, %cst_160 [1] : vector<16x32xf32> to vector<16xf32>
    %370 = vector.shape_cast %369 : vector<16xf32> to vector<16x1xf32>
    %cst_161 = arith.constant 3.200000e+01 : f32
    %371 = vector.broadcast %cst_161 : f32 to vector<16x1xf32>
    %372 = arith.divf %370, %371 : vector<16x1xf32>
    %373 = vector.broadcast %365 : vector<16x1xf32> to vector<16x32xf32>
    %374 = arith.subf %357, %373 : vector<16x32xf32>
    %cst_162 = arith.constant 9.99999974E-6 : f32
    %375 = vector.broadcast %cst_162 : f32 to vector<16x1xf32>
    %376 = arith.addf %372, %375 : vector<16x1xf32>
    %377 = math.rsqrt %376 : vector<16x1xf32>
    %378 = vector.broadcast %377 : vector<16x1xf32> to vector<16x32xf32>
    %379 = arith.mulf %374, %378 : vector<16x32xf32>
    %380 = vector.broadcast %359 : vector<1x32xf32> to vector<16x32xf32>
    %381 = arith.mulf %379, %380 : vector<16x32xf32>
    %382 = vector.broadcast %361 : vector<1x32xf32> to vector<16x32xf32>
    %383 = arith.addf %381, %382 : vector<16x32xf32>
    %384 = arith.truncf %383 : vector<16x32xf32> to vector<16x32xbf16>
    %cst_163 = arith.constant 0.000000e+00 : f32
    %385 = vector.broadcast %cst_163 : f32 to vector<16x32xf32>
    %c0_i32_164 = arith.constant 0 : i32
    %c4_i32_165 = arith.constant 4 : i32
    %386 = arith.addi %c4_i32_165, %c0_i32_164 : i32
    %387 = arith.index_cast %386 : i32 to index
    %c0_166 = arith.constant 0 : index
    %c0_167 = arith.constant 0 : index
    %388 = vector.load %arg12[%387, %c0_166, %c0_167] : memref<8x32x512xbf16, #tpu.memory_space<vmem>>, vector<1x32x512xbf16>
    %389 = vector.shape_cast %388 : vector<1x32x512xbf16> to vector<32x512xbf16>
    %cst_168 = arith.constant dense<0.000000e+00> : vector<16x512xf32>
    %390 = tpu.matmul %384, %389, %cst_168 {dimension_numbers = #tpu.dot_dimension_numbers<[1], [0], [0], [1], [0, 0, 1, 1], [], []>} : vector<16x32xbf16>, vector<32x512xbf16>, vector<16x512xf32> -> vector<16x512xf32>
    %391 = arith.index_cast %386 : i32 to index
    %c0_169 = arith.constant 0 : index
    %c0_170 = arith.constant 0 : index
    %392 = vector.load %arg13[%391, %c0_169, %c0_170] : memref<8x1x512xf32, #tpu.memory_space<vmem>>, vector<1x1x512xf32>
    %393 = vector.shape_cast %392 : vector<1x1x512xf32> to vector<1x512xf32>
    %394 = vector.broadcast %393 : vector<1x512xf32> to vector<16x512xf32>
    %395 = arith.addf %390, %394 : vector<16x512xf32>
    %cst_171 = arith.constant 0.000000e+00 : f32
    %396 = vector.broadcast %cst_171 : f32 to vector<16x512xf32>
    %397 = arith.maximumf %395, %396 : vector<16x512xf32>
    %398 = arith.truncf %397 : vector<16x512xf32> to vector<16x512xbf16>
    %399 = arith.index_cast %386 : i32 to index
    %c0_172 = arith.constant 0 : index
    %c0_173 = arith.constant 0 : index
    %400 = vector.load %arg14[%399, %c0_172, %c0_173] : memref<8x512x32xbf16, #tpu.memory_space<vmem>>, vector<1x512x32xbf16>
    %401 = vector.shape_cast %400 : vector<1x512x32xbf16> to vector<512x32xbf16>
    %cst_174 = arith.constant dense<0.000000e+00> : vector<16x32xf32>
    %402 = tpu.matmul %398, %401, %cst_174 {dimension_numbers = #tpu.dot_dimension_numbers<[1], [0], [0], [1], [0, 0, 1, 1], [], []>} : vector<16x512xbf16>, vector<512x32xbf16>, vector<16x32xf32> -> vector<16x32xf32>
    %403 = arith.addf %385, %402 : vector<16x32xf32>
    %c1_i32_175 = arith.constant 1 : i32
    %c4_i32_176 = arith.constant 4 : i32
    %404 = arith.addi %c4_i32_176, %c1_i32_175 : i32
    %405 = arith.index_cast %404 : i32 to index
    %c0_177 = arith.constant 0 : index
    %c0_178 = arith.constant 0 : index
    %406 = vector.load %arg12[%405, %c0_177, %c0_178] : memref<8x32x512xbf16, #tpu.memory_space<vmem>>, vector<1x32x512xbf16>
    %407 = vector.shape_cast %406 : vector<1x32x512xbf16> to vector<32x512xbf16>
    %cst_179 = arith.constant dense<0.000000e+00> : vector<16x512xf32>
    %408 = tpu.matmul %384, %407, %cst_179 {dimension_numbers = #tpu.dot_dimension_numbers<[1], [0], [0], [1], [0, 0, 1, 1], [], []>} : vector<16x32xbf16>, vector<32x512xbf16>, vector<16x512xf32> -> vector<16x512xf32>
    %409 = arith.index_cast %404 : i32 to index
    %c0_180 = arith.constant 0 : index
    %c0_181 = arith.constant 0 : index
    %410 = vector.load %arg13[%409, %c0_180, %c0_181] : memref<8x1x512xf32, #tpu.memory_space<vmem>>, vector<1x1x512xf32>
    %411 = vector.shape_cast %410 : vector<1x1x512xf32> to vector<1x512xf32>
    %412 = vector.broadcast %411 : vector<1x512xf32> to vector<16x512xf32>
    %413 = arith.addf %408, %412 : vector<16x512xf32>
    %cst_182 = arith.constant 0.000000e+00 : f32
    %414 = vector.broadcast %cst_182 : f32 to vector<16x512xf32>
    %415 = arith.maximumf %413, %414 : vector<16x512xf32>
    %416 = arith.truncf %415 : vector<16x512xf32> to vector<16x512xbf16>
    %417 = arith.index_cast %404 : i32 to index
    %c0_183 = arith.constant 0 : index
    %c0_184 = arith.constant 0 : index
    %418 = vector.load %arg14[%417, %c0_183, %c0_184] : memref<8x512x32xbf16, #tpu.memory_space<vmem>>, vector<1x512x32xbf16>
    %419 = vector.shape_cast %418 : vector<1x512x32xbf16> to vector<512x32xbf16>
    %cst_185 = arith.constant dense<0.000000e+00> : vector<16x32xf32>
    %420 = tpu.matmul %416, %419, %cst_185 {dimension_numbers = #tpu.dot_dimension_numbers<[1], [0], [0], [1], [0, 0, 1, 1], [], []>} : vector<16x512xbf16>, vector<512x32xbf16>, vector<16x32xf32> -> vector<16x32xf32>
    %421 = arith.addf %403, %420 : vector<16x32xf32>
    %c2_i32_186 = arith.constant 2 : i32
    %c4_i32_187 = arith.constant 4 : i32
    %422 = arith.addi %c4_i32_187, %c2_i32_186 : i32
    %423 = arith.index_cast %422 : i32 to index
    %c0_188 = arith.constant 0 : index
    %c0_189 = arith.constant 0 : index
    %424 = vector.load %arg12[%423, %c0_188, %c0_189] : memref<8x32x512xbf16, #tpu.memory_space<vmem>>, vector<1x32x512xbf16>
    %425 = vector.shape_cast %424 : vector<1x32x512xbf16> to vector<32x512xbf16>
    %cst_190 = arith.constant dense<0.000000e+00> : vector<16x512xf32>
    %426 = tpu.matmul %384, %425, %cst_190 {dimension_numbers = #tpu.dot_dimension_numbers<[1], [0], [0], [1], [0, 0, 1, 1], [], []>} : vector<16x32xbf16>, vector<32x512xbf16>, vector<16x512xf32> -> vector<16x512xf32>
    %427 = arith.index_cast %422 : i32 to index
    %c0_191 = arith.constant 0 : index
    %c0_192 = arith.constant 0 : index
    %428 = vector.load %arg13[%427, %c0_191, %c0_192] : memref<8x1x512xf32, #tpu.memory_space<vmem>>, vector<1x1x512xf32>
    %429 = vector.shape_cast %428 : vector<1x1x512xf32> to vector<1x512xf32>
    %430 = vector.broadcast %429 : vector<1x512xf32> to vector<16x512xf32>
    %431 = arith.addf %426, %430 : vector<16x512xf32>
    %cst_193 = arith.constant 0.000000e+00 : f32
    %432 = vector.broadcast %cst_193 : f32 to vector<16x512xf32>
    %433 = arith.maximumf %431, %432 : vector<16x512xf32>
    %434 = arith.truncf %433 : vector<16x512xf32> to vector<16x512xbf16>
    %435 = arith.index_cast %422 : i32 to index
    %c0_194 = arith.constant 0 : index
    %c0_195 = arith.constant 0 : index
    %436 = vector.load %arg14[%435, %c0_194, %c0_195] : memref<8x512x32xbf16, #tpu.memory_space<vmem>>, vector<1x512x32xbf16>
    %437 = vector.shape_cast %436 : vector<1x512x32xbf16> to vector<512x32xbf16>
    %cst_196 = arith.constant dense<0.000000e+00> : vector<16x32xf32>
    %438 = tpu.matmul %434, %437, %cst_196 {dimension_numbers = #tpu.dot_dimension_numbers<[1], [0], [0], [1], [0, 0, 1, 1], [], []>} : vector<16x512xbf16>, vector<512x32xbf16>, vector<16x32xf32> -> vector<16x32xf32>
    %439 = arith.addf %421, %438 : vector<16x32xf32>
    %c3_i32_197 = arith.constant 3 : i32
    %c4_i32_198 = arith.constant 4 : i32
    %440 = arith.addi %c4_i32_198, %c3_i32_197 : i32
    %441 = arith.index_cast %440 : i32 to index
    %c0_199 = arith.constant 0 : index
    %c0_200 = arith.constant 0 : index
    %442 = vector.load %arg12[%441, %c0_199, %c0_200] : memref<8x32x512xbf16, #tpu.memory_space<vmem>>, vector<1x32x512xbf16>
    %443 = vector.shape_cast %442 : vector<1x32x512xbf16> to vector<32x512xbf16>
    %cst_201 = arith.constant dense<0.000000e+00> : vector<16x512xf32>
    %444 = tpu.matmul %384, %443, %cst_201 {dimension_numbers = #tpu.dot_dimension_numbers<[1], [0], [0], [1], [0, 0, 1, 1], [], []>} : vector<16x32xbf16>, vector<32x512xbf16>, vector<16x512xf32> -> vector<16x512xf32>
    %445 = arith.index_cast %440 : i32 to index
    %c0_202 = arith.constant 0 : index
    %c0_203 = arith.constant 0 : index
    %446 = vector.load %arg13[%445, %c0_202, %c0_203] : memref<8x1x512xf32, #tpu.memory_space<vmem>>, vector<1x1x512xf32>
    %447 = vector.shape_cast %446 : vector<1x1x512xf32> to vector<1x512xf32>
    %448 = vector.broadcast %447 : vector<1x512xf32> to vector<16x512xf32>
    %449 = arith.addf %444, %448 : vector<16x512xf32>
    %cst_204 = arith.constant 0.000000e+00 : f32
    %450 = vector.broadcast %cst_204 : f32 to vector<16x512xf32>
    %451 = arith.maximumf %449, %450 : vector<16x512xf32>
    %452 = arith.truncf %451 : vector<16x512xf32> to vector<16x512xbf16>
    %453 = arith.index_cast %440 : i32 to index
    %c0_205 = arith.constant 0 : index
    %c0_206 = arith.constant 0 : index
    %454 = vector.load %arg14[%453, %c0_205, %c0_206] : memref<8x512x32xbf16, #tpu.memory_space<vmem>>, vector<1x512x32xbf16>
    %455 = vector.shape_cast %454 : vector<1x512x32xbf16> to vector<512x32xbf16>
    %cst_207 = arith.constant dense<0.000000e+00> : vector<16x32xf32>
    %456 = tpu.matmul %452, %455, %cst_207 {dimension_numbers = #tpu.dot_dimension_numbers<[1], [0], [0], [1], [0, 0, 1, 1], [], []>} : vector<16x512xbf16>, vector<512x32xbf16>, vector<16x32xf32> -> vector<16x32xf32>
    %457 = arith.addf %439, %456 : vector<16x32xf32>
    %c4_i32_208 = arith.constant 4 : i32
    %c1_209 = arith.constant 1 : index
    %c0_210 = arith.constant 0 : index
    %c0_211 = arith.constant 0 : index
    %458 = vector.load %arg15[%c1_209, %c0_210, %c0_211] : memref<2x1x32xf32, #tpu.memory_space<vmem>>, vector<1x1x32xf32>
    %459 = vector.shape_cast %458 : vector<1x1x32xf32> to vector<1x32xf32>
    %460 = vector.broadcast %459 : vector<1x32xf32> to vector<16x32xf32>
    %461 = arith.addf %457, %460 : vector<16x32xf32>
    %462 = arith.addf %383, %461 : vector<16x32xf32>
    %c1_212 = arith.constant 1 : index
    %c0_213 = arith.constant 0 : index
    %c0_214 = arith.constant 0 : index
    %463 = vector.load %arg10[%c1_212, %c0_213, %c0_214] : memref<2x1x32xf32, #tpu.memory_space<vmem>>, vector<1x1x32xf32>
    %464 = vector.shape_cast %463 : vector<1x1x32xf32> to vector<1x32xf32>
    %c1_215 = arith.constant 1 : index
    %c0_216 = arith.constant 0 : index
    %c0_217 = arith.constant 0 : index
    %465 = vector.load %arg11[%c1_215, %c0_216, %c0_217] : memref<2x1x32xf32, #tpu.memory_space<vmem>>, vector<1x1x32xf32>
    %466 = vector.shape_cast %465 : vector<1x1x32xf32> to vector<1x32xf32>
    %cst_218 = arith.constant dense<0.000000e+00> : vector<16xf32>
    %467 = vector.multi_reduction <add>, %462, %cst_218 [1] : vector<16x32xf32> to vector<16xf32>
    %468 = vector.shape_cast %467 : vector<16xf32> to vector<16x1xf32>
    %cst_219 = arith.constant 3.200000e+01 : f32
    %469 = vector.broadcast %cst_219 : f32 to vector<16x1xf32>
    %470 = arith.divf %468, %469 : vector<16x1xf32>
    %471 = vector.broadcast %470 : vector<16x1xf32> to vector<16x32xf32>
    %472 = arith.subf %462, %471 : vector<16x32xf32>
    %473 = arith.mulf %472, %472 : vector<16x32xf32>
    %cst_220 = arith.constant dense<0.000000e+00> : vector<16xf32>
    %474 = vector.multi_reduction <add>, %473, %cst_220 [1] : vector<16x32xf32> to vector<16xf32>
    %475 = vector.shape_cast %474 : vector<16xf32> to vector<16x1xf32>
    %cst_221 = arith.constant 3.200000e+01 : f32
    %476 = vector.broadcast %cst_221 : f32 to vector<16x1xf32>
    %477 = arith.divf %475, %476 : vector<16x1xf32>
    %478 = vector.broadcast %470 : vector<16x1xf32> to vector<16x32xf32>
    %479 = arith.subf %462, %478 : vector<16x32xf32>
    %cst_222 = arith.constant 9.99999974E-6 : f32
    %480 = vector.broadcast %cst_222 : f32 to vector<16x1xf32>
    %481 = arith.addf %477, %480 : vector<16x1xf32>
    %482 = math.rsqrt %481 : vector<16x1xf32>
    %483 = vector.broadcast %482 : vector<16x1xf32> to vector<16x32xf32>
    %484 = arith.mulf %479, %483 : vector<16x32xf32>
    %485 = vector.broadcast %464 : vector<1x32xf32> to vector<16x32xf32>
    %486 = arith.mulf %484, %485 : vector<16x32xf32>
    %487 = vector.broadcast %466 : vector<1x32xf32> to vector<16x32xf32>
    %488 = arith.addf %486, %487 : vector<16x32xf32>
    %489 = vector.shape_cast %488 : vector<16x32xf32> to vector<2x8x32xf32>
    %490 = vector.extract_strided_slice %489 {offsets = [0, 7, 0], sizes = [2, 1, 32], strides = [1, 1, 1]} : vector<2x8x32xf32> to vector<2x1x32xf32>
    %491 = vector.shape_cast %490 : vector<2x1x32xf32> to vector<2x32xf32>
    %492 = arith.truncf %491 : vector<2x32xf32> to vector<2x32xbf16>
    %c0_223 = arith.constant 0 : index
    %c0_224 = arith.constant 0 : index
    %493 = vector.load %arg16[%c0_223, %c0_224] : memref<32x8xbf16, #tpu.memory_space<vmem>>, vector<32x8xbf16>
    %cst_225 = arith.constant dense<0.000000e+00> : vector<2x8xf32>
    %494 = tpu.matmul %492, %493, %cst_225 {dimension_numbers = #tpu.dot_dimension_numbers<[1], [0], [0], [1], [0, 0, 1, 1], [], []>} : vector<2x32xbf16>, vector<32x8xbf16>, vector<2x8xf32> -> vector<2x8xf32>
    %c0_226 = arith.constant 0 : index
    %c0_227 = arith.constant 0 : index
    %495 = vector.load %arg17[%c0_226, %c0_227] : memref<1x8xf32, #tpu.memory_space<vmem>>, vector<1x8xf32>
    %496 = vector.broadcast %495 : vector<1x8xf32> to vector<2x8xf32>
    %497 = arith.addf %494, %496 : vector<2x8xf32>
    %cst_228 = arith.constant dense<0xFF800000> : vector<2xf32>
    %498 = vector.multi_reduction <maximumf>, %497, %cst_228 [1] : vector<2x8xf32> to vector<2xf32>
    %499 = vector.shape_cast %498 : vector<2xf32> to vector<2x1xf32>
    %500 = vector.broadcast %499 : vector<2x1xf32> to vector<2x8xf32>
    %501 = arith.subf %497, %500 : vector<2x8xf32>
    %502 = math.exp %501 : vector<2x8xf32>
    %cst_229 = arith.constant dense<0.000000e+00> : vector<2xf32>
    %503 = vector.multi_reduction <add>, %502, %cst_229 [1] : vector<2x8xf32> to vector<2xf32>
    %504 = vector.shape_cast %503 : vector<2xf32> to vector<2x1xf32>
    %505 = vector.broadcast %504 : vector<2x1xf32> to vector<2x8xf32>
    %506 = arith.divf %502, %505 : vector<2x8xf32>
    %c0_230 = arith.constant 0 : index
    %c0_231 = arith.constant 0 : index
    %507 = vector.load %arg18[%c0_230, %c0_231] : memref<32x8xbf16, #tpu.memory_space<vmem>>, vector<32x8xbf16>
    %cst_232 = arith.constant dense<0.000000e+00> : vector<2x8xf32>
    %508 = tpu.matmul %492, %507, %cst_232 {dimension_numbers = #tpu.dot_dimension_numbers<[1], [0], [0], [1], [0, 0, 1, 1], [], []>} : vector<2x32xbf16>, vector<32x8xbf16>, vector<2x8xf32> -> vector<2x8xf32>
    %c0_233 = arith.constant 0 : index
    %c0_234 = arith.constant 0 : index
    %509 = vector.load %arg19[%c0_233, %c0_234] : memref<1x8xf32, #tpu.memory_space<vmem>>, vector<1x8xf32>
    %510 = vector.broadcast %509 : vector<1x8xf32> to vector<2x8xf32>
    %511 = arith.addf %508, %510 : vector<2x8xf32>
    %512 = arith.mulf %506, %511 : vector<2x8xf32>
    %cst_235 = arith.constant dense<0.000000e+00> : vector<2xf32>
    %513 = vector.multi_reduction <add>, %512, %cst_235 [1] : vector<2x8xf32> to vector<2xf32>
    %514 = vector.shape_cast %513 : vector<2xf32> to vector<2x1xf32>
    %c0_236 = arith.constant 0 : index
    %c0_237 = arith.constant 0 : index
    %515 = vector.load %arg20[%c0_236, %c0_237] : memref<2x1xf32, #tpu.memory_space<vmem>>, vector<2x1xf32>
    tpu.vector_store %arg20[%c0_236, %c0_237], %514 {strides = array<i32>} : memref<2x1xf32, #tpu.memory_space<vmem>>, vector<2x1xf32>,
    return
  }
}

</mosaic_0001>

<bundles_post_ra>
// kernel: moetr_forward.1
= control target key start
LH: loop header
LB: loop body
LE: loop exit
PB: predicated region body
PF: predicated region fallthrough
CT: control target
= control target key end

     0   :  { %v8092_v0 = vmov 0.0   ;;  %vm8093_vm0 = vmmov 0   ;;  %vm79_vm1 = vcmask 130048   ;;  %vm150_vm2 = vcmask 261120   ;;  %s9800_s26 = smov 96   ;;  %s9799_s27 = smov 88   ;;  %s9766_s3 = inlined_call_operand.vmem [shape: bf16[16,32], index: 3, kind: input, shape index: {}]   ;;  %s9767_s0 = inlined_call_operand.vmem [shape: f32[16,16], index: 0, kind: input, shape index: {}]   ;;  %s9768_s4 = inlined_call_operand.vmem [shape: bf16[2,32,96], index: 4, kind: input, shape index: {}]   ;;  %s9769_s1 = inlined_call_operand.vmem [shape: f32[16,32], index: 1, kind: input, shape index: {}]   ;;  %s9770_s5 = inlined_call_operand.vmem [shape: f32[2,1,96], index: 5, kind: input, shape index: {}]   ;;  %s9771_s2 = inlined_call_operand.vmem [shape: f32[16,16], index: 2, kind: input, shape index: {}]   ;;  %s9772_s6 = inlined_call_operand.vmem [shape: bf16[8,8,32], index: 6, kind: input, shape index: {}]   ;;  %s9773_s7 = inlined_call_operand.vmem [shape: f32[2,1,32], index: 7, kind: input, shape index: {}]   ;;  %s9774_s12 = inlined_call_operand.vmem [shape: bf16[8,32,512], index: 12, kind: input, shape index: {}]   ;;  %s9775_s14 = inlined_call_operand.vmem [shape: bf16[8,512,32], index: 14, kind: input, shape index: {}]   ;;  %s9776_s8 = inlined_call_operand.vmem [shape: f32[2,1,32], index: 8, kind: input, shape index: {}]   ;;  %s9777_s9 = inlined_call_operand.vmem [shape: f32[2,1,32], index: 9, kind: input, shape index: {}]   ;;  %s9778_s13 = inlined_call_operand.vmem [shape: f32[8,1,512], index: 13, kind: input, shape index: {}]   ;;  %s9779_s15 = inlined_call_operand.vmem [shape: f32[2,1,32], index: 15, kind: input, shape index: {}]   ;;  %s9780_s10 = inlined_call_operand.vmem [shape: f32[2,1,32], index: 10, kind: input, shape index: {}]   ;;  %s9781_s11 = inlined_call_operand.vmem [shape: f32[2,1,32], index: 11, kind: input, shape index: {}]   ;;  %s9782_s16 = inlined_call_operand.vmem [shape: bf16[32,8], index: 16, kind: input, shape index: {}]   ;;  %s9783_s18 = inlined_call_operand.vmem [shape: bf16[32,8], index: 18, kind: input, shape index: {}]   ;;  %s9784_s17 = inlined_call_operand.vmem [shape: f32[1,8], index: 17, kind: input, shape index: {}]   ;;  %s9785_s19 = inlined_call_operand.vmem [shape: f32[1,8], index: 19, kind: input, shape index: {}]   ;;  %s9786_s20 = inlined_call_operand.vmem [shape: f32[2,1], index: 20, kind: output, shape index: {}]  }
   0x1   :  { %9801 = sst [smem:[#allocation2_spill]] %s9766_s3  ;;  %7449 = vmatprep.subr.bf16.mxu0 %v8092_v0  ;;  %7451 = vmatprep.mubr.msk.bf16.mxu0 %vm8093_vm0, %v8092_v0  ;;  %vm199_vm3 = vcmask 64512   ;;  %v8278_v29 = vld [vmem:[%s9771_s2] sm:$0xff]  ;;  %v8284_v33 = vld [vmem:[%s9771_s2 + $0x8] sm:$0xff]  ;;  %s9798_s21 = smov 56   ;;  %vm446_vm4 = vcmask 1043456  }
   0x2   :  { %9802 = sst [smem:[#allocation3_spill]] %s9767_s0  ;;  %7455 = vmatprep.subr.bf16.mxu1 %v8092_v0  ;;  %7459 = vmatprep.mubr.msk.bf16.mxu1 %vm8093_vm0, %v8092_v0  ;;  %s9796_s22 = smov 80   ;;  %vm5973_vm5 = vcmask 1041409   ;;  %vm6031_vm6 = vcmask 58368   ;;  %vm6110_vm7 = vcmask 1024  }
   0x3   :  { %9803 = sst [smem:[#allocation4_spill]] %s9768_s4  ;;  %s9794_s30 = smov 72  }
   0x4   :  { %9804 = sst [smem:[#allocation5_spill]] %s9769_s1  ;;  %s8094_s1 = smov 120  }
   0x5   :  { %9805 = sst [smem:[#allocation6_spill]] %s9770_s5  ;;  %s9793_s3 = smov 48  }
   0x6   :  { %s9806_s23 = sld [smem:[#allocation2_spill]]  ;;  %s9792_s24 = smov 104  }
   0x7   :  { %s9807_s25 = sld [smem:[#allocation3_spill]]  ;;  %s9791_s29 = smov 40  }
   0x8   :  { %s9808_s5 = sld [smem:[#allocation4_spill]] }
   0x9   :  { %s9809_s0 = sld [smem:[#allocation5_spill]] }
   0xc   :  { %v7645_v1 = vld [vmem:[%s9806_s23] sm:$0xff]   ;;  %s9795_s23 = smov 112  }
   0xd   :  { %v66_v2 = vld [vmem:[%s9807_s25] sm:$0xff]  ;;  %v67_v3 = vld [vmem:[%s9807_s25 + $0x8] sm:$0xff]  ;;  %7450 = vmatpush3.bf16.msra.mxu0 %v7645_v1  ;;  %s9810_s25 = sld [smem:[#allocation6_spill]] }
   0xe   :  { %v68_v4 = vpack.c.bf16 %v67_v3, %v66_v2  ;;  %7463 = vmatprep.subr.bf16.mxu0 %v8092_v0  ;;  %v7646_v5 = vld [vmem:[%s9808_s5 + $0x8] sm:$0xff]   ;;  %v7647_v6 = vld [vmem:[%s9808_s5] sm:$0xff]  }
   0xf   :  { %7456 = vmatpush3.bf16.msra.mxu1 %v7646_v5  ;;  %v71_v8 = vld [vmem:[%s9809_s0] sm:$0xff]  ;;  %v72_v10 = vld [vmem:[%s9809_s0 + $0x8] sm:$0xff]  ;;  %s9797_s0 = smov 64  }
  0x10   :  { %7452 = vmatmul.mubr.msk.bf16.vlgmr.msra.gmra.mxu0 %vm79_vm1, %v68_v4  ;;  %7457 = vmatprep.subr.bf16.mxu1 %v8092_v0 }
  0x11   :  { %7465 = vmatprep.mubr.msk.bf16.mxu0 %vm8093_vm0, %v8092_v0 }
  0x13   :  { %7458 = vmatpush3.bf16.msra.mxu1 %v7647_v6  ;;  %v6118_v17 = vld [vmem:[%s9810_s25] ss:$0 sm:$0xff] }
  0x14   :  { %7469 = vmatprep.subr.bf16.mxu1 %v8092_v0 }
  0xd0   :  { %v117_v7 = vpop.f32.mrf.mxu0 }
  0xd1   :  { %v8244_v12 = vadd.f32 %v117_v7, %v71_v8 }
  0xd2   :  { %v7453_v9 = vpop.f32.mrf.mxu0 }
  0xd4   :  { %v120_v11 = vpop.f32.mrf.mxu0 }
  0xd5   :  { %v8246_v13 = vadd.f32 %v120_v11, %v72_v10 }
  0xd6   :  { %v7454_v14 = vpop.f32.mrf.mxu0 }
  0xd7   :  { %v126_v15 = vpack.c.bf16 %v8246_v13, %v8244_v12 }
  0xd9   :  { %7460 = vmatmul.mubr.msk.bf16.vlgmr.msra.gmra.mxu1 %vm150_vm2, %v126_v15 }
  0xda   :  { %7471 = vmatprep.mubr.msk.bf16.mxu1 %vm8093_vm0, %v8092_v0 }
 0x199   :  { %v188_v16 = vpop.f32.mrf.mxu1 }
 0x19a   :  { %v189_v20 = vadd.f32 %v6118_v17, %v188_v16 }
 0x19b   :  { %v7461_v18 = vpop.f32.mrf.mxu1 }
 0x19d   :  { %v191_v19 = vpop.f32.mrf.mxu1 }
 0x19e   :  { %v192_v21 = vadd.f32 %v6118_v17, %v191_v19 }
 0x19f   :  { %v7462_v22 = vpop.f32.mrf.mxu1 }
 0x1a0   :  { %v8256_v23 = vpack.c.bf16 %v192_v21, %v189_v20  ;;  %v318_v22 = vld [vmem:[%s9772_s6] sm:$0xf] }
 0x1a2   :  { %319 = vrot.lane.b32.xlu1 %v8256_v23, %s8094_s1  ;;  %197 = vrot.lane.b32.xlu0 %v8256_v23, %s9800_s26 }
 0x1a6   :  { %321 = vrot.lane.b32.xlu0 %v8256_v23, %s9799_s27  ;;  %s9814_s27 = smov 64  }
 0x214   :  { %v198_v24 = vpop.permute.xlu0 %197  ;;  %v320_v28 = vpop.permute.xlu1 %319 }
 0x215   :  { %v204_v25 = vsel %vm199_vm3, %v198_v24, 0  ;;  %v495_v24 = vsel %vm446_vm4, %v318_v22, 0 }
 0x216   :  { %7464 = vmatpush3.bf16.xpose.msra.mxu0 %v204_v25  ;;  %v6126_v25 = vld [vmem:[%s9772_s6 + $0x4] sm:$0xf] }
 0x217   :  { %7475 = vmatprep.subr.bf16.mxu0 %v8092_v0 }
 0x218   :  { %v322_v26 = vpop.permute.xlu0 %321 }
 0x219   :  { %v327_v27 = vsel %vm199_vm3, %v322_v26, 0  ;;  %v448_v26 = vsel %vm446_vm4, %v6126_v25, 0 }
 0x21d   :  { %7466 = vmatmul.mubr.msk.bf16.vlgmr.msra.gmra.mxu0 %vm199_vm3, %v8256_v23 }
 0x21e   :  { %7476 = vmatpush3.bf16.xpose.msra.mxu0 %v327_v27  ;;  %7477 = vmatprep.mubr.msk.bf16.mxu0 %vm8093_vm0, %v8092_v0 }
 0x21f   :  { %7487 = vmatprep.subr.bf16.mxu0 %v8092_v0 }
 0x225   :  { %7478 = vmatmul.mubr.msk.bf16.vlgmr.msra.gmra.mxu0 %vm199_vm3, %v320_v28 }
 0x226   :  { %7489 = vmatprep.mubr.msk.bf16.mxu0 %vm8093_vm0, %v8092_v0  ;;  %7488 = vmatpush3.bf16.msra.mxu0 %v448_v26 }
 0x227   :  { %7499 = vmatprep.subr.bf16.mxu0 %v8092_v0 }
 0x2dd   :  { %v240_v30 = vpop.f32.mrf.mxu0 }
 0x2de   :  { %v241_v31 = vadd.f32 %v240_v30, %v8278_v29 }
 0x2df   :  { %v7467_v32 = vpop.f32.mrf.mxu0 }
 0x2e0   :  { %v247_v34 = vsel %vm79_vm1, %v241_v31, -inf }
 0x2e1   :  { %248 = vmax.xlane.f32.xlu1 %v247_v34  ;;  %v243_v35 = vpop.f32.mrf.mxu0 }
 0x2e2   :  { %v244_v36 = vadd.f32 %v243_v35, %v8284_v33 }
 0x2e3   :  { %v7468_v37 = vpop.f32.mrf.mxu0 }
 0x2e4   :  { %v250_v38 = vsel %vm79_vm1, %v244_v36, -inf }
 0x2e5   :  { %251 = vmax.xlane.f32.xlu0 %v250_v38  ;;  %v363_v39 = vpop.f32.mrf.mxu0 }
 0x2e6   :  { %v364_v40 = vadd.f32 %v363_v39, %v8278_v29 }
 0x2e7   :  { %v7479_v41 = vpop.f32.mrf.mxu0 }
 0x2e8   :  { %v370_v42 = vsel %vm79_vm1, %v364_v40, -inf }
 0x2e9   :  { %371 = vmax.xlane.f32.xlu0 %v370_v42  ;;  %v366_v43 = vpop.f32.mrf.mxu0 }
 0x2ea   :  { %v367_v44 = vadd.f32 %v366_v43, %v8284_v33 }
 0x2eb   :  { %v7480_v45 = vpop.f32.mrf.mxu0 }
 0x2ec   :  { %v373_v46 = vsel %vm79_vm1, %v367_v44, -inf }
 0x2ed   :  { %374 = vmax.xlane.f32.xlu1 %v373_v46 }
 0x36a   :  { %v249_v47 = vpop.xlane.xlu1 %248 }
 0x36b   :  { %v253_v48 = vsub.f32 %v241_v31, %v249_v47 }
 0x36d   :  { %v255_v49 = vmul.f32 1.442695, %v253_v48 }
 0x36e   :  { %v252_v50 = vpop.xlane.xlu0 %251 }
 0x36f   :  { %8006 = vpow2.f32 %v255_v49  ;;  %v254_v51 = vsub.f32 %v244_v36, %v252_v50 }
 0x371   :  { %v257_v52 = vmul.f32 1.442695, %v254_v51 }
 0x372   :  { %v372_v53 = vpop.xlane.xlu0 %371 }
 0x373   :  { %8008 = vpow2.f32 %v257_v52  ;;  %v376_v54 = vsub.f32 %v364_v40, %v372_v53 }
 0x375   :  { %v378_v55 = vmul.f32 1.442695, %v376_v54 }
 0x376   :  { %v375_v56 = vpop.xlane.xlu1 %374 }
 0x377   :  { %8010 = vpow2.f32 %v378_v55  ;;  %v377_v57 = vsub.f32 %v367_v44, %v375_v56 }
 0x379   :  { %v380_v58 = vmul.f32 1.442695, %v377_v57 }
 0x37b   :  { %8012 = vpow2.f32 %v380_v58 }
 0x37c   :  { %v8007_v59 = vpop.eup %8006 }
 0x37d   :  { %v259_v60 = vsel %vm79_vm1, %v8007_v59, 0.0 }
 0x37e   :  { %260 = vadd.xlane.f32.xlu0 %v259_v60 }
 0x380   :  { %v8009_v61 = vpop.eup %8008 }
 0x381   :  { %v262_v62 = vsel %vm79_vm1, %v8009_v61, 0.0 }
 0x382   :  { %263 = vadd.xlane.f32.xlu1 %v262_v62 }
 0x384   :  { %v8011_v63 = vpop.eup %8010 }
 0x385   :  { %v382_v1 = vsel %vm79_vm1, %v8011_v63, 0.0 }
 0x386   :  { %383 = vadd.xlane.f32.xlu0 %v382_v1 }
 0x388   :  { %v8013_v2 = vpop.eup %8012 }
 0x389   :  { %v385_v3 = vsel %vm79_vm1, %v8013_v2, 0.0 }
 0x38a   :  { %386 = vadd.xlane.f32.xlu1 %v385_v3 }
 0x39b   :  { %393 = vrot.lane.b32.xlu1 %v8256_v23, %s9798_s21  ;;  %s9818_s21 = smov 48  }
 0x39c   :  { %270 = vrot.lane.b32.xlu0 %v8256_v23, %s9797_s0  ;;  %s9811_s0 = smov 96  }
 0x39f   :  { %540 = vrot.lane.b32.xlu1 %v8256_v23, %s9796_s22  ;;  %s9812_s22 = smov 88  }
 0x3a0   :  { %538 = vrot.lane.b32.xlu0 %v8256_v23, %s9795_s23 }
 0x407   :  { %v261_v4 = vpop.xlane.xlu0 %260 }
 0x408   :  { %8014 = vrcp.f32 %v261_v4 }
 0x40b   :  { %v264_v5 = vpop.xlane.xlu1 %263 }
 0x40c   :  { %8016 = vrcp.f32 %v264_v5 }
 0x40f   :  { %v384_v6 = vpop.xlane.xlu0 %383 }
 0x410   :  { %8018 = vrcp.f32 %v384_v6 }
 0x413   :  { %v271_v7 = vpop.permute.xlu0 %270  ;;  %v387_v8 = vpop.xlane.xlu1 %386 }
 0x414   :  { %8020 = vrcp.f32 %v387_v8  ;;  %7470 = vmatpush3.bf16.msra.mxu1 %v271_v7 }
 0x415   :  { %7481 = vmatprep.subr.bf16.mxu1 %v8092_v0  ;;  %v8015_v9 = vpop.eup %8014 }
 0x416   :  { %v266_v11 = vmul.f32 %v8015_v9, %v8007_v59 }
 0x417   :  { %v394_v16 = vpop.permute.xlu1 %393  ;;  %v539_v41 = vpop.permute.xlu0 %538 }
 0x419   :  { %v8017_v10 = vpop.eup %8016 }
 0x41a   :  { %v268_v14 = vmul.f32 %v8017_v10, %v8009_v61 }
 0x41b   :  { %v541_v36 = vpop.permute.xlu1 %540 }
 0x41c   :  { %v269_v15 = vpack.c.bf16 %v268_v14, %v266_v11  ;;  %v546_v40 = vsel %vm199_vm3, %v541_v36, 0 }
 0x41d   :  { %v8019_v17 = vpop.eup %8018 }
 0x41e   :  { %7472 = vmatmul.mubr.msk.bf16.vlgmr.msra.gmra.mxu1 %vm79_vm1, %v269_v15  ;;  %v389_v19 = vmul.f32 %v8019_v17, %v8011_v63 }
 0x41f   :  { %7482 = vmatpush3.bf16.msra.mxu1 %v394_v16  ;;  %7483 = vmatprep.mubr.msk.bf16.mxu1 %vm8093_vm0, %v8092_v0 }
 0x420   :  { %7493 = vmatprep.subr.bf16.mxu1 %v8092_v0 }
 0x421   :  { %v8021_v18 = vpop.eup %8020 }
 0x422   :  { %v391_v20 = vmul.f32 %v8021_v18, %v8013_v2 }
 0x424   :  { %v392_v21 = vpack.c.bf16 %v391_v20, %v389_v19  ;;  %v6131_v20 = vld [vmem:[%s9772_s6 + $0x8] sm:$0xf] }
 0x426   :  { %7484 = vmatmul.mubr.msk.bf16.vlgmr.msra.gmra.mxu1 %vm79_vm1, %v392_v21  ;;  %v666_v21 = vsel %vm446_vm4, %v6131_v20, 0 }
 0x427   :  { %7495 = vmatprep.mubr.msk.bf16.mxu1 %vm8093_vm0, %v8092_v0  ;;  %7494 = vmatpush3.bf16.msra.mxu1 %v495_v24 }
 0x428   :  { %7505 = vmatprep.subr.bf16.mxu1 %v8092_v0 }
 0x4de   :  { %v310_v27 = vpop.f32.mrf.mxu1 }
 0x4e0   :  { %v7473_v28 = vpop.f32.mrf.mxu1 }
 0x4e2   :  { %v313_v30 = vpop.f32.mrf.mxu1 }
 0x4e3   :  { %v317_v31 = vpack.c.bf16 %v313_v30, %v310_v27 }
 0x4e4   :  { %v7474_v32 = vpop.f32.mrf.mxu1 }
 0x4e5   :  { %7496 = vmatmul.mubr.msk.bf16.vlgmr.msra.gmra.mxu1 %vm199_vm3, %v317_v31 }
 0x4e6   :  { %v433_v34 = vpop.f32.mrf.mxu1  ;;  %7507 = vmatprep.mubr.msk.bf16.mxu1 %vm8093_vm0, %v8092_v0 }
 0x4e8   :  { %v7485_v35 = vpop.f32.mrf.mxu1 }
 0x4ea   :  { %v436_v37 = vpop.f32.mrf.mxu1 }
 0x4eb   :  { %v440_v38 = vpack.c.bf16 %v436_v37, %v433_v34 }
 0x4ec   :  { %v7486_v39 = vpop.f32.mrf.mxu1 }
 0x4ed   :  { %7490 = vmatmul.mubr.msk.bf16.vlgmr.msra.gmra.mxu0 %vm199_vm3, %v440_v38 }
 0x4ee   :  { %7500 = vmatpush3.bf16.xpose.msra.mxu0 %v546_v40  ;;  %7501 = vmatprep.mubr.msk.bf16.mxu0 %vm8093_vm0, %v8092_v0 }
 0x4ef   :  { %7511 = vmatprep.subr.bf16.mxu0 %v8092_v0 }
 0x4f5   :  { %7502 = vmatmul.mubr.msk.bf16.vlgmr.msra.gmra.mxu0 %vm199_vm3, %v539_v41 }
 0x4f6   :  { %7513 = vmatprep.mubr.msk.bf16.mxu0 %vm8093_vm0, %v8092_v0  ;;  %7512 = vmatpush3.bf16.msra.mxu0 %v666_v21 }
 0x4f7   :  { %7523 = vmatprep.subr.bf16.mxu0 %v8092_v0 }
 0x5a5   :  { %v531_v42 = vpop.f32.mrf.mxu1 }
 0x5a7   :  { %v7497_v43 = vpop.f32.mrf.mxu1 }
 0x5a9   :  { %v534_v44 = vpop.f32.mrf.mxu1 }
 0x5ab   :  { %v7498_v45 = vpop.f32.mrf.mxu1 }
 0x5ad   :  { %v484_v46 = vpop.f32.mrf.mxu0 }
 0x5ae   :  { %v8334_v47 = vadd.f32 %v531_v42, %v484_v46 }
 0x5af   :  { %v7491_v48 = vpop.f32.mrf.mxu0 }
 0x5b1   :  { %v487_v49 = vpop.f32.mrf.mxu0 }
 0x5b2   :  { %v8336_v50 = vadd.f32 %v534_v44, %v487_v49 }
 0x5b3   :  { %v7492_v51 = vpop.f32.mrf.mxu0 }
 0x5b5   :  { %v582_v52 = vpop.f32.mrf.mxu0 }
 0x5b6   :  { %v583_v53 = vadd.f32 %v582_v52, %v8278_v29 }
 0x5b7   :  { %v7503_v54 = vpop.f32.mrf.mxu0 }
 0x5b8   :  { %v589_v55 = vsel %vm79_vm1, %v583_v53, -inf }
 0x5b9   :  { %590 = vmax.xlane.f32.xlu1 %v589_v55  ;;  %v585_v56 = vpop.f32.mrf.mxu0 }
 0x5ba   :  { %v586_v57 = vadd.f32 %v585_v56, %v8284_v33 }
 0x5bb   :  { %v7504_v58 = vpop.f32.mrf.mxu0 }
 0x5bc   :  { %v592_v59 = vsel %vm79_vm1, %v586_v57, -inf }
 0x5bd   :  { %593 = vmax.xlane.f32.xlu0 %v592_v59 }
 0x642   :  { %v591_v60 = vpop.xlane.xlu1 %590 }
 0x643   :  { %v595_v61 = vsub.f32 %v583_v53, %v591_v60 }
 0x645   :  { %v597_v62 = vmul.f32 1.442695, %v595_v61 }
 0x646   :  { %v594_v63 = vpop.xlane.xlu0 %593 }
 0x647   :  { %8022 = vpow2.f32 %v597_v62  ;;  %v596_v1 = vsub.f32 %v586_v57, %v594_v63 }
 0x649   :  { %v599_v2 = vmul.f32 1.442695, %v596_v1 }
 0x64b   :  { %8024 = vpow2.f32 %v599_v2 }
 0x654   :  { %v8023_v3 = vpop.eup %8022 }
 0x655   :  { %v601_v4 = vsel %vm79_vm1, %v8023_v3, 0.0 }
 0x656   :  { %602 = vadd.xlane.f32.xlu0 %v601_v4  ;;  %v6137_v4 = vld [vmem:[%s9773_s7] ss:$0 sm:$0xff] }
 0x658   :  { %v8025_v5 = vpop.eup %8024 }
 0x659   :  { %v604_v6 = vsel %vm79_vm1, %v8025_v5, 0.0 }
 0x65a   :  { %605 = vadd.xlane.f32.xlu1 %v604_v6 }
 0x66b   :  { %713 = vrot.lane.b32.xlu1 %v8256_v23, %s9794_s30 }
 0x66c   :  { %612 = vrot.lane.b32.xlu0 %v8256_v23, %s9793_s3  ;;  %s9817_s3 = smov 72  }
 0x66f   :  { %711 = vrot.lane.b32.xlu1 %v8256_v23, %s9792_s24  ;;  %s9815_s24 = smov 80  }
 0x6df   :  { %v603_v7 = vpop.xlane.xlu0 %602 }
 0x6e0   :  { %8026 = vrcp.f32 %v603_v7 }
 0x6e3   :  { %v606_v8 = vpop.xlane.xlu1 %605  ;;  %v613_v9 = vpop.permute.xlu0 %612 }
 0x6e4   :  { %8028 = vrcp.f32 %v606_v8  ;;  %7506 = vmatpush3.bf16.msra.mxu1 %v613_v9 }
 0x6e5   :  { %7517 = vmatprep.subr.bf16.mxu1 %v8092_v0 }
 0x6e7   :  { %v714_v16 = vpop.permute.xlu1 %713 }
 0x6e8   :  { %v719_v18 = vsel %vm199_vm3, %v714_v16, 0 }
 0x6eb   :  { %v712_v19 = vpop.permute.xlu1 %711 }
 0x6ed   :  { %v8027_v10 = vpop.eup %8026 }
 0x6ee   :  { %v608_v14 = vmul.f32 %v8027_v10, %v8023_v3 }
 0x6f1   :  { %v8029_v11 = vpop.eup %8028 }
 0x6f2   :  { %v610_v15 = vmul.f32 %v8029_v11, %v8025_v5 }
 0x6f4   :  { %v611_v17 = vpack.c.bf16 %v610_v15, %v608_v14 }
 0x6f6   :  { %7508 = vmatmul.mubr.msk.bf16.vlgmr.msra.gmra.mxu1 %vm79_vm1, %v611_v17 }
 0x6f7   :  { %7518 = vmatpush3.bf16.xpose.msra.mxu1 %v719_v18  ;;  %7519 = vmatprep.mubr.msk.bf16.mxu1 %vm8093_vm0, %v8092_v0 }
 0x6f8   :  { %7529 = vmatprep.subr.bf16.mxu1 %v8092_v0 }
 0x6fe   :  { %7520 = vmatmul.mubr.msk.bf16.vlgmr.msra.gmra.mxu1 %vm199_vm3, %v712_v19 }
 0x6ff   :  { %7531 = vmatprep.mubr.msk.bf16.mxu1 %vm8093_vm0, %v8092_v0 }
 0x7b6   :  { %v652_v22 = vpop.f32.mrf.mxu1 }
 0x7b8   :  { %v7509_v24 = vpop.f32.mrf.mxu1 }
 0x7ba   :  { %v655_v25 = vpop.f32.mrf.mxu1 }
 0x7bb   :  { %v659_v26 = vpack.c.bf16 %v655_v25, %v652_v22 }
 0x7bc   :  { %v7510_v27 = vpop.f32.mrf.mxu1 }
 0x7bd   :  { %7514 = vmatmul.mubr.msk.bf16.vlgmr.msra.gmra.mxu0 %vm199_vm3, %v659_v26 }
 0x7be   :  { %v755_v28 = vpop.f32.mrf.mxu1  ;;  %7525 = vmatprep.mubr.msk.bf16.mxu0 %vm8093_vm0, %v8092_v0 }
 0x7bf   :  { %v756_v30 = vadd.f32 %v755_v28, %v8278_v29  ;;  %v7648_v28 = vld [vmem:[%s9774_s12 + $0x20] ss:$16 sps:$4 sm:$0xff]  }
 0x7c0   :  { %v7521_v31 = vpop.f32.mrf.mxu1 }
 0x7c1   :  { %v762_v32 = vsel %vm79_vm1, %v756_v30, -inf  ;;  %v7653_v31 = vld [vmem:[%s9774_s12 + $0x2c] ss:$16 sps:$4 sm:$0xff]  }
 0x7c2   :  { %763 = vmax.xlane.f32.xlu0 %v762_v32  ;;  %v758_v34 = vpop.f32.mrf.mxu1  ;;  %v7656_v32 = vld [vmem:[%s9774_s12 + $0x4] ss:$16 sps:$4 sm:$0xff]  }
 0x7c3   :  { %v759_v35 = vadd.f32 %v758_v34, %v8284_v33  ;;  %v7659_v34 = vld [vmem:[%s9774_s12 + $0xc] ss:$16 sps:$4 sm:$0xff]  }
 0x7c4   :  { %v7522_v36 = vpop.f32.mrf.mxu1 }
 0x7c5   :  { %v765_v37 = vsel %vm79_vm1, %v759_v35, -inf  ;;  %v7657_v36 = vld [vmem:[%s9774_s12 + $0x8] ss:$16 sps:$4 sm:$0xff]  }
 0x7c6   :  { %766 = vmax.xlane.f32.xlu1 %v765_v37  ;;  %v8105_v37 = vmov 0  }
 0x7d7   :  { %785 = vrot.lane.b32.xlu1 %v8256_v23, %s9791_s29  ;;  %s9816_s29 = smov 112  }
 0x84b   :  { %v764_v38 = vpop.xlane.xlu0 %763 }
 0x84c   :  { %v768_v39 = vsub.f32 %v756_v30, %v764_v38  ;;  %v7651_v30 = vld [vmem:[%s9774_s12 + $0x28] ss:$16 sps:$4 sm:$0xff]   ;;  %v7662_v38 = vld [vmem:[%s9774_s12 + $0x64] ss:$16 sps:$4 sm:$0xff]  }
 0x84e   :  { %v770_v40 = vmul.f32 1.442695, %v768_v39  ;;  %v7665_v39 = vld [vmem:[%s9774_s12 + $0x6c] ss:$16 sps:$4 sm:$0xff]  }
 0x84f   :  { %v767_v41 = vpop.xlane.xlu1 %766 }
 0x850   :  { %8030 = vpow2.f32 %v770_v40  ;;  %v769_v29 = vsub.f32 %v759_v35, %v767_v41  ;;  %v7654_v35 = vld [vmem:[%s9774_s12] ss:$16 sps:$4 sm:$0xff]  }
 0x852   :  { %v772_v42 = vmul.f32 1.442695, %v769_v29 }
 0x853   :  { %v786_v43 = vpop.permute.xlu1 %785 }
 0x854   :  { %8032 = vpow2.f32 %v772_v42  ;;  %7524 = vmatpush3.bf16.msra.mxu0 %v786_v43 }
 0x85d   :  { %v8031_v44 = vpop.eup %8030 }
 0x85e   :  { %v774_v33 = vsel %vm79_vm1, %v8031_v44, 0.0 }
 0x85f   :  { %775 = vadd.xlane.f32.xlu0 %v774_v33 }
 0x861   :  { %v8033_v45 = vpop.eup %8032 }
 0x862   :  { %v777_v46 = vsel %vm79_vm1, %v8033_v45, 0.0 }
 0x863   :  { %778 = vadd.xlane.f32.xlu0 %v777_v46 }
 0x87d   :  { %v702_v48 = vpop.f32.mrf.mxu0 }
 0x87e   :  { %v709_v23 = vadd.f32 %v702_v48, %v8334_v47  ;;  %v6135_v47 = vld [vmem:[%s9772_s6 + $0xc] sm:$0xf] }
 0x87f   :  { %v7515_v49 = vpop.f32.mrf.mxu0  ;;  %v839_v61 = vsel %vm446_vm4, %v6135_v47, 0  ;;  %v7669_v47 = vld [vmem:[%s9774_s12 + $0x48] ss:$16 sps:$4 sm:$0xff]  }
 0x880   :  { %7530 = vmatpush3.bf16.msra.mxu1 %v839_v61  ;;  %v7672_v61 = vld [vmem:[%s9775_s14 + $0x178] sm:$0xff]  }
 0x881   :  { %v705_v51 = vpop.f32.mrf.mxu0  ;;  %1069 = vmatprep.subr.bf16.mxu1 %v7653_v31  ;;  %v7704_v31 = vld [vmem:[%s9775_s14 + $0x78] sm:$0xff]  }
 0x882   :  { %v710_v52 = vadd.f32 %v705_v51, %v8336_v50 }
 0x883   :  { %v7516_v53 = vpop.f32.mrf.mxu0 }
 0x884   :  { %v7660_v53 = vld [vmem:[%s9774_s12 + $0x60] ss:$16 sps:$4 sm:$0xff]  }
 0x8e8   :  { %v776_v54 = vpop.xlane.xlu0 %775 }
 0x8e9   :  { %8034 = vrcp.f32 %v776_v54  ;;  %v7663_v54 = vld [vmem:[%s9774_s12 + $0x68] ss:$16 sps:$4 sm:$0xff]  }
 0x8ec   :  { %v779_v55 = vpop.xlane.xlu0 %778 }
 0x8ed   :  { %8036 = vrcp.f32 %v779_v55 }
 0x8f6   :  { %v8035_v56 = vpop.eup %8034 }
 0x8f7   :  { %v781_v58 = vmul.f32 %v8035_v56, %v8031_v44 }
 0x8fa   :  { %v8037_v57 = vpop.eup %8036 }
 0x8fb   :  { %v783_v59 = vmul.f32 %v8037_v57, %v8033_v45  ;;  %v6138_v45 = vld [vmem:[%s9776_s8] ss:$0 sm:$0xff]  ;;  %v7668_v57 = vld [vmem:[%s9774_s12 + $0x44] ss:$16 sps:$4 sm:$0xff]  }
 0x8fd   :  { %v784_v60 = vpack.c.bf16 %v783_v59, %v781_v58  ;;  %v7671_v58 = vld [vmem:[%s9774_s12 + $0x4c] ss:$16 sps:$4 sm:$0xff]  }
 0x8ff   :  { %7526 = vmatmul.mubr.msk.bf16.vlgmr.msra.gmra.mxu0 %vm79_vm1, %v784_v60  ;;  %v7666_v60 = vld [vmem:[%s9774_s12 + $0x40] ss:$16 sps:$4 sm:$0xff]  }
 0x900   :  { %1046 = vmatprep.mubr.bf16.mxu0 %v8105_v37 }
 0x9bf   :  { %v825_v50 = vpop.f32.mrf.mxu0 }
 0x9c1   :  { %v7527_v62 = vpop.f32.mrf.mxu0 }
 0x9c2   :  { %v7674_v62 = vld [vmem:[%s9775_s14 + $0x138] sm:$0xff]  }
 0x9c3   :  { %v828_v63 = vpop.f32.mrf.mxu0 }
 0x9c4   :  { %v832_v1 = vpack.c.bf16 %v828_v63, %v825_v50  ;;  %v7673_v50 = vld [vmem:[%s9775_s14 + $0x1f8] sm:$0xff]  }
 0x9c5   :  { %v7528_v2 = vpop.f32.mrf.mxu0  ;;  %v7675_v63 = vld [vmem:[%s9775_s14 + $0x1b8] sm:$0xff]  }
 0x9c6   :  { %7532 = vmatmul.mubr.msk.bf16.vlgmr.msra.gmra.mxu1 %vm199_vm3, %v832_v1  ;;  %v7676_v1 = vld [vmem:[%s9775_s14 + $0x170] sm:$0xff]  }
 0x9c7   :  { %1070 = vmatpush1.bf16.msra.mxu1 %v7651_v30  ;;  %1089 = vmatprep.mubr.bf16.mxu1 %v8105_v37  ;;  %v7677_v2 = vld [vmem:[%s9775_s14 + $0x1f0] sm:$0xff]   ;;  %v7703_v30 = vld [vmem:[%s9775_s14 + $0x180] sm:$0xff]  }
 0x9c8   :  { %1071 = vmatprep.subr.bf16.mxu1 %v7659_v34  ;;  %v951_v34 = vlaneseq }
 0x9cb   :  { %1072 = vmatpush1.bf16.msra.mxu1 %v7657_v36 }
 0x9cc   :  { %1303 = vmatprep.subr.bf16.mxu1 %v7665_v39 }
 0xa86   :  { %v875_v3 = vpop.f32.mrf.mxu1 }
 0xa87   :  { %v882_v5 = vadd.f32 %v875_v3, %v709_v23  ;;  %v6139_v23 = vld [vmem:[%s9777_s9] ss:$0 sm:$0xff]  ;;  %v7678_v3 = vld [vmem:[%s9775_s14 + $0x130] sm:$0xff]  }
 0xa88   :  { %v7533_v6 = vpop.f32.mrf.mxu1 }
 0xa89   :  { %v891_v7 = vadd.f32 %v6137_v4, %v882_v5  ;;  %v7680_v5 = vld [vmem:[%s9775_s14 + $0x168] sm:$0xff]  }
 0xa8a   :  { %v878_v8 = vpop.f32.mrf.mxu1  ;;  %v7681_v6 = vld [vmem:[%s9775_s14 + $0x1e8] sm:$0xff]  }
 0xa8b   :  { %v883_v9 = vadd.f32 %v878_v8, %v710_v52  ;;  %v893_v10 = vadd.f32 %v891_v7, %v8244_v12  ;;  %v7682_v7 = vld [vmem:[%s9775_s14 + $0x128] sm:$0xff]  }
 0xa8c   :  { %v7534_v11 = vpop.f32.mrf.mxu1  ;;  %v7683_v8 = vld [vmem:[%s9775_s14 + $0x1a8] sm:$0xff]  }
 0xa8d   :  { %v892_v14 = vadd.f32 %v6137_v4, %v883_v9  ;;  %v897_v15 = vsel %vm150_vm2, %v893_v10, 0.0  ;;  %v7679_v4 = vld [vmem:[%s9775_s14 + $0x1b0] sm:$0xff]   ;;  %v7684_v9 = vld [vmem:[%s9775_s14 + $0x160] sm:$0xff]  }
 0xa8e   :  { %898 = vadd.xlane.f32.xlu0 %v897_v15  ;;  %v7686_v11 = vld [vmem:[%s9775_s14 + $0x120] sm:$0xff]   ;;  %v7688_v15 = vld [vmem:[%s9775_s14 + $0x158] sm:$0xff]  }
 0xa8f   :  { %v894_v16 = vadd.f32 %v892_v14, %v8246_v13  ;;  %v7650_v13 = vld [vmem:[%s9774_s12 + $0x24] ss:$16 sps:$4 sm:$0xff]  }
 0xa90   :  { %1026 = vmatprep.subr.bf16.mxu0 %v7650_v13  ;;  %v7687_v14 = vld [vmem:[%s9775_s14 + $0x1a0] sm:$0xff]  }
 0xa91   :  { %v900_v17 = vsel %vm150_vm2, %v894_v16, 0.0  ;;  %1027 = vmatpush1.bf16.msra.mxu0 %v7648_v28  ;;  %v7701_v13 = vld [vmem:[%s9775_s14 + $0x1c0] sm:$0xff]  }
 0xa92   :  { %901 = vadd.xlane.f32.xlu0 %v900_v17  ;;  %1028 = vmatprep.subr.bf16.mxu0 %v7656_v32  ;;  %v7690_v17 = vld [vmem:[%s9775_s14 + $0x118] sm:$0xff]   ;;  %v7702_v28 = vld [vmem:[%s9775_s14 + $0x100] sm:$0xff]  }
 0xa93   :  { %v7705_v32 = vld [vmem:[%s9775_s14 + $0xf8] sm:$0xff]  }
 0xa95   :  { %1029 = vmatpush1.bf16.msra.mxu0 %v7654_v35 }
 0xa96   :  { %1260 = vmatprep.subr.bf16.mxu0 %v7662_v38 }
 0xb17   :  { %v899_v18 = vpop.xlane.xlu0 %898 }
 0xb18   :  { %v904_v19 = vmul.f32 0.03125, %v899_v18  ;;  %v7691_v18 = vld [vmem:[%s9775_s14 + $0x198] sm:$0xff]  }
 0xb1a   :  { %v906_v20 = vsub.f32 %v893_v10, %v904_v19  ;;  %v7685_v10 = vld [vmem:[%s9775_s14 + $0x1e0] sm:$0xff]   ;;  %v7692_v19 = vld [vmem:[%s9775_s14 + $0x150] sm:$0xff]  }
 0xb1b   :  { %v902_v21 = vpop.xlane.xlu0 %901 }
 0xb1c   :  { %v905_v22 = vmul.f32 0.03125, %v902_v21  ;;  %v908_v24 = vmul.f32 %v906_v20, %v906_v20  ;;  %v7694_v21 = vld [vmem:[%s9775_s14 + $0x110] sm:$0xff]  }
 0xb1e   :  { %v907_v25 = vsub.f32 %v894_v16, %v905_v22  ;;  %v910_v26 = vsel %vm150_vm2, %v908_v24, 0.0  ;;  %v7689_v16 = vld [vmem:[%s9775_s14 + $0x1d8] sm:$0xff]   ;;  %v7695_v22 = vld [vmem:[%s9775_s14 + $0x190] sm:$0xff]   ;;  %v7696_v24 = vld [vmem:[%s9775_s14 + $0x148] sm:$0xff]  }
 0xb1f   :  { %911 = vadd.xlane.f32.xlu0 %v910_v26  ;;  %v7698_v26 = vld [vmem:[%s9775_s14 + $0x108] sm:$0xff]  }
 0xb20   :  { %v909_v12 = vmul.f32 %v907_v25, %v907_v25 }
 0xb22   :  { %v913_v27 = vsel %vm150_vm2, %v909_v12, 0.0  ;;  %v7699_v12 = vld [vmem:[%s9775_s14 + $0x188] sm:$0xff]  }
 0xb23   :  { %914 = vadd.xlane.f32.xlu0 %v913_v27  ;;  %v7700_v27 = vld [vmem:[%s9775_s14 + $0x140] sm:$0xff]  }
 0xba8   :  { %v912_v40 = vpop.xlane.xlu0 %911 }
 0xba9   :  { %v916_v41 = vmul.f32 0.03125, %v912_v40  ;;  %v952_v40 = vshrl.u32 %v951_v34, 7 }
 0xbab   :  { %v918_v29 = vadd.f32 1e-05, %v916_v41 }
 0xbac   :  { %v915_v42 = vpop.xlane.xlu0 %914 }
 0xbad   :  { %8038 = vrsqrt.f32 %v918_v29  ;;  %v917_v43 = vmul.f32 0.03125, %v915_v42 }
 0xbaf   :  { %v919_v44 = vadd.f32 1e-05, %v917_v43 }
 0xbb1   :  { %8040 = vrsqrt.f32 %v919_v44  ;;  %v8576_v44 = vsub.s32 1, %v952_v40 }
 0xbba   :  { %v8039_v33 = vpop.eup %8038 }
 0xbbb   :  { %v922_v46 = vmul.f32 %v8039_v33, %v906_v20  ;;  %v7693_v20 = vld [vmem:[%s9775_s14 + $0x1d0] sm:$0xff]   ;;  %v8578_v33 = vsub.s32 3, %v952_v40 }
 0xbbd   :  { %v930_v49 = vmul.f32 %v6138_v45, %v922_v46  ;;  %v8583_v46 = vsub.s32 0, %v952_v40 }
 0xbbe   :  { %v8041_v48 = vpop.eup %8040 }
 0xbbf   :  { %v923_v51 = vmul.f32 %v8041_v48, %v907_v25  ;;  %v8436_v55 = vadd.f32 %v6139_v23, %v930_v49  ;;  %v7697_v25 = vld [vmem:[%s9775_s14 + $0x1c8] sm:$0xff]   ;;  %v8585_v48 = vsub.s32 2, %v952_v40 }
 0xbc1   :  { %v931_v52 = vmul.f32 %v6138_v45, %v923_v51  ;;  %v6158_v45 = vld [vmem:[%s9778_s13 + $0x4] sm:$0xf] }
 0xbc2   :  { %v1195_v51 = vrot.slane %v6158_v45, %v8576_v44 }
 0xbc3   :  { %v8438_v56 = vadd.f32 %v6139_v23, %v931_v52  ;;  %v1203_v52 = vrot.slane %v6158_v45, %v8578_v33 }
 0xbc5   :  { %v8448_v59 = vpack.c.bf16 %v8438_v56, %v8436_v55 }
 0xbc7   :  { %6148 = vmatmul.mubr.msk.bf16.vlgmr.msra.gmra.mxu0 %vm150_vm2, %v8448_v59  ;;  %6149 = vmatmul.mubr.msk.bf16.vlgmr.msra.gmra.mxu1 %vm150_vm2, %v8448_v59 }
 0xbc8   :  { %1261 = vmatpush1.bf16.msra.mxu0 %v7660_v53  ;;  %1304 = vmatpush1.bf16.msra.mxu1 %v7663_v54  ;;  %v1191_v53 = vrot.slane %v6158_v45, %v8583_v46  ;;  %v1199_v54 = vrot.slane %v6158_v45, %v8585_v48  ;;  %v7711_v45 = vld [vmem:[%s9775_s14 + $0xb0] sm:$0xff]  }
 0xbc9   :  { %1262 = vmatprep.subr.bf16.mxu0 %v7668_v57  ;;  %1305 = vmatprep.subr.bf16.mxu1 %v7671_v58 }
 0xbca   :  { %1280 = vmatprep.mubr.bf16.mxu0 %v8105_v37  ;;  %1323 = vmatprep.mubr.bf16.mxu1 %v8105_v37 }
 0xbcc   :  { %1263 = vmatpush1.bf16.msra.mxu0 %v7666_v60  ;;  %1306 = vmatpush1.bf16.msra.mxu1 %v7669_v47  ;;  %v8594_v60 = vld [vmem:[%s9778_s13] sm:$0xf] }
 0xbcd   :  { %7064 = vmatprep.subr.bf16.mxu0 %v7672_v61  ;;  %7086 = vmatprep.subr.bf16.mxu1 %v7673_v50  ;;  %v958_v47 = vrot.slane %v8594_v60, %v8576_v44  ;;  %v966_v61 = vrot.slane %v8594_v60, %v8578_v33 }
 0xbcf   :  { %6167 = vmatmul.mubr.msk.bf16.vlgmr.msra.gmra.mxu0 %vm150_vm2, %v8448_v59  ;;  %6168 = vmatmul.mubr.msk.bf16.vlgmr.msra.gmra.mxu1 %vm150_vm2, %v8448_v59 }
 0xbd0   :  { %7065 = vmatpush3.bf16.msra.mxu0 %v7674_v62  ;;  %7087 = vmatpush3.bf16.msra.mxu1 %v7675_v63 }
 0xbd1   :  { %7066 = vmatprep.subr.bf16.mxu0 %v7676_v1  ;;  %7088 = vmatprep.subr.bf16.mxu1 %v7677_v2 }
 0xbd4   :  { %7067 = vmatpush3.bf16.msra.mxu0 %v7678_v3  ;;  %7089 = vmatpush3.bf16.msra.mxu1 %v7679_v4 }
 0xbd5   :  { %7068 = vmatprep.subr.bf16.mxu0 %v7680_v5  ;;  %7090 = vmatprep.subr.bf16.mxu1 %v7681_v6 }
 0xbd8   :  { %7069 = vmatpush3.bf16.msra.mxu0 %v7682_v7  ;;  %7091 = vmatpush3.bf16.msra.mxu1 %v7683_v8 }
 0xbd9   :  { %7070 = vmatprep.subr.bf16.mxu0 %v7684_v9  ;;  %7092 = vmatprep.subr.bf16.mxu1 %v7685_v10 }
 0xbdc   :  { %7071 = vmatpush3.bf16.msra.mxu0 %v7686_v11  ;;  %7093 = vmatpush3.bf16.msra.mxu1 %v7687_v14 }
 0xbdd   :  { %7072 = vmatprep.subr.bf16.mxu0 %v7688_v15  ;;  %7094 = vmatprep.subr.bf16.mxu1 %v7689_v16 }
 0xbe0   :  { %7073 = vmatpush3.bf16.msra.mxu0 %v7690_v17  ;;  %7095 = vmatpush3.bf16.msra.mxu1 %v7691_v18 }
 0xbe1   :  { %7074 = vmatprep.subr.bf16.mxu0 %v7692_v19  ;;  %7096 = vmatprep.subr.bf16.mxu1 %v7693_v20 }
 0xbe4   :  { %7075 = vmatpush3.bf16.msra.mxu0 %v7694_v21  ;;  %7097 = vmatpush3.bf16.msra.mxu1 %v7695_v22 }
 0xbe5   :  { %7076 = vmatprep.subr.bf16.mxu0 %v7696_v24  ;;  %7098 = vmatprep.subr.bf16.mxu1 %v7697_v25 }
 0xbe8   :  { %7077 = vmatpush3.bf16.msra.mxu0 %v7698_v26  ;;  %7099 = vmatpush3.bf16.msra.mxu1 %v7699_v12 }
 0xbe9   :  { %7078 = vmatprep.subr.bf16.mxu0 %v7700_v27  ;;  %7100 = vmatprep.subr.bf16.mxu1 %v7701_v13  ;;  %v7706_v13 = vld [vmem:[%s9775_s14 + $0x38] sm:$0xff]  }
 0xbec   :  { %7079 = vmatpush3.bf16.msra.mxu0 %v7702_v28  ;;  %7101 = vmatpush3.bf16.msra.mxu1 %v7703_v30  ;;  %v7707_v28 = vld [vmem:[%s9775_s14 + $0xb8] sm:$0xff]  }
 0xbed   :  { %7108 = vmatprep.subr.bf16.mxu0 %v7704_v31  ;;  %7130 = vmatprep.subr.bf16.mxu1 %v7705_v32 }
 0xc87   :  { %v8568_v35 = vpop.f32.mrf.mxu0  ;;  %v8570_v36 = vpop.f32.mrf.mxu1 }
 0xc89   :  { %v1050_v38 = vpop.f32.mrf.mxu0  ;;  %v1093_v39 = vpop.f32.mrf.mxu1 }
 0xc8a   :  { %v1051_v14 = vadd.f32 %v1050_v38, %v958_v47  ;;  %v1094_v15 = vadd.f32 %v1093_v39, %v966_v61  ;;  %v7708_v38 = vld [vmem:[%s9775_s14 + $0x70] sm:$0xff]  }
 0xc8b   :  { %v8572_v41 = vpop.f32.mrf.mxu0  ;;  %v8574_v29 = vpop.f32.mrf.mxu1  ;;  %v7709_v39 = vld [vmem:[%s9775_s14 + $0xf0] sm:$0xff]  }
 0xc8c   :  { %v1101_v30 = vmax.f32 %v1051_v14, 0.0  ;;  %v1103_v31 = vmax.f32 %v1094_v15, 0.0  ;;  %v7733_v14 = vld [vmem:[%s9775_s14 + $0xc0] sm:$0xff]  }
 0xc8d   :  { %v1054_v42 = vpop.f32.mrf.mxu0  ;;  %v1097_v43 = vpop.f32.mrf.mxu1 }
 0xc8e   :  { %v1055_v4 = vadd.f32 %v1054_v42, %v958_v47  ;;  %v1098_v5 = vadd.f32 %v1097_v43, %v966_v61  ;;  %v7710_v43 = vld [vmem:[%s9775_s14 + $0x30] sm:$0xff]   ;;  %v7720_v47 = vld [vmem:[%s9775_s14 + $0x58] sm:$0xff]  }
 0xc8f   :  { %v1282_v23 = vpop.f32.mrf.mxu0  ;;  %v1325_v49 = vpop.f32.mrf.mxu1  ;;  %v7721_v61 = vld [vmem:[%s9775_s14 + $0xd8] sm:$0xff]  }
 0xc90   :  { %v1283_v6 = vadd.f32 %v1282_v23, %v1191_v53  ;;  %v1326_v7 = vadd.f32 %v1325_v49, %v1199_v54  ;;  %v1105_v22 = vmax.f32 %v1055_v4, 0.0  ;;  %v1107_v24 = vmax.f32 %v1098_v5, 0.0  ;;  %v7712_v23 = vld [vmem:[%s9775_s14 + $0x68] sm:$0xff]  }
 0xc91   :  { %v1284_v57 = vpop.f32.mrf.mxu0  ;;  %v1327_v58 = vpop.f32.mrf.mxu1  ;;  %v7713_v49 = vld [vmem:[%s9775_s14 + $0xe8] sm:$0xff]  }
 0xc92   :  { %v1285_v63 = vadd.f32 %v1284_v57, %v1195_v51  ;;  %v1328_v1 = vadd.f32 %v1327_v58, %v1203_v52  ;;  %v1334_v25 = vmax.f32 %v1283_v6, 0.0  ;;  %v1336_v26 = vmax.f32 %v1326_v7, 0.0  ;;  %v7718_v57 = vld [vmem:[%s9775_s14 + $0x20] sm:$0xff]   ;;  %v7728_v4 = vld [vmem:[%s9775_s14 + $0x48] sm:$0xff]  }
 0xc93   :  { %v1286_v50 = vpop.f32.mrf.mxu0  ;;  %v1329_v62 = vpop.f32.mrf.mxu1  ;;  %v1109_v40 = vpack.c.bf16 %v1105_v22, %v1101_v30  ;;  %v1111_v42 = vpack.c.bf16 %v1107_v24, %v1103_v31  ;;  %v7719_v58 = vld [vmem:[%s9775_s14 + $0xa0] sm:$0xff]   ;;  %v7729_v5 = vld [vmem:[%s9775_s14 + $0xc8] sm:$0xff]   ;;  %v954_v6 = vrot.slane %v8594_v60, %v8583_v46  ;;  %v962_v7 = vrot.slane %v8594_v60, %v8585_v48  ;;  %v7749_v30 = vld [vmem:[%s9775_s14 + $0x2f8] sm:$0xff]  }
 0xc94   :  { %v1287_v2 = vadd.f32 %v1286_v50, %v1191_v53  ;;  %v1330_v3 = vadd.f32 %v1329_v62, %v1199_v54  ;;  %v1335_v18 = vmax.f32 %v1285_v63, 0.0  ;;  %v1337_v19 = vmax.f32 %v1328_v1, 0.0  ;;  %v7716_v53 = vld [vmem:[%s9775_s14 + $0x60] sm:$0xff]   ;;  %v7722_v50 = vld [vmem:[%s9775_s14 + $0x18] sm:$0xff]   ;;  %v7724_v63 = vld [vmem:[%s9775_s14 + $0x50] sm:$0xff]  }
 0xc95   :  { %v1288_v8 = vpop.f32.mrf.mxu0  ;;  %v1331_v9 = vpop.f32.mrf.mxu1  ;;  %v7717_v54 = vld [vmem:[%s9775_s14 + $0xe0] sm:$0xff]   ;;  %v7723_v62 = vld [vmem:[%s9775_s14 + $0x98] sm:$0xff]   ;;  %v7725_v1 = vld [vmem:[%s9775_s14 + $0xd0] sm:$0xff]   ;;  %v1049_v15 = vadd.f32 %v8568_v35, %v954_v6 }
 0xc96   :  { %v1289_v10 = vadd.f32 %v1288_v8, %v1195_v51  ;;  %v1332_v11 = vadd.f32 %v1331_v9, %v1203_v52  ;;  %v1338_v16 = vmax.f32 %v1287_v2, 0.0  ;;  %v1340_v17 = vmax.f32 %v1330_v3, 0.0  ;;  %v7714_v51 = vld [vmem:[%s9775_s14 + $0x28] sm:$0xff]   ;;  %v7726_v2 = vld [vmem:[%s9775_s14 + $0x10] sm:$0xff]   ;;  %v7732_v60 = vld [vmem:[%s9775_s14 + $0x40] sm:$0xff]  }
 0xc97   :  { %v7715_v52 = vld [vmem:[%s9775_s14 + $0xa8] sm:$0xff]   ;;  %v7727_v3 = vld [vmem:[%s9775_s14 + $0x90] sm:$0xff]   ;;  %v7750_v31 = vld [vmem:[%s9775_s14 + $0x238] sm:$0xff]  }
 0xc98   :  { %v1339_v20 = vmax.f32 %v1289_v10, 0.0  ;;  %v1341_v21 = vmax.f32 %v1332_v11, 0.0  ;;  %v1342_v32 = vpack.c.bf16 %v1338_v16, %v1334_v25  ;;  %v1344_v34 = vpack.c.bf16 %v1340_v17, %v1336_v26  ;;  %v7730_v8 = vld [vmem:[%s9775_s14 + $0x8] sm:$0xff]   ;;  %v7738_v35 = vld [vmem:[%s9774_s12 + $0xa4] ss:$16 sps:$4 sm:$0xff]  }
 0xc99   :  { %v7731_v9 = vld [vmem:[%s9775_s14 + $0x88] sm:$0xff]   ;;  %v1053_v10 = vadd.f32 %v8572_v41, %v954_v6  ;;  %v1096_v11 = vadd.f32 %v8574_v29, %v962_v7  ;;  %v1092_v16 = vadd.f32 %v8570_v36, %v962_v7  ;;  %v7734_v41 = vld [vmem:[%s9775_s14] sm:$0xff]  }
 0xc9a   :  { %v1343_v12 = vpack.c.bf16 %v1339_v20, %v1335_v18  ;;  %v1345_v27 = vpack.c.bf16 %v1341_v21, %v1337_v19  ;;  %v7735_v29 = vld [vmem:[%s9775_s14 + $0x80] sm:$0xff]   ;;  %v7741_v36 = vld [vmem:[%s9774_s12 + $0xac] ss:$16 sps:$4 sm:$0xff]   ;;  %v1100_v19 = vmax.f32 %v1049_v15, 0.0  ;;  %v7739_v22 = vld [vmem:[%s9774_s12 + $0xa8] ss:$16 sps:$4 sm:$0xff]  }
 0xc9b   :  { %v1104_v17 = vmax.f32 %v1053_v10, 0.0  ;;  %v1106_v18 = vmax.f32 %v1096_v11, 0.0  ;;  %v1102_v20 = vmax.f32 %v1092_v16, 0.0  ;;  %v7736_v21 = vld [vmem:[%s9774_s12 + $0xa0] ss:$16 sps:$4 sm:$0xff]  }
 0xc9c   :  { %1635 = vmatprep.mubr.bf16.mxu0 %v1343_v12  ;;  %1676 = vmatprep.mubr.bf16.mxu1 %v1345_v27  ;;  %v7744_v26 = vld [vmem:[%s9774_s12 + $0x84] ss:$16 sps:$4 sm:$0xff]   ;;  %v7747_v12 = vld [vmem:[%s9774_s12 + $0x8c] ss:$16 sps:$4 sm:$0xff]   ;;  %v7742_v27 = vld [vmem:[%s9774_s12 + $0x80] ss:$16 sps:$4 sm:$0xff]  }
 0xc9d   :  { %1636 = vmatmul.mubr.bf16.vlgmr.msra.gmra.mxu0 %v1342_v32  ;;  %1677 = vmatmul.mubr.bf16.vlgmr.msra.gmra.mxu1 %v1344_v34  ;;  %v1108_v24 = vpack.c.bf16 %v1104_v17, %v1100_v19  ;;  %v1110_v25 = vpack.c.bf16 %v1106_v18, %v1102_v20  ;;  %v7751_v32 = vld [vmem:[%s9775_s14 + $0x2b8] sm:$0xff]   ;;  %v7752_v34 = vld [vmem:[%s9775_s14 + $0x270] sm:$0xff]   ;;  %v7777_v6 = vld [vmem:[%s9775_s14 + $0x2c0] sm:$0xff]  }
 0xc9e   :  { %7109 = vmatpush3.bf16.msra.mxu0 %v7706_v13  ;;  %7131 = vmatpush3.bf16.msra.mxu1 %v7707_v28  ;;  %v7745_v13 = vld [vmem:[%s9774_s12 + $0x88] ss:$16 sps:$4 sm:$0xff]   ;;  %v7778_v7 = vld [vmem:[%s9775_s14 + $0x200] sm:$0xff]   ;;  %v7785_v10 = vld [vmem:[%s9774_s12 + $0xec] ss:$16 sps:$4 sm:$0xff]  }
 0xc9f   :  { %1909 = vmatprep.mubr.bf16.mxu0 %v1109_v40  ;;  %1950 = vmatprep.mubr.bf16.mxu1 %v1111_v42  ;;  %v7748_v28 = vld [vmem:[%s9775_s14 + $0x278] sm:$0xff]   ;;  %v7755_v40 = vld [vmem:[%s9775_s14 + $0x2b0] sm:$0xff]   ;;  %v7756_v42 = vld [vmem:[%s9775_s14 + $0x268] sm:$0xff]  }
 0xca0   :  { %7110 = vmatprep.subr.bf16.mxu0 %v7708_v38  ;;  %7132 = vmatprep.subr.bf16.mxu1 %v7709_v39  ;;  %v7753_v38 = vld [vmem:[%s9775_s14 + $0x2f0] sm:$0xff]  }
 0xca1   :  { %v7754_v39 = vld [vmem:[%s9775_s14 + $0x230] sm:$0xff]  }
 0xca2   :  { %7111 = vmatpush3.bf16.msra.mxu0 %v7710_v43  ;;  %7133 = vmatpush3.bf16.msra.mxu1 %v7711_v45  ;;  %v7757_v43 = vld [vmem:[%s9775_s14 + $0x2e8] sm:$0xff]  }
 0xca3   :  { %7112 = vmatprep.subr.bf16.mxu0 %v7712_v23  ;;  %7134 = vmatprep.subr.bf16.mxu1 %v7713_v49  ;;  %v7758_v45 = vld [vmem:[%s9775_s14 + $0x228] sm:$0xff]   ;;  %v7760_v49 = vld [vmem:[%s9775_s14 + $0x260] sm:$0xff]  }
 0xca4   :  { %v7759_v23 = vld [vmem:[%s9775_s14 + $0x2a8] sm:$0xff]  }
 0xca6   :  { %7113 = vmatpush3.bf16.msra.mxu0 %v7714_v51  ;;  %7135 = vmatpush3.bf16.msra.mxu1 %v7715_v52  ;;  %v7761_v51 = vld [vmem:[%s9775_s14 + $0x2e0] sm:$0xff]  }
 0xca7   :  { %7114 = vmatprep.subr.bf16.mxu0 %v7716_v53  ;;  %7136 = vmatprep.subr.bf16.mxu1 %v7717_v54  ;;  %v7762_v52 = vld [vmem:[%s9775_s14 + $0x220] sm:$0xff]   ;;  %v7764_v54 = vld [vmem:[%s9775_s14 + $0x258] sm:$0xff]  }
 0xca8   :  { %v7763_v53 = vld [vmem:[%s9775_s14 + $0x2a0] sm:$0xff]  }
 0xcaa   :  { %7115 = vmatpush3.bf16.msra.mxu0 %v7718_v57  ;;  %7137 = vmatpush3.bf16.msra.mxu1 %v7719_v58  ;;  %v7765_v57 = vld [vmem:[%s9775_s14 + $0x2d8] sm:$0xff]  }
 0xcab   :  { %7116 = vmatprep.subr.bf16.mxu0 %v7720_v47  ;;  %7138 = vmatprep.subr.bf16.mxu1 %v7721_v61  ;;  %v7766_v58 = vld [vmem:[%s9775_s14 + $0x218] sm:$0xff]   ;;  %v7768_v61 = vld [vmem:[%s9775_s14 + $0x250] sm:$0xff]  }
 0xcac   :  { %v7767_v47 = vld [vmem:[%s9775_s14 + $0x298] sm:$0xff]  }
 0xcae   :  { %7117 = vmatpush3.bf16.msra.mxu0 %v7722_v50  ;;  %7139 = vmatpush3.bf16.msra.mxu1 %v7723_v62  ;;  %v7769_v50 = vld [vmem:[%s9775_s14 + $0x2d0] sm:$0xff]  }
 0xcaf   :  { %7118 = vmatprep.subr.bf16.mxu0 %v7724_v63  ;;  %7140 = vmatprep.subr.bf16.mxu1 %v7725_v1  ;;  %v7770_v62 = vld [vmem:[%s9775_s14 + $0x210] sm:$0xff]   ;;  %v7772_v1 = vld [vmem:[%s9775_s14 + $0x248] sm:$0xff]  }
 0xcb0   :  { %v7771_v63 = vld [vmem:[%s9775_s14 + $0x290] sm:$0xff]  }
 0xcb2   :  { %7119 = vmatpush3.bf16.msra.mxu0 %v7726_v2  ;;  %7141 = vmatpush3.bf16.msra.mxu1 %v7727_v3  ;;  %v7773_v2 = vld [vmem:[%s9775_s14 + $0x2c8] sm:$0xff]  }
 0xcb3   :  { %7120 = vmatprep.subr.bf16.mxu0 %v7728_v4  ;;  %7142 = vmatprep.subr.bf16.mxu1 %v7729_v5  ;;  %v7774_v3 = vld [vmem:[%s9775_s14 + $0x208] sm:$0xff]   ;;  %v7776_v5 = vld [vmem:[%s9775_s14 + $0x240] sm:$0xff]  }
 0xcb4   :  { %v7775_v4 = vld [vmem:[%s9775_s14 + $0x288] sm:$0xff]  }
 0xcb6   :  { %7121 = vmatpush3.bf16.msra.mxu0 %v7730_v8  ;;  %7143 = vmatpush3.bf16.msra.mxu1 %v7731_v9  ;;  %v7779_v8 = vld [vmem:[%s9775_s14 + $0x280] sm:$0xff]  }
 0xcb7   :  { %7122 = vmatprep.subr.bf16.mxu0 %v7732_v60  ;;  %7144 = vmatprep.subr.bf16.mxu1 %v7733_v14  ;;  %v7782_v9 = vld [vmem:[%s9774_s12 + $0xe4] ss:$16 sps:$4 sm:$0xff]  }
 0xcba   :  { %7123 = vmatpush3.bf16.msra.mxu0 %v7734_v41  ;;  %7145 = vmatpush3.bf16.msra.mxu1 %v7735_v29 }
 0xcbb   :  { %2043 = vmatprep.subr.bf16.mxu0 %v7738_v35  ;;  %2086 = vmatprep.subr.bf16.mxu1 %v7741_v36 }
 0xcbd   :  { %1910 = vmatmul.mubr.bf16.vlgmr.msra.gmra.mxu0 %v1108_v24  ;;  %1951 = vmatmul.mubr.bf16.vlgmr.msra.gmra.mxu1 %v1110_v25 }
 0xcbe   :  { %2044 = vmatpush1.bf16.msra.mxu0 %v7736_v21  ;;  %2087 = vmatpush1.bf16.msra.mxu1 %v7739_v22 }
 0xcbf   :  { %2045 = vmatprep.subr.bf16.mxu0 %v7744_v26  ;;  %2088 = vmatprep.subr.bf16.mxu1 %v7747_v12 }
 0xcc0   :  { %2063 = vmatprep.mubr.bf16.mxu0 %v8105_v37  ;;  %2106 = vmatprep.mubr.bf16.mxu1 %v8105_v37 }
 0xcc2   :  { %2046 = vmatpush1.bf16.msra.mxu0 %v7742_v27  ;;  %2089 = vmatpush1.bf16.msra.mxu1 %v7745_v13 }
 0xcc3   :  { %7152 = vmatprep.subr.bf16.mxu0 %v7748_v28  ;;  %7174 = vmatprep.subr.bf16.mxu1 %v7749_v30 }
 0xcc5   :  { %6314 = vmatmul.mubr.msk.bf16.vlgmr.msra.gmra.mxu0 %vm150_vm2, %v8448_v59  ;;  %6315 = vmatmul.mubr.msk.bf16.vlgmr.msra.gmra.mxu1 %vm150_vm2, %v8448_v59 }
 0xcc6   :  { %7153 = vmatpush3.bf16.msra.mxu0 %v7750_v31  ;;  %7175 = vmatpush3.bf16.msra.mxu1 %v7751_v32 }
 0xcc7   :  { %7154 = vmatprep.subr.bf16.mxu0 %v7752_v34  ;;  %7176 = vmatprep.subr.bf16.mxu1 %v7753_v38 }
 0xcca   :  { %7155 = vmatpush3.bf16.msra.mxu0 %v7754_v39  ;;  %7177 = vmatpush3.bf16.msra.mxu1 %v7755_v40  ;;  %v6305_v40 = vld [vmem:[%s9778_s13 + $0x8] sm:$0xf] }
 0xccb   :  { %7156 = vmatprep.subr.bf16.mxu0 %v7756_v42  ;;  %7178 = vmatprep.subr.bf16.mxu1 %v7757_v43 }
 0xcce   :  { %7157 = vmatpush3.bf16.msra.mxu0 %v7758_v45  ;;  %7179 = vmatpush3.bf16.msra.mxu1 %v7759_v23  ;;  %v1978_v23 = vrot.slane %v6305_v40, %v8576_v44 }
 0xccf   :  { %7158 = vmatprep.subr.bf16.mxu0 %v7760_v49  ;;  %7180 = vmatprep.subr.bf16.mxu1 %v7761_v51  ;;  %v1986_v49 = vrot.slane %v6305_v40, %v8578_v33  ;;  %v1974_v51 = vrot.slane %v6305_v40, %v8583_v46 }
 0xcd2   :  { %7159 = vmatpush3.bf16.msra.mxu0 %v7762_v52  ;;  %7181 = vmatpush3.bf16.msra.mxu1 %v7763_v53  ;;  %v1982_v52 = vrot.slane %v6305_v40, %v8585_v48  ;;  %v7806_v40 = vld [vmem:[%s9775_s14 + $0x320] sm:$0xff]  }
 0xcd3   :  { %7160 = vmatprep.subr.bf16.mxu0 %v7764_v54  ;;  %7182 = vmatprep.subr.bf16.mxu1 %v7765_v57 }
 0xcd6   :  { %7161 = vmatpush3.bf16.msra.mxu0 %v7766_v58  ;;  %7183 = vmatpush3.bf16.msra.mxu1 %v7767_v47 }
 0xcd7   :  { %7162 = vmatprep.subr.bf16.mxu0 %v7768_v61  ;;  %7184 = vmatprep.subr.bf16.mxu1 %v7769_v50 }
 0xcda   :  { %7163 = vmatpush3.bf16.msra.mxu0 %v7770_v62  ;;  %7185 = vmatpush3.bf16.msra.mxu1 %v7771_v63 }
 0xcdb   :  { %7164 = vmatprep.subr.bf16.mxu0 %v7772_v1  ;;  %7186 = vmatprep.subr.bf16.mxu1 %v7773_v2 }
 0xcde   :  { %7165 = vmatpush3.bf16.msra.mxu0 %v7774_v3  ;;  %7187 = vmatpush3.bf16.msra.mxu1 %v7775_v4 }
 0xcdf   :  { %7166 = vmatprep.subr.bf16.mxu0 %v7776_v5  ;;  %7188 = vmatprep.subr.bf16.mxu1 %v7777_v6 }
 0xce2   :  { %7167 = vmatpush3.bf16.msra.mxu0 %v7778_v7  ;;  %7189 = vmatpush3.bf16.msra.mxu1 %v7779_v8 }
 0xce3   :  { %2554 = vmatprep.subr.bf16.mxu0 %v7782_v9  ;;  %2597 = vmatprep.subr.bf16.mxu1 %v7785_v10 }
 0xd5d   :  { %v7080_v11 = vpop.f32.mrf.mxu0  ;;  %v7102_v60 = vpop.f32.mrf.mxu1 }
 0xd5f   :  { %v7081_v14 = vpop.f32.mrf.mxu0  ;;  %v7103_v15 = vpop.f32.mrf.mxu1 }
 0xd60   :  { %v7082_v16 = vadd.f32 %v7081_v14, %v7080_v11  ;;  %v7104_v41 = vadd.f32 %v7103_v15, %v7102_v60 }
 0xd61   :  { %v7083_v29 = vpop.f32.mrf.mxu0  ;;  %v7105_v17 = vpop.f32.mrf.mxu1 }
 0xd62   :  { %v1679_v18 = vadd.f32 %v7104_v41, %v7082_v16 }
 0xd63   :  { %v7084_v35 = vpop.f32.mrf.mxu0  ;;  %v7106_v36 = vpop.f32.mrf.mxu1 }
 0xd64   :  { %v7085_v19 = vadd.f32 %v7084_v35, %v7083_v29  ;;  %v7107_v20 = vadd.f32 %v7106_v36, %v7105_v17  ;;  %v7780_v29 = vld [vmem:[%s9774_s12 + $0xe0] ss:$16 sps:$4 sm:$0xff]   ;;  %v7783_v17 = vld [vmem:[%s9774_s12 + $0xe8] ss:$16 sps:$4 sm:$0xff]   ;;  %v7788_v36 = vld [vmem:[%s9774_s12 + $0xc4] ss:$16 sps:$4 sm:$0xff]  }
 0xd66   :  { %v1682_v21 = vadd.f32 %v7107_v20, %v7085_v19  ;;  %v7791_v19 = vld [vmem:[%s9774_s12 + $0xcc] ss:$16 sps:$4 sm:$0xff]   ;;  %v7786_v20 = vld [vmem:[%s9774_s12 + $0xc0] ss:$16 sps:$4 sm:$0xff]  }
 0xd7d   :  { %v7124_v22 = vpop.f32.mrf.mxu0  ;;  %v7146_v24 = vpop.f32.mrf.mxu1 }
 0xd7f   :  { %v7125_v25 = vpop.f32.mrf.mxu0  ;;  %v7147_v26 = vpop.f32.mrf.mxu1 }
 0xd80   :  { %v7126_v12 = vadd.f32 %v7125_v25, %v7124_v22  ;;  %v7148_v27 = vadd.f32 %v7147_v26, %v7146_v24  ;;  %v7792_v22 = vld [vmem:[%s9775_s14 + $0x378] sm:$0xff]  }
 0xd81   :  { %v7127_v13 = vpop.f32.mrf.mxu0  ;;  %v7149_v28 = vpop.f32.mrf.mxu1  ;;  %v7793_v24 = vld [vmem:[%s9775_s14 + $0x3f8] sm:$0xff]  }
 0xd82   :  { %v1912_v30 = vadd.f32 %v7126_v12, %v1679_v18  ;;  %v7794_v25 = vld [vmem:[%s9775_s14 + $0x338] sm:$0xff]   ;;  %v7796_v12 = vld [vmem:[%s9775_s14 + $0x370] sm:$0xff]  }
 0xd83   :  { %v7128_v31 = vpop.f32.mrf.mxu0  ;;  %v7150_v32 = vpop.f32.mrf.mxu1  ;;  %v7795_v26 = vld [vmem:[%s9775_s14 + $0x3b8] sm:$0xff]  }
 0xd84   :  { %v8830_v34 = vadd.f32 %v7148_v27, %v1912_v30  ;;  %v7129_v38 = vadd.f32 %v7128_v31, %v7127_v13  ;;  %v7151_v39 = vadd.f32 %v7150_v32, %v7149_v28  ;;  %v7797_v27 = vld [vmem:[%s9775_s14 + $0x3f0] sm:$0xff]   ;;  %v7800_v30 = vld [vmem:[%s9775_s14 + $0x368] sm:$0xff]  }
 0xd85   :  { %v2065_v42 = vpop.f32.mrf.mxu0  ;;  %v2108_v43 = vpop.f32.mrf.mxu1  ;;  %v7798_v13 = vld [vmem:[%s9775_s14 + $0x330] sm:$0xff]   ;;  %v7802_v31 = vld [vmem:[%s9775_s14 + $0x328] sm:$0xff]  }
 0xd86   :  { %v1915_v45 = vadd.f32 %v7129_v38, %v1682_v21  ;;  %v2066_v1 = vadd.f32 %v2065_v42, %v1974_v51  ;;  %v2109_v2 = vadd.f32 %v2108_v43, %v1982_v52  ;;  %v7789_v21 = vld [vmem:[%s9774_s12 + $0xc8] ss:$16 sps:$4 sm:$0xff]   ;;  %v7799_v28 = vld [vmem:[%s9775_s14 + $0x3b0] sm:$0xff]   ;;  %v7804_v38 = vld [vmem:[%s9775_s14 + $0x360] sm:$0xff]  }
 0xd87   :  { %v2067_v53 = vpop.f32.mrf.mxu0  ;;  %v2110_v54 = vpop.f32.mrf.mxu1  ;;  %v7803_v32 = vld [vmem:[%s9775_s14 + $0x3a8] sm:$0xff]   ;;  %v7807_v42 = vld [vmem:[%s9775_s14 + $0x3a0] sm:$0xff]   ;;  %v7808_v43 = vld [vmem:[%s9775_s14 + $0x358] sm:$0xff]  }
 0xd88   :  { %v8839_v57 = vadd.f32 %v7151_v39, %v1915_v45  ;;  %v2068_v61 = vadd.f32 %v2067_v53, %v1978_v23  ;;  %v2111_v50 = vadd.f32 %v2110_v54, %v1986_v49  ;;  %v2117_v14 = vmax.f32 %v2066_v1, 0.0  ;;  %v7805_v39 = vld [vmem:[%s9775_s14 + $0x3e0] sm:$0xff]   ;;  %v7809_v45 = vld [vmem:[%s9775_s14 + $0x3d8] sm:$0xff]   ;;  %v7814_v53 = vld [vmem:[%s9775_s14 + $0x310] sm:$0xff]  }
 0xd89   :  { %v2069_v58 = vpop.f32.mrf.mxu0  ;;  %v2112_v47 = vpop.f32.mrf.mxu1  ;;  %v2119_v15 = vmax.f32 %v2109_v2, 0.0  ;;  %v7815_v54 = vld [vmem:[%s9775_s14 + $0x390] sm:$0xff]   ;;  %v7822_v1 = vld [vmem:[%s9775_s14 + $0x300] sm:$0xff]  }
 0xd8a   :  { %v2070_v62 = vadd.f32 %v2069_v58, %v1974_v51  ;;  %v2113_v63 = vadd.f32 %v2112_v47, %v1982_v52  ;;  %v2118_v9 = vmax.f32 %v2068_v61, 0.0  ;;  %v2120_v10 = vmax.f32 %v2111_v50, 0.0  ;;  %v7812_v51 = vld [vmem:[%s9775_s14 + $0x350] sm:$0xff]   ;;  %v7816_v58 = vld [vmem:[%s9775_s14 + $0x348] sm:$0xff]   ;;  %v7823_v2 = vld [vmem:[%s9775_s14 + $0x380] sm:$0xff]  }
 0xd8b   :  { %v2071_v3 = vpop.f32.mrf.mxu0  ;;  %v2114_v4 = vpop.f32.mrf.mxu1  ;;  %v7813_v52 = vld [vmem:[%s9775_s14 + $0x3d0] sm:$0xff]   ;;  %v7817_v47 = vld [vmem:[%s9775_s14 + $0x3c8] sm:$0xff]  }
 0xd8c   :  { %v2072_v5 = vadd.f32 %v2071_v3, %v1978_v23  ;;  %v2115_v6 = vadd.f32 %v2114_v4, %v1986_v49  ;;  %v2121_v7 = vmax.f32 %v2070_v62, 0.0  ;;  %v2123_v8 = vmax.f32 %v2113_v63, 0.0  ;;  %v7810_v23 = vld [vmem:[%s9775_s14 + $0x318] sm:$0xff]   ;;  %v7818_v61 = vld [vmem:[%s9775_s14 + $0x308] sm:$0xff]   ;;  %v7820_v62 = vld [vmem:[%s9775_s14 + $0x340] sm:$0xff]  }
 0xd8d   :  { %v7811_v49 = vld [vmem:[%s9775_s14 + $0x398] sm:$0xff]   ;;  %v7819_v50 = vld [vmem:[%s9775_s14 + $0x388] sm:$0xff]   ;;  %v7821_v63 = vld [vmem:[%s9775_s14 + $0x3c0] sm:$0xff]  }
 0xd8e   :  { %v2122_v11 = vmax.f32 %v2072_v5, 0.0  ;;  %v2124_v60 = vmax.f32 %v2115_v6, 0.0  ;;  %v2125_v18 = vpack.c.bf16 %v2121_v7, %v2117_v14  ;;  %v2127_v35 = vpack.c.bf16 %v2123_v8, %v2119_v15 }
 0xd90   :  { %v2126_v16 = vpack.c.bf16 %v2122_v11, %v2118_v9  ;;  %v2128_v41 = vpack.c.bf16 %v2124_v60, %v2120_v10 }
 0xd92   :  { %2418 = vmatprep.mubr.bf16.mxu0 %v2126_v16  ;;  %2459 = vmatprep.mubr.bf16.mxu1 %v2128_v41 }
 0xd93   :  { %2419 = vmatmul.mubr.bf16.vlgmr.msra.gmra.mxu0 %v2125_v18  ;;  %2460 = vmatmul.mubr.bf16.vlgmr.msra.gmra.mxu1 %v2127_v35 }
 0xd94   :  { %2555 = vmatpush1.bf16.msra.mxu0 %v7780_v29  ;;  %2598 = vmatpush1.bf16.msra.mxu1 %v7783_v17  ;;  %v6420_v29 = vld [vmem:[%s9778_s13 + $0xc] sm:$0xf] }
 0xd95   :  { %2556 = vmatprep.subr.bf16.mxu0 %v7788_v36  ;;  %2599 = vmatprep.subr.bf16.mxu1 %v7791_v19  ;;  %v2489_v36 = vrot.slane %v6420_v29, %v8576_v44  ;;  %v2497_v19 = vrot.slane %v6420_v29, %v8578_v33 }
 0xd96   :  { %2574 = vmatprep.mubr.bf16.mxu0 %v8105_v37  ;;  %2617 = vmatprep.mubr.bf16.mxu1 %v8105_v37 }
 0xd98   :  { %2557 = vmatpush1.bf16.msra.mxu0 %v7786_v20  ;;  %2600 = vmatpush1.bf16.msra.mxu1 %v7789_v21  ;;  %v2485_v20 = vrot.slane %v6420_v29, %v8583_v46  ;;  %v2493_v21 = vrot.slane %v6420_v29, %v8585_v48 }
 0xd99   :  { %7196 = vmatprep.subr.bf16.mxu0 %v7792_v22  ;;  %7218 = vmatprep.subr.bf16.mxu1 %v7793_v24 }
 0xd9b   :  { %6429 = vmatmul.mubr.msk.bf16.vlgmr.msra.gmra.mxu0 %vm150_vm2, %v8448_v59  ;;  %6430 = vmatmul.mubr.msk.bf16.vlgmr.msra.gmra.mxu1 %vm150_vm2, %v8448_v59  ;;  %v7801_v59 = vld [vmem:[%s9775_s14 + $0x3e8] sm:$0xff]  }
 0xd9c   :  { %7197 = vmatpush3.bf16.msra.mxu0 %v7794_v25  ;;  %7219 = vmatpush3.bf16.msra.mxu1 %v7795_v26 }
 0xd9d   :  { %7198 = vmatprep.subr.bf16.mxu0 %v7796_v12  ;;  %7220 = vmatprep.subr.bf16.mxu1 %v7797_v27 }
 0xda0   :  { %7199 = vmatpush3.bf16.msra.mxu0 %v7798_v13  ;;  %7221 = vmatpush3.bf16.msra.mxu1 %v7799_v28 }
 0xda1   :  { %7200 = vmatprep.subr.bf16.mxu0 %v7800_v30  ;;  %7222 = vmatprep.subr.bf16.mxu1 %v7801_v59 }
 0xda4   :  { %7201 = vmatpush3.bf16.msra.mxu0 %v7802_v31  ;;  %7223 = vmatpush3.bf16.msra.mxu1 %v7803_v32 }
 0xda5   :  { %7202 = vmatprep.subr.bf16.mxu0 %v7804_v38  ;;  %7224 = vmatprep.subr.bf16.mxu1 %v7805_v39 }
 0xda8   :  { %7203 = vmatpush3.bf16.msra.mxu0 %v7806_v40  ;;  %7225 = vmatpush3.bf16.msra.mxu1 %v7807_v42 }
 0xda9   :  { %7204 = vmatprep.subr.bf16.mxu0 %v7808_v43  ;;  %7226 = vmatprep.subr.bf16.mxu1 %v7809_v45 }
 0xdac   :  { %7205 = vmatpush3.bf16.msra.mxu0 %v7810_v23  ;;  %7227 = vmatpush3.bf16.msra.mxu1 %v7811_v49 }
 0xdad   :  { %7206 = vmatprep.subr.bf16.mxu0 %v7812_v51  ;;  %7228 = vmatprep.subr.bf16.mxu1 %v7813_v52 }
 0xdb0   :  { %7207 = vmatpush3.bf16.msra.mxu0 %v7814_v53  ;;  %7229 = vmatpush3.bf16.msra.mxu1 %v7815_v54 }
 0xdb1   :  { %7208 = vmatprep.subr.bf16.mxu0 %v7816_v58  ;;  %7230 = vmatprep.subr.bf16.mxu1 %v7817_v47 }
 0xdb4   :  { %7209 = vmatpush3.bf16.msra.mxu0 %v7818_v61  ;;  %7231 = vmatpush3.bf16.msra.mxu1 %v7819_v50 }
 0xdb5   :  { %7210 = vmatprep.subr.bf16.mxu0 %v7820_v62  ;;  %7232 = vmatprep.subr.bf16.mxu1 %v7821_v63 }
 0xdb8   :  { %7211 = vmatpush3.bf16.msra.mxu0 %v7822_v1  ;;  %7233 = vmatpush3.bf16.msra.mxu1 %v7823_v2 }
 0xdb9   :  { %7535 = vmatprep.subr.bf16.mxu0 %v8092_v0  ;;  %7543 = vmatprep.subr.bf16.mxu1 %v8092_v0 }
 0xe53   :  { %v7168_v3 = vpop.f32.mrf.mxu0  ;;  %v7190_v4 = vpop.f32.mrf.mxu1 }
 0xe55   :  { %v7169_v5 = vpop.f32.mrf.mxu0  ;;  %v7191_v6 = vpop.f32.mrf.mxu1 }
 0xe56   :  { %v7170_v7 = vadd.f32 %v7169_v5, %v7168_v3  ;;  %v7192_v8 = vadd.f32 %v7191_v6, %v7190_v4 }
 0xe57   :  { %v7171_v9 = vpop.f32.mrf.mxu0  ;;  %v7193_v10 = vpop.f32.mrf.mxu1 }
 0xe58   :  { %v2462_v11 = vadd.f32 %v7192_v8, %v7170_v7  ;;  %v6527_v7 = vld [vmem:[%s9779_s15] ss:$0 sm:$0xff] }
 0xe59   :  { %v7172_v60 = vpop.f32.mrf.mxu0  ;;  %v7194_v14 = vpop.f32.mrf.mxu1 }
 0xe5a   :  { %v2468_v15 = vadd.f32 %v2462_v11, %v8830_v34  ;;  %v7173_v16 = vadd.f32 %v7172_v60, %v7171_v9  ;;  %v7195_v41 = vadd.f32 %v7194_v14, %v7193_v10 }
 0xe5b   :  { %v2576_v17 = vpop.f32.mrf.mxu0  ;;  %v2619_v18 = vpop.f32.mrf.mxu1 }
 0xe5c   :  { %v2465_v35 = vadd.f32 %v7195_v41, %v7173_v16  ;;  %v2577_v30 = vadd.f32 %v2576_v17, %v2485_v20  ;;  %v2620_v59 = vadd.f32 %v2619_v18, %v2493_v21 }
 0xe5d   :  { %v2578_v22 = vpop.f32.mrf.mxu0  ;;  %v2621_v24 = vpop.f32.mrf.mxu1 }
 0xe5e   :  { %v2469_v34 = vadd.f32 %v2465_v35, %v8839_v57  ;;  %v2579_v12 = vadd.f32 %v2578_v22, %v2489_v36  ;;  %v2622_v27 = vadd.f32 %v2621_v24, %v2497_v19  ;;  %v2628_v51 = vmax.f32 %v2577_v30, 0.0 }
 0xe5f   :  { %v2580_v25 = vpop.f32.mrf.mxu0  ;;  %v2623_v26 = vpop.f32.mrf.mxu1  ;;  %v2630_v57 = vmax.f32 %v2620_v59, 0.0 }
 0xe60   :  { %v2581_v13 = vadd.f32 %v2580_v25, %v2485_v20  ;;  %v2624_v28 = vadd.f32 %v2623_v26, %v2493_v21  ;;  %v2629_v43 = vmax.f32 %v2579_v12, 0.0  ;;  %v2631_v45 = vmax.f32 %v2622_v27, 0.0  ;;  %v7825_v25 = vld [vmem:[%s9808_s5 + $0x10] sm:$0xff]  }
 0xe61   :  { %v2582_v31 = vpop.f32.mrf.mxu0  ;;  %v2625_v32 = vpop.f32.mrf.mxu1 }
 0xe62   :  { %v2583_v38 = vadd.f32 %v2582_v31, %v2489_v36  ;;  %v2626_v39 = vadd.f32 %v2625_v32, %v2497_v19  ;;  %v2632_v40 = vmax.f32 %v2581_v13, 0.0  ;;  %v2634_v42 = vmax.f32 %v2624_v28, 0.0  ;;  %v6528_v32 = vld [vmem:[%s9780_s10] ss:$0 sm:$0xff] }
 0xe64   :  { %v2633_v23 = vmax.f32 %v2583_v38, 0.0  ;;  %v2635_v49 = vmax.f32 %v2626_v39, 0.0  ;;  %v2636_v54 = vpack.c.bf16 %v2632_v40, %v2628_v51  ;;  %v2638_v58 = vpack.c.bf16 %v2634_v42, %v2630_v57  ;;  %v6529_v42 = vld [vmem:[%s9781_s11] ss:$0 sm:$0xff]  ;;  %v6535_v57 = vld [vmem:[%s9810_s25 + $0x1] ss:$0 sm:$0xff] }
 0xe66   :  { %v2637_v52 = vpack.c.bf16 %v2633_v23, %v2629_v43  ;;  %v2639_v53 = vpack.c.bf16 %v2635_v49, %v2631_v45 }
 0xe68   :  { %2929 = vmatprep.mubr.bf16.mxu0 %v2637_v52  ;;  %2970 = vmatprep.mubr.bf16.mxu1 %v2639_v53 }
 0xe69   :  { %2930 = vmatmul.mubr.bf16.vlgmr.msra.gmra.mxu0 %v2636_v54  ;;  %2971 = vmatmul.mubr.bf16.vlgmr.msra.gmra.mxu1 %v2638_v58 }
 0xe6a   :  { %7539 = vmatprep.mubr.msk.bf16.mxu0 %vm8093_vm0, %v8092_v0  ;;  %7545 = vmatprep.mubr.msk.bf16.mxu1 %vm8093_vm0, %v8092_v0 }
 0xf29   :  { %v7212_v47 = vpop.f32.mrf.mxu0  ;;  %v7234_v61 = vpop.f32.mrf.mxu1 }
 0xf2b   :  { %v7213_v50 = vpop.f32.mrf.mxu0  ;;  %v7235_v62 = vpop.f32.mrf.mxu1 }
 0xf2c   :  { %v7214_v63 = vadd.f32 %v7213_v50, %v7212_v47  ;;  %v7236_v1 = vadd.f32 %v7235_v62, %v7234_v61 }
 0xf2d   :  { %v7215_v2 = vpop.f32.mrf.mxu0  ;;  %v7237_v3 = vpop.f32.mrf.mxu1 }
 0xf2e   :  { %v2973_v4 = vadd.f32 %v7236_v1, %v7214_v63 }
 0xf2f   :  { %v7216_v5 = vpop.f32.mrf.mxu0  ;;  %v7238_v6 = vpop.f32.mrf.mxu1 }
 0xf30   :  { %v2979_v8 = vadd.f32 %v2973_v4, %v2468_v15  ;;  %v7217_v9 = vadd.f32 %v7216_v5, %v7215_v2  ;;  %v7239_v10 = vadd.f32 %v7238_v6, %v7237_v3  ;;  %v9033_v4 = vld [vmem:[%s9771_s2] sm:$0xff] }
 0xf32   :  { %v2976_v11 = vadd.f32 %v7239_v10, %v7217_v9  ;;  %v2988_v60 = vadd.f32 %v6527_v7, %v2979_v8  ;;  %v9040_v9 = vld [vmem:[%s9771_s2 + $0x8] sm:$0xff]  ;;  %s9813_s2 = smov 56  }
 0xf34   :  { %v2980_v14 = vadd.f32 %v2976_v11, %v2469_v34  ;;  %v2990_v16 = vadd.f32 %v2988_v60, %v8436_v55 }
 0xf36   :  { %v2994_v41 = vsel %vm150_vm2, %v2990_v16, 0.0  ;;  %v2989_v29 = vadd.f32 %v6527_v7, %v2980_v14 }
 0xf37   :  { %2995 = vadd.xlane.f32.xlu1 %v2994_v41 }
 0xf38   :  { %v2991_v17 = vadd.f32 %v2989_v29, %v8438_v56  ;;  %v7824_v56 = vld [vmem:[%s9808_s5 + $0x18] sm:$0xff]  }
 0xf39   :  { %7536 = vmatpush3.bf16.msra.mxu0 %v7824_v56 }
 0xf3a   :  { %v2997_v18 = vsel %vm150_vm2, %v2991_v17, 0.0  ;;  %7537 = vmatprep.subr.bf16.mxu0 %v8092_v0 }
 0xf3b   :  { %2998 = vadd.xlane.f32.xlu0 %v2997_v18 }
 0xf3d   :  { %7538 = vmatpush3.bf16.msra.mxu0 %v7825_v25 }
 0xf3e   :  { %7549 = vmatprep.subr.bf16.mxu0 %v8092_v0 }
 0xfc0   :  { %v2996_v35 = vpop.xlane.xlu1 %2995 }
 0xfc1   :  { %v3000_v36 = vmul.f32 0.03125, %v2996_v35 }
 0xfc3   :  { %v3002_v19 = vsub.f32 %v2990_v16, %v3000_v36 }
 0xfc4   :  { %v2999_v15 = vpop.xlane.xlu0 %2998 }
 0xfc5   :  { %v3001_v20 = vmul.f32 0.03125, %v2999_v15  ;;  %v3004_v21 = vmul.f32 %v3002_v19, %v3002_v19 }
 0xfc7   :  { %v3003_v22 = vsub.f32 %v2991_v17, %v3001_v20  ;;  %v3006_v24 = vsel %vm150_vm2, %v3004_v21, 0.0 }
 0xfc8   :  { %3007 = vadd.xlane.f32.xlu0 %v3006_v24 }
 0xfc9   :  { %v3005_v55 = vmul.f32 %v3003_v22, %v3003_v22 }
 0xfcb   :  { %v3009_v34 = vsel %vm150_vm2, %v3005_v55, 0.0 }
 0xfcc   :  { %3010 = vadd.xlane.f32.xlu0 %v3009_v34 }
0x1051   :  { %v3008_v26 = vpop.xlane.xlu0 %3007 }
0x1052   :  { %v3012_v12 = vmul.f32 0.03125, %v3008_v26 }
0x1054   :  { %v3014_v27 = vadd.f32 1e-05, %v3012_v12 }
0x1055   :  { %v3011_v13 = vpop.xlane.xlu0 %3010 }
0x1056   :  { %8042 = vrsqrt.f32 %v3014_v27  ;;  %v3013_v28 = vmul.f32 0.03125, %v3011_v13 }
0x1058   :  { %v3015_v30 = vadd.f32 1e-05, %v3013_v28 }
0x105a   :  { %8044 = vrsqrt.f32 %v3015_v30 }
0x1063   :  { %v8043_v59 = vpop.eup %8042 }
0x1064   :  { %v3018_v31 = vmul.f32 %v8043_v59, %v3002_v19 }
0x1066   :  { %v3026_v40 = vmul.f32 %v6528_v32, %v3018_v31 }
0x1067   :  { %v8045_v38 = vpop.eup %8044 }
0x1068   :  { %v3019_v39 = vmul.f32 %v8045_v38, %v3003_v22  ;;  %v8999_v45 = vadd.f32 %v6529_v42, %v3026_v40 }
0x106a   :  { %v3027_v43 = vmul.f32 %v6528_v32, %v3019_v39 }
0x106c   :  { %v9001_v23 = vadd.f32 %v6529_v42, %v3027_v43 }
0x106e   :  { %v3036_v49 = vpack.c.bf16 %v9001_v23, %v8999_v45 }
0x1070   :  { %7540 = vmatmul.mubr.msk.bf16.vlgmr.msra.gmra.mxu0 %vm150_vm2, %v3036_v49 }
0x1071   :  { %7551 = vmatprep.mubr.msk.bf16.mxu0 %vm8093_vm0, %v8092_v0 }
0x1130   :  { %v3099_v51 = vpop.f32.mrf.mxu0 }
0x1131   :  { %v3100_v54 = vadd.f32 %v6535_v57, %v3099_v51 }
0x1132   :  { %v7541_v52 = vpop.f32.mrf.mxu0 }
0x1134   :  { %v3102_v53 = vpop.f32.mrf.mxu0 }
0x1135   :  { %v3103_v58 = vadd.f32 %v6535_v57, %v3102_v53 }
0x1136   :  { %v7542_v47 = vpop.f32.mrf.mxu0 }
0x1137   :  { %v9011_v61 = vpack.c.bf16 %v3103_v58, %v3100_v54 }
0x1139   :  { %3230 = vrot.lane.b32.xlu1 %v9011_v61, %s8094_s1  ;;  %3108 = vrot.lane.b32.xlu0 %v9011_v61, %s9811_s0  ;;  %s9819_s0 = smov 104   ;;  %s9820_s1 = smov 40  }
0x113d   :  { %3232 = vrot.lane.b32.xlu0 %v9011_v61, %s9812_s22 }
0x11ab   :  { %v3109_v50 = vpop.permute.xlu0 %3108  ;;  %v3231_v2 = vpop.permute.xlu1 %3230 }
0x11ac   :  { %v3114_v62 = vsel %vm199_vm3, %v3109_v50, 0 }
0x11ad   :  { %7544 = vmatpush3.bf16.xpose.msra.mxu1 %v3114_v62 }
0x11ae   :  { %7555 = vmatprep.subr.bf16.mxu1 %v8092_v0 }
0x11af   :  { %v3233_v63 = vpop.permute.xlu0 %3232 }
0x11b0   :  { %v3238_v1 = vsel %vm199_vm3, %v3233_v63, 0 }
0x11b4   :  { %7546 = vmatmul.mubr.msk.bf16.vlgmr.msra.gmra.mxu1 %vm199_vm3, %v9011_v61 }
0x11b5   :  { %7556 = vmatpush3.bf16.xpose.msra.mxu1 %v3238_v1  ;;  %7557 = vmatprep.mubr.msk.bf16.mxu1 %vm8093_vm0, %v8092_v0 }
0x11b6   :  { %7567 = vmatprep.subr.bf16.mxu1 %v8092_v0 }
0x11bc   :  { %7558 = vmatmul.mubr.msk.bf16.vlgmr.msra.gmra.mxu1 %vm199_vm3, %v3231_v2  ;;  %v6541_v2 = vld [vmem:[%s9772_s6 + $0x10] sm:$0xf] }
0x11bd   :  { %7569 = vmatprep.mubr.msk.bf16.mxu1 %vm8093_vm0, %v8092_v0 }
0x1274   :  { %v3150_v3 = vpop.f32.mrf.mxu1 }
0x1275   :  { %v3151_v5 = vadd.f32 %v9033_v4, %v3150_v3  ;;  %v3405_v3 = vsel %vm446_vm4, %v6541_v2, 0 }
0x1276   :  { %v7547_v6 = vpop.f32.mrf.mxu1 }
0x1277   :  { %v3157_v7 = vsel %vm79_vm1, %v3151_v5, -inf }
0x1278   :  { %3158 = vmax.xlane.f32.xlu0 %v3157_v7  ;;  %v3153_v8 = vpop.f32.mrf.mxu1 }
0x1279   :  { %v3154_v10 = vadd.f32 %v9040_v9, %v3153_v8 }
0x127a   :  { %v7548_v11 = vpop.f32.mrf.mxu1 }
0x127b   :  { %v3160_v60 = vsel %vm79_vm1, %v3154_v10, -inf }
0x127c   :  { %3161 = vmax.xlane.f32.xlu1 %v3160_v60  ;;  %v3274_v14 = vpop.f32.mrf.mxu1 }
0x127d   :  { %v3275_v16 = vadd.f32 %v9033_v4, %v3274_v14 }
0x127e   :  { %v7559_v41 = vpop.f32.mrf.mxu1 }
0x127f   :  { %v3281_v29 = vsel %vm79_vm1, %v3275_v16, -inf }
0x1280   :  { %3282 = vmax.xlane.f32.xlu0 %v3281_v29  ;;  %v3277_v17 = vpop.f32.mrf.mxu1 }
0x1281   :  { %v3278_v18 = vadd.f32 %v9040_v9, %v3277_v17 }
0x1282   :  { %v7560_v35 = vpop.f32.mrf.mxu1 }
0x1283   :  { %v3284_v36 = vsel %vm79_vm1, %v3278_v18, -inf }
0x1284   :  { %3285 = vmax.xlane.f32.xlu0 %v3284_v36 }
0x1301   :  { %v3159_v19 = vpop.xlane.xlu0 %3158 }
0x1302   :  { %v3163_v15 = vsub.f32 %v3151_v5, %v3159_v19  ;;  %v6544_v5 = vld [vmem:[%s9772_s6 + $0x14] sm:$0xf] }
0x1303   :  { %v3358_v6 = vsel %vm446_vm4, %v6544_v5, 0 }
0x1304   :  { %v3165_v20 = vmul.f32 1.442695, %v3163_v15  ;;  %7568 = vmatpush3.bf16.msra.mxu1 %v3358_v6  ;;  %v6549_v6 = vld [vmem:[%s9772_s6 + $0x18] sm:$0xf] }
0x1305   :  { %v3162_v21 = vpop.xlane.xlu1 %3161  ;;  %7579 = vmatprep.subr.bf16.mxu1 %v8092_v0 }
0x1306   :  { %8046 = vpow2.f32 %v3165_v20  ;;  %v3164_v22 = vsub.f32 %v3154_v10, %v3162_v21 }
0x1308   :  { %v3167_v24 = vmul.f32 1.442695, %v3164_v22 }
0x1309   :  { %v3283_v55 = vpop.xlane.xlu0 %3282 }
0x130a   :  { %8048 = vpow2.f32 %v3167_v24  ;;  %v3287_v34 = vsub.f32 %v3275_v16, %v3283_v55 }
0x130c   :  { %v3289_v56 = vmul.f32 1.442695, %v3287_v34 }
0x130d   :  { %v3286_v25 = vpop.xlane.xlu0 %3285 }
0x130e   :  { %8050 = vpow2.f32 %v3289_v56  ;;  %v3288_v26 = vsub.f32 %v3278_v18, %v3286_v25 }
0x1310   :  { %v3291_v12 = vmul.f32 1.442695, %v3288_v26 }
0x1312   :  { %8052 = vpow2.f32 %v3291_v12 }
0x1313   :  { %v8047_v27 = vpop.eup %8046 }
0x1314   :  { %v3169_v13 = vsel %vm79_vm1, %v8047_v27, 0.0 }
0x1315   :  { %3170 = vadd.xlane.f32.xlu0 %v3169_v13 }
0x1317   :  { %v8049_v28 = vpop.eup %8048 }
0x1318   :  { %v3172_v30 = vsel %vm79_vm1, %v8049_v28, 0.0 }
0x1319   :  { %3173 = vadd.xlane.f32.xlu0 %v3172_v30 }
0x131b   :  { %v8051_v59 = vpop.eup %8050 }
0x131c   :  { %v3293_v31 = vsel %vm79_vm1, %v8051_v59, 0.0 }
0x131d   :  { %3294 = vadd.xlane.f32.xlu0 %v3293_v31 }
0x131f   :  { %v8053_v32 = vpop.eup %8052 }
0x1320   :  { %v3296_v38 = vsel %vm79_vm1, %v8053_v32, 0.0 }
0x1321   :  { %3297 = vadd.xlane.f32.xlu1 %v3296_v38 }
0x1332   :  { %3304 = vrot.lane.b32.xlu1 %v9011_v61, %s9813_s2 }
0x1333   :  { %3180 = vrot.lane.b32.xlu0 %v9011_v61, %s9814_s27 }
0x1336   :  { %3450 = vrot.lane.b32.xlu1 %v9011_v61, %s9815_s24 }
0x1337   :  { %3448 = vrot.lane.b32.xlu0 %v9011_v61, %s9816_s29 }
0x139e   :  { %v3171_v39 = vpop.xlane.xlu0 %3170 }
0x139f   :  { %8054 = vrcp.f32 %v3171_v39 }
0x13a2   :  { %v3174_v40 = vpop.xlane.xlu0 %3173 }
0x13a3   :  { %8056 = vrcp.f32 %v3174_v40 }
0x13a6   :  { %v3295_v42 = vpop.xlane.xlu0 %3294 }
0x13a7   :  { %8058 = vrcp.f32 %v3295_v42 }
0x13aa   :  { %v3298_v43 = vpop.xlane.xlu1 %3297  ;;  %v3181_v49 = vpop.permute.xlu0 %3180 }
0x13ab   :  { %8060 = vrcp.f32 %v3298_v43  ;;  %7550 = vmatpush3.bf16.msra.mxu0 %v3181_v49 }
0x13ac   :  { %7561 = vmatprep.subr.bf16.mxu0 %v8092_v0  ;;  %v8055_v51 = vpop.eup %8054 }
0x13ad   :  { %v3176_v52 = vmul.f32 %v8055_v51, %v8047_v27 }
0x13ae   :  { %v3305_v58 = vpop.permute.xlu1 %3304  ;;  %v3449_v36 = vpop.permute.xlu0 %3448 }
0x13b0   :  { %v8057_v57 = vpop.eup %8056 }
0x13b1   :  { %v3178_v53 = vmul.f32 %v8057_v57, %v8049_v28 }
0x13b2   :  { %v3451_v41 = vpop.permute.xlu1 %3450 }
0x13b3   :  { %v3179_v54 = vpack.c.bf16 %v3178_v53, %v3176_v52  ;;  %v3456_v35 = vsel %vm199_vm3, %v3451_v41, 0 }
0x13b4   :  { %v8059_v47 = vpop.eup %8058 }
0x13b5   :  { %7552 = vmatmul.mubr.msk.bf16.vlgmr.msra.gmra.mxu0 %vm79_vm1, %v3179_v54  ;;  %v3300_v62 = vmul.f32 %v8059_v47, %v8051_v59 }
0x13b6   :  { %7562 = vmatpush3.bf16.msra.mxu0 %v3305_v58  ;;  %7563 = vmatprep.mubr.msk.bf16.mxu0 %vm8093_vm0, %v8092_v0 }
0x13b7   :  { %7573 = vmatprep.subr.bf16.mxu0 %v8092_v0 }
0x13b8   :  { %v8061_v50 = vpop.eup %8060 }
0x13b9   :  { %v3302_v63 = vmul.f32 %v8061_v50, %v8053_v32 }
0x13bb   :  { %v3303_v1 = vpack.c.bf16 %v3302_v63, %v3300_v62 }
0x13bd   :  { %7564 = vmatmul.mubr.msk.bf16.vlgmr.msra.gmra.mxu0 %vm79_vm1, %v3303_v1 }
0x13be   :  { %7575 = vmatprep.mubr.msk.bf16.mxu0 %vm8093_vm0, %v8092_v0  ;;  %7574 = vmatpush3.bf16.msra.mxu0 %v3405_v3 }
0x13bf   :  { %7585 = vmatprep.subr.bf16.mxu0 %v8092_v0 }
0x1475   :  { %v3220_v7 = vpop.f32.mrf.mxu0 }
0x1477   :  { %v7553_v8 = vpop.f32.mrf.mxu0 }
0x1479   :  { %v3223_v10 = vpop.f32.mrf.mxu0 }
0x147a   :  { %v3227_v11 = vpack.c.bf16 %v3223_v10, %v3220_v7  ;;  %v3576_v7 = vsel %vm446_vm4, %v6549_v6, 0 }
0x147b   :  { %v7554_v60 = vpop.f32.mrf.mxu0 }
0x147c   :  { %7576 = vmatmul.mubr.msk.bf16.vlgmr.msra.gmra.mxu0 %vm199_vm3, %v3227_v11 }
0x147d   :  { %v3344_v14 = vpop.f32.mrf.mxu0  ;;  %7587 = vmatprep.mubr.msk.bf16.mxu0 %vm8093_vm0, %v8092_v0 }
0x147f   :  { %v7565_v16 = vpop.f32.mrf.mxu0 }
0x1481   :  { %v3347_v29 = vpop.f32.mrf.mxu0 }
0x1482   :  { %v3351_v17 = vpack.c.bf16 %v3347_v29, %v3344_v14 }
0x1483   :  { %v7566_v18 = vpop.f32.mrf.mxu0 }
0x1484   :  { %7570 = vmatmul.mubr.msk.bf16.vlgmr.msra.gmra.mxu1 %vm199_vm3, %v3351_v17 }
0x1485   :  { %7580 = vmatpush3.bf16.xpose.msra.mxu1 %v3456_v35  ;;  %7581 = vmatprep.mubr.msk.bf16.mxu1 %vm8093_vm0, %v8092_v0 }
0x1486   :  { %7591 = vmatprep.subr.bf16.mxu1 %v8092_v0 }
0x148c   :  { %7582 = vmatmul.mubr.msk.bf16.vlgmr.msra.gmra.mxu1 %vm199_vm3, %v3449_v36 }
0x148d   :  { %7593 = vmatprep.mubr.msk.bf16.mxu1 %vm8093_vm0, %v8092_v0  ;;  %7592 = vmatpush3.bf16.msra.mxu1 %v3576_v7 }
0x148e   :  { %7603 = vmatprep.subr.bf16.mxu1 %v8092_v0 }
0x153c   :  { %v3441_v19 = vpop.f32.mrf.mxu0 }
0x153e   :  { %v7577_v15 = vpop.f32.mrf.mxu0 }
0x1540   :  { %v3444_v20 = vpop.f32.mrf.mxu0 }
0x1542   :  { %v7578_v21 = vpop.f32.mrf.mxu0 }
0x1544   :  { %v3394_v22 = vpop.f32.mrf.mxu1 }
0x1545   :  { %v9089_v24 = vadd.f32 %v3441_v19, %v3394_v22 }
0x1546   :  { %v7571_v55 = vpop.f32.mrf.mxu1 }
0x1548   :  { %v3397_v34 = vpop.f32.mrf.mxu1 }
0x1549   :  { %v9091_v56 = vadd.f32 %v3444_v20, %v3397_v34 }
0x154a   :  { %v7572_v25 = vpop.f32.mrf.mxu1 }
0x154c   :  { %v3492_v26 = vpop.f32.mrf.mxu1 }
0x154d   :  { %v3493_v12 = vadd.f32 %v9033_v4, %v3492_v26 }
0x154e   :  { %v7583_v27 = vpop.f32.mrf.mxu1 }
0x154f   :  { %v3499_v13 = vsel %vm79_vm1, %v3493_v12, -inf }
0x1550   :  { %3500 = vmax.xlane.f32.xlu1 %v3499_v13  ;;  %v3495_v28 = vpop.f32.mrf.mxu1 }
0x1551   :  { %v3496_v30 = vadd.f32 %v9040_v9, %v3495_v28 }
0x1552   :  { %v7584_v59 = vpop.f32.mrf.mxu1 }
0x1553   :  { %v3502_v31 = vsel %vm79_vm1, %v3496_v30, -inf }
0x1554   :  { %3503 = vmax.xlane.f32.xlu0 %v3502_v31 }
0x15d9   :  { %v3501_v32 = vpop.xlane.xlu1 %3500 }
0x15da   :  { %v3505_v38 = vsub.f32 %v3493_v12, %v3501_v32 }
0x15dc   :  { %v3507_v39 = vmul.f32 1.442695, %v3505_v38 }
0x15dd   :  { %v3504_v40 = vpop.xlane.xlu0 %3503 }
0x15de   :  { %8062 = vpow2.f32 %v3507_v39  ;;  %v3506_v42 = vsub.f32 %v3496_v30, %v3504_v40 }
0x15e0   :  { %v3509_v43 = vmul.f32 1.442695, %v3506_v42 }
0x15e2   :  { %8064 = vpow2.f32 %v3509_v43 }
0x15eb   :  { %v8063_v49 = vpop.eup %8062 }
0x15ec   :  { %v3511_v51 = vsel %vm79_vm1, %v8063_v49, 0.0 }
0x15ed   :  { %3512 = vadd.xlane.f32.xlu0 %v3511_v51 }
0x15ef   :  { %v8065_v57 = vpop.eup %8064 }
0x15f0   :  { %v3514_v52 = vsel %vm79_vm1, %v8065_v57, 0.0 }
0x15f1   :  { %3515 = vadd.xlane.f32.xlu1 %v3514_v52 }
0x1602   :  { %3623 = vrot.lane.b32.xlu1 %v9011_v61, %s9817_s3 }
0x1603   :  { %3522 = vrot.lane.b32.xlu0 %v9011_v61, %s9818_s21 }
0x1606   :  { %3621 = vrot.lane.b32.xlu1 %v9011_v61, %s9819_s0 }
0x1676   :  { %v3513_v53 = vpop.xlane.xlu0 %3512 }
0x1677   :  { %8066 = vrcp.f32 %v3513_v53 }
0x167a   :  { %v3516_v54 = vpop.xlane.xlu1 %3515  ;;  %v3523_v58 = vpop.permute.xlu0 %3522 }
0x167b   :  { %8068 = vrcp.f32 %v3516_v54  ;;  %7586 = vmatpush3.bf16.msra.mxu0 %v3523_v58  ;;  %v6556_v58 = vld [vmem:[%s9773_s7 + $0x1] ss:$0 sm:$0xff] }
0x167c   :  { %7597 = vmatprep.subr.bf16.mxu0 %v8092_v0 }
0x167e   :  { %v3624_v1 = vpop.permute.xlu1 %3623 }
0x167f   :  { %v3629_v3 = vsel %vm199_vm3, %v3624_v1, 0 }
0x1682   :  { %v3622_v5 = vpop.permute.xlu1 %3621 }
0x1684   :  { %v8067_v47 = vpop.eup %8066 }
0x1685   :  { %v3518_v62 = vmul.f32 %v8067_v47, %v8063_v49 }
0x1688   :  { %v8069_v50 = vpop.eup %8068 }
0x1689   :  { %v3520_v63 = vmul.f32 %v8069_v50, %v8065_v57 }
0x168b   :  { %v3521_v2 = vpack.c.bf16 %v3520_v63, %v3518_v62 }
0x168d   :  { %7588 = vmatmul.mubr.msk.bf16.vlgmr.msra.gmra.mxu0 %vm79_vm1, %v3521_v2 }
0x168e   :  { %7598 = vmatpush3.bf16.xpose.msra.mxu0 %v3629_v3  ;;  %7599 = vmatprep.mubr.msk.bf16.mxu0 %vm8093_vm0, %v8092_v0 }
0x168f   :  { %7609 = vmatprep.subr.bf16.mxu0 %v8092_v0 }
0x1695   :  { %7600 = vmatmul.mubr.msk.bf16.vlgmr.msra.gmra.mxu0 %vm199_vm3, %v3622_v5 }
0x1696   :  { %7611 = vmatprep.mubr.msk.bf16.mxu0 %vm8093_vm0, %v8092_v0 }
0x174d   :  { %v3562_v8 = vpop.f32.mrf.mxu0 }
0x174f   :  { %v7589_v10 = vpop.f32.mrf.mxu0 }
0x1751   :  { %v3565_v11 = vpop.f32.mrf.mxu0 }
0x1752   :  { %v3569_v60 = vpack.c.bf16 %v3565_v11, %v3562_v8 }
0x1753   :  { %v7590_v14 = vpop.f32.mrf.mxu0 }
0x1754   :  { %7594 = vmatmul.mubr.msk.bf16.vlgmr.msra.gmra.mxu1 %vm199_vm3, %v3569_v60 }
0x1755   :  { %v3665_v16 = vpop.f32.mrf.mxu0  ;;  %7605 = vmatprep.mubr.msk.bf16.mxu1 %vm8093_vm0, %v8092_v0 }
0x1756   :  { %v3666_v41 = vadd.f32 %v9033_v4, %v3665_v16 }
0x1757   :  { %v7601_v29 = vpop.f32.mrf.mxu0 }
0x1758   :  { %v3672_v17 = vsel %vm79_vm1, %v3666_v41, -inf }
0x1759   :  { %3673 = vmax.xlane.f32.xlu0 %v3672_v17  ;;  %v3668_v18 = vpop.f32.mrf.mxu0 }
0x175a   :  { %v3669_v35 = vadd.f32 %v9040_v9, %v3668_v18 }
0x175b   :  { %v7602_v36 = vpop.f32.mrf.mxu0 }
0x175c   :  { %v3675_v19 = vsel %vm79_vm1, %v3669_v35, -inf  ;;  %v7826_v36 = vld [vmem:[%s9774_s12 + $0x120] ss:$16 sps:$4 sm:$0xff]  }
0x175d   :  { %3676 = vmax.xlane.f32.xlu1 %v3675_v19  ;;  %v7829_v19 = vld [vmem:[%s9774_s12 + $0x128] ss:$16 sps:$4 sm:$0xff]  }
0x176e   :  { %3695 = vrot.lane.b32.xlu1 %v9011_v61, %s9820_s1 }
0x17e2   :  { %v3674_v15 = vpop.xlane.xlu0 %3673 }
0x17e3   :  { %v3678_v20 = vsub.f32 %v3666_v41, %v3674_v15  ;;  %v7834_v15 = vld [vmem:[%s9774_s12 + $0x104] ss:$16 sps:$4 sm:$0xff]  }
0x17e5   :  { %v3680_v21 = vmul.f32 1.442695, %v3678_v20  ;;  %v7837_v20 = vld [vmem:[%s9774_s12 + $0x10c] ss:$16 sps:$4 sm:$0xff]  }
0x17e6   :  { %v3677_v22 = vpop.xlane.xlu1 %3676 }
0x17e7   :  { %8070 = vpow2.f32 %v3680_v21  ;;  %v3679_v4 = vsub.f32 %v3669_v35, %v3677_v22  ;;  %v7831_v35 = vld [vmem:[%s9774_s12 + $0x12c] ss:$16 sps:$4 sm:$0xff]   ;;  %v7832_v21 = vld [vmem:[%s9774_s12 + $0x100] ss:$16 sps:$4 sm:$0xff]   ;;  %v7835_v22 = vld [vmem:[%s9774_s12 + $0x108] ss:$16 sps:$4 sm:$0xff]  }
0x17e9   :  { %v3682_v55 = vmul.f32 1.442695, %v3679_v4  ;;  %v7840_v4 = vld [vmem:[%s9774_s12 + $0x164] ss:$16 sps:$4 sm:$0xff]  }
0x17ea   :  { %v3696_v34 = vpop.permute.xlu1 %3695 }
0x17eb   :  { %8072 = vpow2.f32 %v3682_v55  ;;  %7604 = vmatpush3.bf16.msra.mxu1 %v3696_v34  ;;  %v7843_v55 = vld [vmem:[%s9774_s12 + $0x16c] ss:$16 sps:$4 sm:$0xff]  }
0x17f4   :  { %v8071_v25 = vpop.eup %8070 }
0x17f5   :  { %v3684_v9 = vsel %vm79_vm1, %v8071_v25, 0.0 }
0x17f6   :  { %3685 = vadd.xlane.f32.xlu0 %v3684_v9 }
0x17f8   :  { %v8073_v26 = vpop.eup %8072 }
0x17f9   :  { %v3687_v12 = vsel %vm79_vm1, %v8073_v26, 0.0 }
0x17fa   :  { %3688 = vadd.xlane.f32.xlu0 %v3687_v12 }
0x1814   :  { %v3612_v27 = vpop.f32.mrf.mxu1 }
0x1815   :  { %v3619_v61 = vadd.f32 %v3612_v27, %v9089_v24  ;;  %v6553_v24 = vld [vmem:[%s9772_s6 + $0x1c] sm:$0xf] }
0x1816   :  { %v7595_v13 = vpop.f32.mrf.mxu1 }
0x1818   :  { %v3615_v28 = vpop.f32.mrf.mxu1 }
0x1819   :  { %v3620_v30 = vadd.f32 %v3615_v28, %v9091_v56  ;;  %v3749_v56 = vsel %vm446_vm4, %v6553_v24, 0  ;;  %v6559_v28 = vld [vmem:[%s9776_s8 + $0x1] ss:$0 sm:$0xff] }
0x181a   :  { %v7596_v59 = vpop.f32.mrf.mxu1  ;;  %7610 = vmatpush3.bf16.msra.mxu0 %v3749_v56  ;;  %v7846_v56 = vld [vmem:[%s9774_s12 + $0x144] ss:$16 sps:$4 sm:$0xff]  }
0x181b   :  { %3983 = vmatprep.subr.bf16.mxu0 %v7831_v35  ;;  %v7876_v35 = vld [vmem:[%s9775_s14 + $0x508] sm:$0xff]  }
0x187f   :  { %v3686_v31 = vpop.xlane.xlu0 %3685 }
0x1880   :  { %8074 = vrcp.f32 %v3686_v31 }
0x1883   :  { %v3689_v32 = vpop.xlane.xlu0 %3688 }
0x1884   :  { %8076 = vrcp.f32 %v3689_v32  ;;  %v6560_v32 = vld [vmem:[%s9777_s9 + $0x1] ss:$0 sm:$0xff] }
0x188d   :  { %v8075_v38 = vpop.eup %8074 }
0x188e   :  { %v3691_v40 = vmul.f32 %v8075_v38, %v8071_v25 }
0x1891   :  { %v8077_v39 = vpop.eup %8076 }
0x1892   :  { %v3693_v42 = vmul.f32 %v8077_v39, %v8073_v26 }
0x1894   :  { %v3694_v43 = vpack.c.bf16 %v3693_v42, %v3691_v40  ;;  %v7838_v42 = vld [vmem:[%s9774_s12 + $0x160] ss:$16 sps:$4 sm:$0xff]  }
0x1896   :  { %7606 = vmatmul.mubr.msk.bf16.vlgmr.msra.gmra.mxu1 %vm79_vm1, %v3694_v43  ;;  %v7841_v43 = vld [vmem:[%s9774_s12 + $0x168] ss:$16 sps:$4 sm:$0xff]  }
0x1897   :  { %3960 = vmatprep.mubr.bf16.mxu1 %v8105_v37 }
0x1956   :  { %v3735_v49 = vpop.f32.mrf.mxu1 }
0x1958   :  { %v7607_v51 = vpop.f32.mrf.mxu1 }
0x1959   :  { %v7844_v51 = vld [vmem:[%s9774_s12 + $0x140] ss:$16 sps:$4 sm:$0xff]  }
0x195a   :  { %v3738_v57 = vpop.f32.mrf.mxu1 }
0x195b   :  { %v3742_v52 = vpack.c.bf16 %v3738_v57, %v3735_v49  ;;  %v7849_v49 = vld [vmem:[%s9774_s12 + $0x14c] ss:$16 sps:$4 sm:$0xff]   ;;  %v7847_v57 = vld [vmem:[%s9774_s12 + $0x148] ss:$16 sps:$4 sm:$0xff]  }
0x195c   :  { %v7608_v53 = vpop.f32.mrf.mxu1 }
0x195d   :  { %7612 = vmatmul.mubr.msk.bf16.vlgmr.msra.gmra.mxu0 %vm199_vm3, %v3742_v52  ;;  %v7850_v52 = vld [vmem:[%s9775_s14 + $0x578] sm:$0xff]  }
0x195e   :  { %4003 = vmatprep.mubr.bf16.mxu0 %v8105_v37  ;;  %3984 = vmatpush1.bf16.msra.mxu0 %v7829_v19  ;;  %v7851_v53 = vld [vmem:[%s9775_s14 + $0x5f8] sm:$0xff]   ;;  %v7878_v19 = vld [vmem:[%s9775_s14 + $0x540] sm:$0xff]  }
0x195f   :  { %3985 = vmatprep.subr.bf16.mxu0 %v7837_v20  ;;  %v7880_v20 = vld [vmem:[%s9775_s14 + $0x500] sm:$0xff]  }
0x1962   :  { %3986 = vmatpush1.bf16.msra.mxu0 %v7835_v22  ;;  %v7882_v22 = vld [vmem:[%s9775_s14 + $0x478] sm:$0xff]  }
0x1963   :  { %4218 = vmatprep.subr.bf16.mxu0 %v7843_v55 }
0x1a1d   :  { %v3785_v54 = vpop.f32.mrf.mxu0 }
0x1a1e   :  { %v3792_v47 = vadd.f32 %v3785_v54, %v3619_v61  ;;  %v7852_v54 = vld [vmem:[%s9775_s14 + $0x538] sm:$0xff]  }
0x1a1f   :  { %v7613_v50 = vpop.f32.mrf.mxu0 }
0x1a20   :  { %v3802_v62 = vadd.f32 %v6556_v58, %v3792_v47  ;;  %v7854_v47 = vld [vmem:[%s9775_s14 + $0x570] sm:$0xff]  }
0x1a21   :  { %v3788_v63 = vpop.f32.mrf.mxu0  ;;  %v7855_v50 = vld [vmem:[%s9775_s14 + $0x5f0] sm:$0xff]  }
0x1a22   :  { %v3793_v1 = vadd.f32 %v3788_v63, %v3620_v30  ;;  %v3804_v2 = vadd.f32 %v3802_v62, %v8999_v45  ;;  %v7856_v62 = vld [vmem:[%s9775_s14 + $0x530] sm:$0xff]  }
0x1a23   :  { %v7614_v3 = vpop.f32.mrf.mxu0  ;;  %v7857_v63 = vld [vmem:[%s9775_s14 + $0x5b0] sm:$0xff]  }
0x1a24   :  { %v3803_v5 = vadd.f32 %v6556_v58, %v3793_v1  ;;  %v3810_v6 = vsel %vm150_vm2, %v3804_v2, 0.0  ;;  %v7853_v58 = vld [vmem:[%s9775_s14 + $0x5b8] sm:$0xff]   ;;  %v7858_v1 = vld [vmem:[%s9775_s14 + $0x568] sm:$0xff]  }
0x1a25   :  { %3811 = vadd.xlane.f32.xlu0 %v3810_v6  ;;  %v7860_v3 = vld [vmem:[%s9775_s14 + $0x528] sm:$0xff]   ;;  %v7862_v6 = vld [vmem:[%s9775_s14 + $0x560] sm:$0xff]  }
0x1a26   :  { %v3805_v7 = vadd.f32 %v3803_v5, %v9001_v23  ;;  %v7828_v23 = vld [vmem:[%s9774_s12 + $0x124] ss:$16 sps:$4 sm:$0xff]   ;;  %v7861_v5 = vld [vmem:[%s9775_s14 + $0x5a8] sm:$0xff]  }
0x1a27   :  { %3940 = vmatprep.subr.bf16.mxu1 %v7828_v23  ;;  %v7875_v23 = vld [vmem:[%s9775_s14 + $0x5c8] sm:$0xff]  }
0x1a28   :  { %v3813_v8 = vsel %vm150_vm2, %v3805_v7, 0.0  ;;  %3941 = vmatpush1.bf16.msra.mxu1 %v7826_v36  ;;  %v7877_v36 = vld [vmem:[%s9775_s14 + $0x588] sm:$0xff]  }
0x1a29   :  { %3814 = vadd.xlane.f32.xlu0 %v3813_v8  ;;  %3942 = vmatprep.subr.bf16.mxu1 %v7834_v15  ;;  %v7864_v8 = vld [vmem:[%s9775_s14 + $0x520] sm:$0xff]  }
0x1a2a   :  { %v7879_v15 = vld [vmem:[%s9775_s14 + $0x5c0] sm:$0xff]  }
0x1a2c   :  { %3943 = vmatpush1.bf16.msra.mxu1 %v7832_v21  ;;  %v7881_v21 = vld [vmem:[%s9775_s14 + $0x580] sm:$0xff]  }
0x1a2d   :  { %4175 = vmatprep.subr.bf16.mxu1 %v7840_v4  ;;  %v7883_v4 = vld [vmem:[%s9775_s14 + $0x4f8] sm:$0xff]  }
0x1aae   :  { %v3812_v10 = vpop.xlane.xlu0 %3811 }
0x1aaf   :  { %v3816_v11 = vmul.f32 0.03125, %v3812_v10  ;;  %v7865_v10 = vld [vmem:[%s9775_s14 + $0x5a0] sm:$0xff]  }
0x1ab1   :  { %v3818_v60 = vsub.f32 %v3804_v2, %v3816_v11  ;;  %v7859_v2 = vld [vmem:[%s9775_s14 + $0x5e8] sm:$0xff]   ;;  %v7866_v11 = vld [vmem:[%s9775_s14 + $0x558] sm:$0xff]  }
0x1ab2   :  { %v3815_v14 = vpop.xlane.xlu0 %3814 }
0x1ab3   :  { %v3817_v16 = vmul.f32 0.03125, %v3815_v14  ;;  %v3820_v41 = vmul.f32 %v3818_v60, %v3818_v60  ;;  %v7868_v14 = vld [vmem:[%s9775_s14 + $0x518] sm:$0xff]  }
0x1ab5   :  { %v3819_v29 = vsub.f32 %v3805_v7, %v3817_v16  ;;  %v3822_v17 = vsel %vm150_vm2, %v3820_v41, 0.0  ;;  %v7863_v7 = vld [vmem:[%s9775_s14 + $0x5e0] sm:$0xff]   ;;  %v7869_v16 = vld [vmem:[%s9775_s14 + $0x598] sm:$0xff]   ;;  %v7870_v41 = vld [vmem:[%s9775_s14 + $0x550] sm:$0xff]  }
0x1ab6   :  { %3823 = vadd.xlane.f32.xlu0 %v3822_v17  ;;  %v7872_v17 = vld [vmem:[%s9775_s14 + $0x510] sm:$0xff]  }
0x1ab7   :  { %v3821_v45 = vmul.f32 %v3819_v29, %v3819_v29 }
0x1ab9   :  { %v3825_v18 = vsel %vm150_vm2, %v3821_v45, 0.0  ;;  %v7873_v45 = vld [vmem:[%s9775_s14 + $0x590] sm:$0xff]  }
0x1aba   :  { %3826 = vadd.xlane.f32.xlu0 %v3825_v18  ;;  %v7874_v18 = vld [vmem:[%s9775_s14 + $0x548] sm:$0xff]  }
0x1b3f   :  { %v3824_v34 = vpop.xlane.xlu0 %3823 }
0x1b40   :  { %v3828_v25 = vmul.f32 0.03125, %v3824_v34 }
0x1b42   :  { %v3830_v9 = vadd.f32 1e-05, %v3828_v25 }
0x1b43   :  { %v3827_v26 = vpop.xlane.xlu0 %3826 }
0x1b44   :  { %8078 = vrsqrt.f32 %v3830_v9  ;;  %v3829_v12 = vmul.f32 0.03125, %v3827_v26 }
0x1b46   :  { %v3831_v27 = vadd.f32 1e-05, %v3829_v12 }
0x1b48   :  { %8080 = vrsqrt.f32 %v3831_v27 }
0x1b51   :  { %v8079_v61 = vpop.eup %8078 }
0x1b52   :  { %v3834_v13 = vmul.f32 %v8079_v61, %v3818_v60  ;;  %v7867_v60 = vld [vmem:[%s9775_s14 + $0x5d8] sm:$0xff]  }
0x1b54   :  { %v3842_v59 = vmul.f32 %v6559_v28, %v3834_v13  ;;  %v6652_v13 = vld [vmem:[%s9778_s13 + $0x14] sm:$0xf] }
0x1b55   :  { %v8081_v30 = vpop.eup %8080 }
0x1b56   :  { %v3835_v31 = vmul.f32 %v8081_v30, %v3819_v29  ;;  %v9185_v39 = vadd.f32 %v6560_v32, %v3842_v59  ;;  %v7871_v29 = vld [vmem:[%s9775_s14 + $0x5d0] sm:$0xff]   ;;  %v4110_v59 = vrot.slane %v6652_v13, %v8576_v44 }
0x1b58   :  { %v3843_v38 = vmul.f32 %v6559_v28, %v3835_v31  ;;  %v4118_v31 = vrot.slane %v6652_v13, %v8578_v33 }
0x1b5a   :  { %v9187_v40 = vadd.f32 %v6560_v32, %v3843_v38  ;;  %v4106_v32 = vrot.slane %v6652_v13, %v8583_v46  ;;  %v4114_v38 = vrot.slane %v6652_v13, %v8585_v48  ;;  %v7889_v13 = vld [vmem:[%s9775_s14 + $0x4b0] sm:$0xff]  }
0x1b5c   :  { %v9197_v24 = vpack.c.bf16 %v9187_v40, %v9185_v39 }
0x1b5e   :  { %6578 = vmatmul.mubr.msk.bf16.vlgmr.msra.gmra.mxu1 %vm150_vm2, %v9197_v24  ;;  %6579 = vmatmul.mubr.msk.bf16.vlgmr.msra.gmra.mxu0 %vm150_vm2, %v9197_v24 }
0x1b5f   :  { %4176 = vmatpush1.bf16.msra.mxu1 %v7838_v42  ;;  %4219 = vmatpush1.bf16.msra.mxu0 %v7841_v43 }
0x1b60   :  { %4177 = vmatprep.subr.bf16.mxu1 %v7846_v56  ;;  %4220 = vmatprep.subr.bf16.mxu0 %v7849_v49  ;;  %v9341_v56 = vld [vmem:[%s9778_s13 + $0x10] sm:$0xf] }
0x1b61   :  { %4195 = vmatprep.mubr.bf16.mxu1 %v8105_v37  ;;  %4238 = vmatprep.mubr.bf16.mxu0 %v8105_v37  ;;  %v3872_v49 = vrot.slane %v9341_v56, %v8576_v44 }
0x1b63   :  { %4178 = vmatpush1.bf16.msra.mxu1 %v7844_v51  ;;  %4221 = vmatpush1.bf16.msra.mxu0 %v7847_v57  ;;  %v3880_v51 = vrot.slane %v9341_v56, %v8578_v33 }
0x1b64   :  { %7267 = vmatprep.subr.bf16.mxu1 %v7850_v52  ;;  %7289 = vmatprep.subr.bf16.mxu0 %v7851_v53 }
0x1b66   :  { %6661 = vmatmul.mubr.msk.bf16.vlgmr.msra.gmra.mxu1 %vm150_vm2, %v9197_v24  ;;  %6662 = vmatmul.mubr.msk.bf16.vlgmr.msra.gmra.mxu0 %vm150_vm2, %v9197_v24 }
0x1b67   :  { %7268 = vmatpush3.bf16.msra.mxu1 %v7852_v54  ;;  %7290 = vmatpush3.bf16.msra.mxu0 %v7853_v58 }
0x1b68   :  { %7269 = vmatprep.subr.bf16.mxu1 %v7854_v47  ;;  %7291 = vmatprep.subr.bf16.mxu0 %v7855_v50 }
0x1b6b   :  { %7270 = vmatpush3.bf16.msra.mxu1 %v7856_v62  ;;  %7292 = vmatpush3.bf16.msra.mxu0 %v7857_v63 }
0x1b6c   :  { %7271 = vmatprep.subr.bf16.mxu1 %v7858_v1  ;;  %7293 = vmatprep.subr.bf16.mxu0 %v7859_v2 }
0x1b6f   :  { %7272 = vmatpush3.bf16.msra.mxu1 %v7860_v3  ;;  %7294 = vmatpush3.bf16.msra.mxu0 %v7861_v5 }
0x1b70   :  { %7273 = vmatprep.subr.bf16.mxu1 %v7862_v6  ;;  %7295 = vmatprep.subr.bf16.mxu0 %v7863_v7 }
0x1b73   :  { %7274 = vmatpush3.bf16.msra.mxu1 %v7864_v8  ;;  %7296 = vmatpush3.bf16.msra.mxu0 %v7865_v10 }
0x1b74   :  { %7275 = vmatprep.subr.bf16.mxu1 %v7866_v11  ;;  %7297 = vmatprep.subr.bf16.mxu0 %v7867_v60 }
0x1b77   :  { %7276 = vmatpush3.bf16.msra.mxu1 %v7868_v14  ;;  %7298 = vmatpush3.bf16.msra.mxu0 %v7869_v16 }
0x1b78   :  { %7277 = vmatprep.subr.bf16.mxu1 %v7870_v41  ;;  %7299 = vmatprep.subr.bf16.mxu0 %v7871_v29 }
0x1b7b   :  { %7278 = vmatpush3.bf16.msra.mxu1 %v7872_v17  ;;  %7300 = vmatpush3.bf16.msra.mxu0 %v7873_v45 }
0x1b7c   :  { %7279 = vmatprep.subr.bf16.mxu1 %v7874_v18  ;;  %7301 = vmatprep.subr.bf16.mxu0 %v7875_v23 }
0x1b7f   :  { %7280 = vmatpush3.bf16.msra.mxu1 %v7876_v35  ;;  %7302 = vmatpush3.bf16.msra.mxu0 %v7877_v36  ;;  %v7884_v36 = vld [vmem:[%s9775_s14 + $0x438] sm:$0xff]  }
0x1b80   :  { %7281 = vmatprep.subr.bf16.mxu1 %v7878_v19  ;;  %7303 = vmatprep.subr.bf16.mxu0 %v7879_v15  ;;  %v7885_v19 = vld [vmem:[%s9775_s14 + $0x4b8] sm:$0xff]  }
0x1b83   :  { %7282 = vmatpush3.bf16.msra.mxu1 %v7880_v20  ;;  %7304 = vmatpush3.bf16.msra.mxu0 %v7881_v21 }
0x1b84   :  { %7311 = vmatprep.subr.bf16.mxu1 %v7882_v22  ;;  %7333 = vmatprep.subr.bf16.mxu0 %v7883_v4  ;;  %v7886_v4 = vld [vmem:[%s9775_s14 + $0x470] sm:$0xff]  }
0x1c1e   :  { %v9323_v55 = vpop.f32.mrf.mxu1  ;;  %v9325_v34 = vpop.f32.mrf.mxu0 }
0x1c20   :  { %v3964_v25 = vpop.f32.mrf.mxu1  ;;  %v4007_v9 = vpop.f32.mrf.mxu0 }
0x1c21   :  { %v3965_v7 = vadd.f32 %v3964_v25, %v3872_v49  ;;  %v4008_v8 = vadd.f32 %v4007_v9, %v3880_v51  ;;  %v7887_v25 = vld [vmem:[%s9775_s14 + $0x4f0] sm:$0xff]  }
0x1c22   :  { %v9327_v26 = vpop.f32.mrf.mxu1  ;;  %v9329_v12 = vpop.f32.mrf.mxu0 }
0x1c23   :  { %v4015_v15 = vmax.f32 %v3965_v7, 0.0  ;;  %v4017_v20 = vmax.f32 %v4008_v8, 0.0  ;;  %v7911_v7 = vld [vmem:[%s9775_s14 + $0x4c0] sm:$0xff]  }
0x1c24   :  { %v3968_v27 = vpop.f32.mrf.mxu1  ;;  %v4011_v61 = vpop.f32.mrf.mxu0 }
0x1c25   :  { %v3969_v50 = vadd.f32 %v3968_v27, %v3872_v49  ;;  %v4012_v62 = vadd.f32 %v4011_v61, %v3880_v51  ;;  %v7888_v61 = vld [vmem:[%s9775_s14 + $0x430] sm:$0xff]   ;;  %v7898_v49 = vld [vmem:[%s9775_s14 + $0x458] sm:$0xff]  }
0x1c26   :  { %v4197_v28 = vpop.f32.mrf.mxu1  ;;  %v4240_v30 = vpop.f32.mrf.mxu0  ;;  %v7899_v51 = vld [vmem:[%s9775_s14 + $0x4d8] sm:$0xff]  }
0x1c27   :  { %v4198_v63 = vadd.f32 %v4197_v28, %v4106_v32  ;;  %v4241_v1 = vadd.f32 %v4240_v30, %v4114_v38  ;;  %v4019_v29 = vmax.f32 %v3969_v50, 0.0  ;;  %v4021_v17 = vmax.f32 %v4012_v62, 0.0  ;;  %v7890_v28 = vld [vmem:[%s9775_s14 + $0x468] sm:$0xff]  }
0x1c28   :  { %v4199_v42 = vpop.f32.mrf.mxu1  ;;  %v4242_v43 = vpop.f32.mrf.mxu0  ;;  %v7891_v30 = vld [vmem:[%s9775_s14 + $0x4e8] sm:$0xff]  }
0x1c29   :  { %v4200_v53 = vadd.f32 %v4199_v42, %v4110_v59  ;;  %v4243_v54 = vadd.f32 %v4242_v43, %v4118_v31  ;;  %v4249_v45 = vmax.f32 %v4198_v63, 0.0  ;;  %v4251_v18 = vmax.f32 %v4241_v1, 0.0  ;;  %v7896_v42 = vld [vmem:[%s9775_s14 + $0x420] sm:$0xff]   ;;  %v7906_v50 = vld [vmem:[%s9775_s14 + $0x448] sm:$0xff]  }
0x1c2a   :  { %v4201_v57 = vpop.f32.mrf.mxu1  ;;  %v4244_v52 = vpop.f32.mrf.mxu0  ;;  %v4023_v9 = vpack.c.bf16 %v4019_v29, %v4015_v15  ;;  %v4025_v27 = vpack.c.bf16 %v4021_v17, %v4017_v20  ;;  %v7897_v43 = vld [vmem:[%s9775_s14 + $0x4a0] sm:$0xff]   ;;  %v7907_v62 = vld [vmem:[%s9775_s14 + $0x4c8] sm:$0xff]   ;;  %v3868_v63 = vrot.slane %v9341_v56, %v8583_v46  ;;  %v3876_v1 = vrot.slane %v9341_v56, %v8585_v48  ;;  %v7927_v15 = vld [vmem:[%s9775_s14 + $0x6f8] sm:$0xff]  }
0x1c2b   :  { %v4202_v58 = vadd.f32 %v4201_v57, %v4106_v32  ;;  %v4245_v47 = vadd.f32 %v4244_v52, %v4114_v38  ;;  %v4250_v60 = vmax.f32 %v4200_v53, 0.0  ;;  %v4252_v14 = vmax.f32 %v4243_v54, 0.0  ;;  %v7894_v32 = vld [vmem:[%s9775_s14 + $0x460] sm:$0xff]   ;;  %v7900_v57 = vld [vmem:[%s9775_s14 + $0x418] sm:$0xff]   ;;  %v7902_v53 = vld [vmem:[%s9775_s14 + $0x450] sm:$0xff]  }
0x1c2c   :  { %v4203_v2 = vpop.f32.mrf.mxu1  ;;  %v4246_v3 = vpop.f32.mrf.mxu0  ;;  %v7895_v38 = vld [vmem:[%s9775_s14 + $0x4e0] sm:$0xff]   ;;  %v7901_v52 = vld [vmem:[%s9775_s14 + $0x498] sm:$0xff]   ;;  %v7903_v54 = vld [vmem:[%s9775_s14 + $0x4d0] sm:$0xff]   ;;  %v3963_v8 = vadd.f32 %v9323_v55, %v3868_v63 }
0x1c2d   :  { %v4204_v5 = vadd.f32 %v4203_v2, %v4110_v59  ;;  %v4247_v6 = vadd.f32 %v4246_v3, %v4118_v31  ;;  %v4253_v10 = vmax.f32 %v4202_v58, 0.0  ;;  %v4255_v11 = vmax.f32 %v4245_v47, 0.0  ;;  %v7892_v59 = vld [vmem:[%s9775_s14 + $0x428] sm:$0xff]   ;;  %v7904_v58 = vld [vmem:[%s9775_s14 + $0x410] sm:$0xff]   ;;  %v7910_v56 = vld [vmem:[%s9775_s14 + $0x440] sm:$0xff]  }
0x1c2e   :  { %v7893_v31 = vld [vmem:[%s9775_s14 + $0x4a8] sm:$0xff]   ;;  %v7905_v47 = vld [vmem:[%s9775_s14 + $0x490] sm:$0xff]   ;;  %v7928_v20 = vld [vmem:[%s9775_s14 + $0x638] sm:$0xff]  }
0x1c2f   :  { %v4254_v16 = vmax.f32 %v4204_v5, 0.0  ;;  %v4256_v41 = vmax.f32 %v4247_v6, 0.0  ;;  %v4257_v21 = vpack.c.bf16 %v4253_v10, %v4249_v45  ;;  %v4259_v22 = vpack.c.bf16 %v4255_v11, %v4251_v18  ;;  %v7908_v2 = vld [vmem:[%s9775_s14 + $0x408] sm:$0xff]   ;;  %v7916_v55 = vld [vmem:[%s9774_s12 + $0x1a4] ss:$16 sps:$4 sm:$0xff]  }
0x1c30   :  { %v7909_v3 = vld [vmem:[%s9775_s14 + $0x488] sm:$0xff]   ;;  %v3967_v5 = vadd.f32 %v9327_v26, %v3868_v63  ;;  %v4010_v6 = vadd.f32 %v9329_v12, %v3876_v1  ;;  %v4006_v10 = vadd.f32 %v9325_v34, %v3876_v1  ;;  %v7912_v26 = vld [vmem:[%s9775_s14 + $0x400] sm:$0xff]  }
0x1c31   :  { %v4258_v23 = vpack.c.bf16 %v4254_v16, %v4250_v60  ;;  %v4260_v35 = vpack.c.bf16 %v4256_v41, %v4252_v14  ;;  %v7913_v12 = vld [vmem:[%s9775_s14 + $0x480] sm:$0xff]   ;;  %v7919_v34 = vld [vmem:[%s9774_s12 + $0x1ac] ss:$16 sps:$4 sm:$0xff]   ;;  %v4014_v14 = vmax.f32 %v3963_v8, 0.0  ;;  %v7917_v29 = vld [vmem:[%s9774_s12 + $0x1a8] ss:$16 sps:$4 sm:$0xff]  }
0x1c32   :  { %v4018_v11 = vmax.f32 %v3967_v5, 0.0  ;;  %v4020_v60 = vmax.f32 %v4010_v6, 0.0  ;;  %v4016_v16 = vmax.f32 %v4006_v10, 0.0  ;;  %v7914_v41 = vld [vmem:[%s9774_s12 + $0x1a0] ss:$16 sps:$4 sm:$0xff]  }
0x1c33   :  { %4550 = vmatprep.mubr.bf16.mxu1 %v4258_v23  ;;  %4591 = vmatprep.mubr.bf16.mxu0 %v4260_v35  ;;  %v7922_v18 = vld [vmem:[%s9774_s12 + $0x184] ss:$16 sps:$4 sm:$0xff]   ;;  %v7925_v23 = vld [vmem:[%s9774_s12 + $0x18c] ss:$16 sps:$4 sm:$0xff]   ;;  %v7920_v35 = vld [vmem:[%s9774_s12 + $0x180] ss:$16 sps:$4 sm:$0xff]  }
0x1c34   :  { %4551 = vmatmul.mubr.bf16.vlgmr.msra.gmra.mxu1 %v4257_v21  ;;  %4592 = vmatmul.mubr.bf16.vlgmr.msra.gmra.mxu0 %v4259_v22  ;;  %v4022_v17 = vpack.c.bf16 %v4018_v11, %v4014_v14  ;;  %v4024_v45 = vpack.c.bf16 %v4020_v60, %v4016_v16  ;;  %v7929_v21 = vld [vmem:[%s9775_s14 + $0x6b8] sm:$0xff]   ;;  %v7930_v22 = vld [vmem:[%s9775_s14 + $0x670] sm:$0xff]   ;;  %v7955_v63 = vld [vmem:[%s9775_s14 + $0x6c0] sm:$0xff]  }
0x1c35   :  { %7312 = vmatpush3.bf16.msra.mxu1 %v7884_v36  ;;  %7334 = vmatpush3.bf16.msra.mxu0 %v7885_v19  ;;  %v7923_v36 = vld [vmem:[%s9774_s12 + $0x188] ss:$16 sps:$4 sm:$0xff]   ;;  %v7956_v1 = vld [vmem:[%s9775_s14 + $0x600] sm:$0xff]   ;;  %v7963_v5 = vld [vmem:[%s9774_s12 + $0x1ec] ss:$16 sps:$4 sm:$0xff]  }
0x1c36   :  { %4824 = vmatprep.mubr.bf16.mxu1 %v4023_v9  ;;  %4865 = vmatprep.mubr.bf16.mxu0 %v4025_v27  ;;  %v7926_v19 = vld [vmem:[%s9775_s14 + $0x678] sm:$0xff]   ;;  %v7933_v9 = vld [vmem:[%s9775_s14 + $0x6b0] sm:$0xff]   ;;  %v7934_v27 = vld [vmem:[%s9775_s14 + $0x668] sm:$0xff]  }
0x1c37   :  { %7313 = vmatprep.subr.bf16.mxu1 %v7886_v4  ;;  %7335 = vmatprep.subr.bf16.mxu0 %v7887_v25  ;;  %v7931_v4 = vld [vmem:[%s9775_s14 + $0x6f0] sm:$0xff]  }
0x1c38   :  { %v7932_v25 = vld [vmem:[%s9775_s14 + $0x630] sm:$0xff]  }
0x1c39   :  { %7314 = vmatpush3.bf16.msra.mxu1 %v7888_v61  ;;  %7336 = vmatpush3.bf16.msra.mxu0 %v7889_v13  ;;  %v7935_v61 = vld [vmem:[%s9775_s14 + $0x6e8] sm:$0xff]  }
0x1c3a   :  { %7315 = vmatprep.subr.bf16.mxu1 %v7890_v28  ;;  %7337 = vmatprep.subr.bf16.mxu0 %v7891_v30  ;;  %v7936_v13 = vld [vmem:[%s9775_s14 + $0x628] sm:$0xff]   ;;  %v7938_v30 = vld [vmem:[%s9775_s14 + $0x660] sm:$0xff]  }
0x1c3b   :  { %v7937_v28 = vld [vmem:[%s9775_s14 + $0x6a8] sm:$0xff]  }
0x1c3d   :  { %7316 = vmatpush3.bf16.msra.mxu1 %v7892_v59  ;;  %7338 = vmatpush3.bf16.msra.mxu0 %v7893_v31  ;;  %v7939_v59 = vld [vmem:[%s9775_s14 + $0x6e0] sm:$0xff]  }
0x1c3e   :  { %7317 = vmatprep.subr.bf16.mxu1 %v7894_v32  ;;  %7339 = vmatprep.subr.bf16.mxu0 %v7895_v38  ;;  %v7940_v31 = vld [vmem:[%s9775_s14 + $0x620] sm:$0xff]   ;;  %v7942_v38 = vld [vmem:[%s9775_s14 + $0x658] sm:$0xff]  }
0x1c3f   :  { %v7941_v32 = vld [vmem:[%s9775_s14 + $0x6a0] sm:$0xff]  }
0x1c41   :  { %7318 = vmatpush3.bf16.msra.mxu1 %v7896_v42  ;;  %7340 = vmatpush3.bf16.msra.mxu0 %v7897_v43  ;;  %v7943_v42 = vld [vmem:[%s9775_s14 + $0x6d8] sm:$0xff]  }
0x1c42   :  { %7319 = vmatprep.subr.bf16.mxu1 %v7898_v49  ;;  %7341 = vmatprep.subr.bf16.mxu0 %v7899_v51  ;;  %v7944_v43 = vld [vmem:[%s9775_s14 + $0x618] sm:$0xff]   ;;  %v7946_v51 = vld [vmem:[%s9775_s14 + $0x650] sm:$0xff]  }
0x1c43   :  { %v7945_v49 = vld [vmem:[%s9775_s14 + $0x698] sm:$0xff]  }
0x1c45   :  { %7320 = vmatpush3.bf16.msra.mxu1 %v7900_v57  ;;  %7342 = vmatpush3.bf16.msra.mxu0 %v7901_v52  ;;  %v7947_v57 = vld [vmem:[%s9775_s14 + $0x6d0] sm:$0xff]  }
0x1c46   :  { %7321 = vmatprep.subr.bf16.mxu1 %v7902_v53  ;;  %7343 = vmatprep.subr.bf16.mxu0 %v7903_v54  ;;  %v7948_v52 = vld [vmem:[%s9775_s14 + $0x610] sm:$0xff]   ;;  %v7950_v54 = vld [vmem:[%s9775_s14 + $0x648] sm:$0xff]  }
0x1c47   :  { %v7949_v53 = vld [vmem:[%s9775_s14 + $0x690] sm:$0xff]  }
0x1c49   :  { %7322 = vmatpush3.bf16.msra.mxu1 %v7904_v58  ;;  %7344 = vmatpush3.bf16.msra.mxu0 %v7905_v47  ;;  %v7951_v58 = vld [vmem:[%s9775_s14 + $0x6c8] sm:$0xff]  }
0x1c4a   :  { %7323 = vmatprep.subr.bf16.mxu1 %v7906_v50  ;;  %7345 = vmatprep.subr.bf16.mxu0 %v7907_v62  ;;  %v7952_v47 = vld [vmem:[%s9775_s14 + $0x608] sm:$0xff]   ;;  %v7954_v62 = vld [vmem:[%s9775_s14 + $0x640] sm:$0xff]  }
0x1c4b   :  { %v7953_v50 = vld [vmem:[%s9775_s14 + $0x688] sm:$0xff]  }
0x1c4d   :  { %7324 = vmatpush3.bf16.msra.mxu1 %v7908_v2  ;;  %7346 = vmatpush3.bf16.msra.mxu0 %v7909_v3  ;;  %v7957_v2 = vld [vmem:[%s9775_s14 + $0x680] sm:$0xff]  }
0x1c4e   :  { %7325 = vmatprep.subr.bf16.mxu1 %v7910_v56  ;;  %7347 = vmatprep.subr.bf16.mxu0 %v7911_v7  ;;  %v7960_v3 = vld [vmem:[%s9774_s12 + $0x1e4] ss:$16 sps:$4 sm:$0xff]  }
0x1c51   :  { %7326 = vmatpush3.bf16.msra.mxu1 %v7912_v26  ;;  %7348 = vmatpush3.bf16.msra.mxu0 %v7913_v12 }
0x1c52   :  { %4958 = vmatprep.subr.bf16.mxu1 %v7916_v55  ;;  %5001 = vmatprep.subr.bf16.mxu0 %v7919_v34 }
0x1c54   :  { %4825 = vmatmul.mubr.bf16.vlgmr.msra.gmra.mxu1 %v4022_v17  ;;  %4866 = vmatmul.mubr.bf16.vlgmr.msra.gmra.mxu0 %v4024_v45 }
0x1c55   :  { %4959 = vmatpush1.bf16.msra.mxu1 %v7914_v41  ;;  %5002 = vmatpush1.bf16.msra.mxu0 %v7917_v29 }
0x1c56   :  { %4960 = vmatprep.subr.bf16.mxu1 %v7922_v18  ;;  %5003 = vmatprep.subr.bf16.mxu0 %v7925_v23 }
0x1c57   :  { %4978 = vmatprep.mubr.bf16.mxu1 %v8105_v37  ;;  %5021 = vmatprep.mubr.bf16.mxu0 %v8105_v37 }
0x1c59   :  { %4961 = vmatpush1.bf16.msra.mxu1 %v7920_v35  ;;  %5004 = vmatpush1.bf16.msra.mxu0 %v7923_v36 }
0x1c5a   :  { %7355 = vmatprep.subr.bf16.mxu1 %v7926_v19  ;;  %7377 = vmatprep.subr.bf16.mxu0 %v7927_v15 }
0x1c5c   :  { %6808 = vmatmul.mubr.msk.bf16.vlgmr.msra.gmra.mxu1 %vm150_vm2, %v9197_v24  ;;  %6809 = vmatmul.mubr.msk.bf16.vlgmr.msra.gmra.mxu0 %vm150_vm2, %v9197_v24 }
0x1c5d   :  { %7356 = vmatpush3.bf16.msra.mxu1 %v7928_v20  ;;  %7378 = vmatpush3.bf16.msra.mxu0 %v7929_v21 }
0x1c5e   :  { %7357 = vmatprep.subr.bf16.mxu1 %v7930_v22  ;;  %7379 = vmatprep.subr.bf16.mxu0 %v7931_v4 }
0x1c61   :  { %7358 = vmatpush3.bf16.msra.mxu1 %v7932_v25  ;;  %7380 = vmatpush3.bf16.msra.mxu0 %v7933_v9  ;;  %v6799_v9 = vld [vmem:[%s9778_s13 + $0x18] sm:$0xf] }
0x1c62   :  { %7359 = vmatprep.subr.bf16.mxu1 %v7934_v27  ;;  %7381 = vmatprep.subr.bf16.mxu0 %v7935_v61 }
0x1c65   :  { %7360 = vmatpush3.bf16.msra.mxu1 %v7936_v13  ;;  %7382 = vmatpush3.bf16.msra.mxu0 %v7937_v28  ;;  %v4893_v28 = vrot.slane %v6799_v9, %v8576_v44 }
0x1c66   :  { %7361 = vmatprep.subr.bf16.mxu1 %v7938_v30  ;;  %7383 = vmatprep.subr.bf16.mxu0 %v7939_v59  ;;  %v4901_v30 = vrot.slane %v6799_v9, %v8578_v33  ;;  %v4889_v59 = vrot.slane %v6799_v9, %v8583_v46 }
0x1c69   :  { %7362 = vmatpush3.bf16.msra.mxu1 %v7940_v31  ;;  %7384 = vmatpush3.bf16.msra.mxu0 %v7941_v32  ;;  %v4897_v31 = vrot.slane %v6799_v9, %v8585_v48  ;;  %v7985_v9 = vld [vmem:[%s9775_s14 + $0x7a0] sm:$0xff]  }
0x1c6a   :  { %7363 = vmatprep.subr.bf16.mxu1 %v7942_v38  ;;  %7385 = vmatprep.subr.bf16.mxu0 %v7943_v42 }
0x1c6d   :  { %7364 = vmatpush3.bf16.msra.mxu1 %v7944_v43  ;;  %7386 = vmatpush3.bf16.msra.mxu0 %v7945_v49 }
0x1c6e   :  { %7365 = vmatprep.subr.bf16.mxu1 %v7946_v51  ;;  %7387 = vmatprep.subr.bf16.mxu0 %v7947_v57 }
0x1c71   :  { %7366 = vmatpush3.bf16.msra.mxu1 %v7948_v52  ;;  %7388 = vmatpush3.bf16.msra.mxu0 %v7949_v53 }
0x1c72   :  { %7367 = vmatprep.subr.bf16.mxu1 %v7950_v54  ;;  %7389 = vmatprep.subr.bf16.mxu0 %v7951_v58 }
0x1c75   :  { %7368 = vmatpush3.bf16.msra.mxu1 %v7952_v47  ;;  %7390 = vmatpush3.bf16.msra.mxu0 %v7953_v50 }
0x1c76   :  { %7369 = vmatprep.subr.bf16.mxu1 %v7954_v62  ;;  %7391 = vmatprep.subr.bf16.mxu0 %v7955_v63 }
0x1c79   :  { %7370 = vmatpush3.bf16.msra.mxu1 %v7956_v1  ;;  %7392 = vmatpush3.bf16.msra.mxu0 %v7957_v2 }
0x1c7a   :  { %5469 = vmatprep.subr.bf16.mxu1 %v7960_v3  ;;  %5512 = vmatprep.subr.bf16.mxu0 %v7963_v5 }
0x1cf4   :  { %v7283_v6 = vpop.f32.mrf.mxu1  ;;  %v7305_v56 = vpop.f32.mrf.mxu0 }
0x1cf6   :  { %v7284_v7 = vpop.f32.mrf.mxu1  ;;  %v7306_v8 = vpop.f32.mrf.mxu0 }
0x1cf7   :  { %v7285_v10 = vadd.f32 %v7284_v7, %v7283_v6  ;;  %v7307_v26 = vadd.f32 %v7306_v8, %v7305_v56 }
0x1cf8   :  { %v7286_v12 = vpop.f32.mrf.mxu1  ;;  %v7308_v11 = vpop.f32.mrf.mxu0 }
0x1cf9   :  { %v4594_v60 = vadd.f32 %v7307_v26, %v7285_v10 }
0x1cfa   :  { %v7287_v55 = vpop.f32.mrf.mxu1  ;;  %v7309_v34 = vpop.f32.mrf.mxu0 }
0x1cfb   :  { %v7288_v14 = vadd.f32 %v7287_v55, %v7286_v12  ;;  %v7310_v16 = vadd.f32 %v7309_v34, %v7308_v11  ;;  %v7958_v12 = vld [vmem:[%s9774_s12 + $0x1e0] ss:$16 sps:$4 sm:$0xff]   ;;  %v7961_v11 = vld [vmem:[%s9774_s12 + $0x1e8] ss:$16 sps:$4 sm:$0xff]   ;;  %v7966_v34 = vld [vmem:[%s9774_s12 + $0x1c4] ss:$16 sps:$4 sm:$0xff]  }
0x1cfd   :  { %v4597_v41 = vadd.f32 %v7310_v16, %v7288_v14  ;;  %v7969_v14 = vld [vmem:[%s9774_s12 + $0x1cc] ss:$16 sps:$4 sm:$0xff]   ;;  %v7964_v16 = vld [vmem:[%s9774_s12 + $0x1c0] ss:$16 sps:$4 sm:$0xff]  }
0x1d14   :  { %v7327_v29 = vpop.f32.mrf.mxu1  ;;  %v7349_v17 = vpop.f32.mrf.mxu0 }
0x1d16   :  { %v7328_v45 = vpop.f32.mrf.mxu1  ;;  %v7350_v18 = vpop.f32.mrf.mxu0 }
0x1d17   :  { %v7329_v23 = vadd.f32 %v7328_v45, %v7327_v29  ;;  %v7351_v35 = vadd.f32 %v7350_v18, %v7349_v17  ;;  %v7970_v29 = vld [vmem:[%s9775_s14 + $0x778] sm:$0xff]  }
0x1d18   :  { %v7330_v36 = vpop.f32.mrf.mxu1  ;;  %v7352_v19 = vpop.f32.mrf.mxu0  ;;  %v7971_v17 = vld [vmem:[%s9775_s14 + $0x7f8] sm:$0xff]  }
0x1d19   :  { %v4827_v15 = vadd.f32 %v7329_v23, %v4594_v60  ;;  %v7972_v45 = vld [vmem:[%s9775_s14 + $0x738] sm:$0xff]   ;;  %v7974_v23 = vld [vmem:[%s9775_s14 + $0x770] sm:$0xff]  }
0x1d1a   :  { %v7331_v20 = vpop.f32.mrf.mxu1  ;;  %v7353_v21 = vpop.f32.mrf.mxu0  ;;  %v7973_v18 = vld [vmem:[%s9775_s14 + $0x7b8] sm:$0xff]  }
0x1d1b   :  { %v9577_v22 = vadd.f32 %v7351_v35, %v4827_v15  ;;  %v7332_v4 = vadd.f32 %v7331_v20, %v7330_v36  ;;  %v7354_v25 = vadd.f32 %v7353_v21, %v7352_v19  ;;  %v7976_v35 = vld [vmem:[%s9775_s14 + $0x730] sm:$0xff]   ;;  %v7978_v19 = vld [vmem:[%s9775_s14 + $0x768] sm:$0xff]   ;;  %v7982_v21 = vld [vmem:[%s9775_s14 + $0x760] sm:$0xff]  }
0x1d1c   :  { %v4980_v27 = vpop.f32.mrf.mxu1  ;;  %v5023_v61 = vpop.f32.mrf.mxu0  ;;  %v7977_v36 = vld [vmem:[%s9775_s14 + $0x7b0] sm:$0xff]   ;;  %v7980_v15 = vld [vmem:[%s9775_s14 + $0x728] sm:$0xff]  }
0x1d1d   :  { %v4830_v13 = vadd.f32 %v7332_v4, %v4597_v41  ;;  %v4981_v54 = vadd.f32 %v4980_v27, %v4889_v59  ;;  %v5024_v58 = vadd.f32 %v5023_v61, %v4897_v31  ;;  %v7967_v41 = vld [vmem:[%s9774_s12 + $0x1c8] ss:$16 sps:$4 sm:$0xff]   ;;  %v7983_v4 = vld [vmem:[%s9775_s14 + $0x7e0] sm:$0xff]  }
0x1d1e   :  { %v4982_v32 = vpop.f32.mrf.mxu1  ;;  %v5025_v38 = vpop.f32.mrf.mxu0  ;;  %v7981_v20 = vld [vmem:[%s9775_s14 + $0x7a8] sm:$0xff]   ;;  %v7986_v27 = vld [vmem:[%s9775_s14 + $0x758] sm:$0xff]  }
0x1d1f   :  { %v9586_v42 = vadd.f32 %v7354_v25, %v4830_v13  ;;  %v4983_v51 = vadd.f32 %v4982_v32, %v4893_v28  ;;  %v5026_v57 = vadd.f32 %v5025_v38, %v4901_v30  ;;  %v5032_v7 = vmax.f32 %v4981_v54, 0.0  ;;  %v7984_v25 = vld [vmem:[%s9775_s14 + $0x720] sm:$0xff]   ;;  %v7987_v61 = vld [vmem:[%s9775_s14 + $0x7d8] sm:$0xff]   ;;  %v7993_v32 = vld [vmem:[%s9775_s14 + $0x790] sm:$0xff]  }
0x1d20   :  { %v4984_v43 = vpop.f32.mrf.mxu1  ;;  %v5027_v49 = vpop.f32.mrf.mxu0  ;;  %v5034_v8 = vmax.f32 %v5024_v58, 0.0  ;;  %v7988_v13 = vld [vmem:[%s9775_s14 + $0x718] sm:$0xff]   ;;  %v7994_v38 = vld [vmem:[%s9775_s14 + $0x748] sm:$0xff]   ;;  %v8001_v54 = vld [vmem:[%s9775_s14 + $0x780] sm:$0xff]  }
0x1d21   :  { %v4985_v52 = vadd.f32 %v4984_v43, %v4889_v59  ;;  %v5028_v53 = vadd.f32 %v5027_v49, %v4897_v31  ;;  %v5033_v3 = vmax.f32 %v4983_v51, 0.0  ;;  %v5035_v5 = vmax.f32 %v5026_v57, 0.0  ;;  %v7991_v59 = vld [vmem:[%s9775_s14 + $0x7d0] sm:$0xff]   ;;  %v7995_v43 = vld [vmem:[%s9775_s14 + $0x7c8] sm:$0xff]   ;;  %v7998_v57 = vld [vmem:[%s9775_s14 + $0x740] sm:$0xff]  }
0x1d22   :  { %v4986_v47 = vpop.f32.mrf.mxu1  ;;  %v5029_v50 = vpop.f32.mrf.mxu0  ;;  %v7992_v31 = vld [vmem:[%s9775_s14 + $0x710] sm:$0xff]   ;;  %v7996_v49 = vld [vmem:[%s9775_s14 + $0x708] sm:$0xff]  }
0x1d23   :  { %v4987_v62 = vadd.f32 %v4986_v47, %v4893_v28  ;;  %v5030_v63 = vadd.f32 %v5029_v50, %v4901_v30  ;;  %v5036_v1 = vmax.f32 %v4985_v52, 0.0  ;;  %v5038_v2 = vmax.f32 %v5028_v53, 0.0  ;;  %v7989_v28 = vld [vmem:[%s9775_s14 + $0x798] sm:$0xff]   ;;  %v7990_v30 = vld [vmem:[%s9775_s14 + $0x750] sm:$0xff]   ;;  %v7997_v51 = vld [vmem:[%s9775_s14 + $0x788] sm:$0xff]  }
0x1d24   :  { %v7999_v52 = vld [vmem:[%s9775_s14 + $0x7c0] sm:$0xff]  }
0x1d25   :  { %v5037_v6 = vmax.f32 %v4987_v62, 0.0  ;;  %v5039_v56 = vmax.f32 %v5030_v63, 0.0  ;;  %v5040_v60 = vpack.c.bf16 %v5036_v1, %v5032_v7  ;;  %v5042_v55 = vpack.c.bf16 %v5038_v2, %v5034_v8  ;;  %v8000_v53 = vld [vmem:[%s9775_s14 + $0x700] sm:$0xff]  }
0x1d27   :  { %v5041_v10 = vpack.c.bf16 %v5037_v6, %v5033_v3  ;;  %v5043_v26 = vpack.c.bf16 %v5039_v56, %v5035_v5 }
0x1d29   :  { %5333 = vmatprep.mubr.bf16.mxu1 %v5041_v10  ;;  %5374 = vmatprep.mubr.bf16.mxu0 %v5043_v26  ;;  %v6914_v26 = vld [vmem:[%s9778_s13 + $0x1c] sm:$0xf] }
0x1d2a   :  { %5334 = vmatmul.mubr.bf16.vlgmr.msra.gmra.mxu1 %v5040_v60  ;;  %5375 = vmatmul.mubr.bf16.vlgmr.msra.gmra.mxu0 %v5042_v55  ;;  %v5404_v55 = vrot.slane %v6914_v26, %v8576_v44 }
0x1d2b   :  { %5470 = vmatpush1.bf16.msra.mxu1 %v7958_v12  ;;  %5513 = vmatpush1.bf16.msra.mxu0 %v7961_v11 }
0x1d2c   :  { %5471 = vmatprep.subr.bf16.mxu1 %v7966_v34  ;;  %5514 = vmatprep.subr.bf16.mxu0 %v7969_v14  ;;  %v5412_v34 = vrot.slane %v6914_v26, %v8578_v33  ;;  %v5400_v14 = vrot.slane %v6914_v26, %v8583_v46 }
0x1d2d   :  { %5489 = vmatprep.mubr.bf16.mxu1 %v8105_v37  ;;  %5532 = vmatprep.mubr.bf16.mxu0 %v8105_v37  ;;  %v7975_v37 = vld [vmem:[%s9775_s14 + $0x7f0] sm:$0xff]  }
0x1d2f   :  { %5472 = vmatpush1.bf16.msra.mxu1 %v7964_v16  ;;  %5515 = vmatpush1.bf16.msra.mxu0 %v7967_v41  ;;  %v5408_v16 = vrot.slane %v6914_v26, %v8585_v48 }
0x1d30   :  { %7399 = vmatprep.subr.bf16.mxu1 %v7970_v29  ;;  %7421 = vmatprep.subr.bf16.mxu0 %v7971_v17 }
0x1d32   :  { %6923 = vmatmul.mubr.msk.bf16.vlgmr.msra.gmra.mxu1 %vm150_vm2, %v9197_v24  ;;  %6924 = vmatmul.mubr.msk.bf16.vlgmr.msra.gmra.mxu0 %vm150_vm2, %v9197_v24  ;;  %v7979_v24 = vld [vmem:[%s9775_s14 + $0x7e8] sm:$0xff]  }
0x1d33   :  { %7400 = vmatpush3.bf16.msra.mxu1 %v7972_v45  ;;  %7422 = vmatpush3.bf16.msra.mxu0 %v7973_v18 }
0x1d34   :  { %7401 = vmatprep.subr.bf16.mxu1 %v7974_v23  ;;  %7423 = vmatprep.subr.bf16.mxu0 %v7975_v37 }
0x1d37   :  { %7402 = vmatpush3.bf16.msra.mxu1 %v7976_v35  ;;  %7424 = vmatpush3.bf16.msra.mxu0 %v7977_v36 }
0x1d38   :  { %7403 = vmatprep.subr.bf16.mxu1 %v7978_v19  ;;  %7425 = vmatprep.subr.bf16.mxu0 %v7979_v24 }
0x1d3b   :  { %7404 = vmatpush3.bf16.msra.mxu1 %v7980_v15  ;;  %7426 = vmatpush3.bf16.msra.mxu0 %v7981_v20 }
0x1d3c   :  { %7405 = vmatprep.subr.bf16.mxu1 %v7982_v21  ;;  %7427 = vmatprep.subr.bf16.mxu0 %v7983_v4 }
0x1d3f   :  { %7406 = vmatpush3.bf16.msra.mxu1 %v7984_v25  ;;  %7428 = vmatpush3.bf16.msra.mxu0 %v7985_v9 }
0x1d40   :  { %7407 = vmatprep.subr.bf16.mxu1 %v7986_v27  ;;  %7429 = vmatprep.subr.bf16.mxu0 %v7987_v61 }
0x1d43   :  { %7408 = vmatpush3.bf16.msra.mxu1 %v7988_v13  ;;  %7430 = vmatpush3.bf16.msra.mxu0 %v7989_v28 }
0x1d44   :  { %7409 = vmatprep.subr.bf16.mxu1 %v7990_v30  ;;  %7431 = vmatprep.subr.bf16.mxu0 %v7991_v59 }
0x1d47   :  { %7410 = vmatpush3.bf16.msra.mxu1 %v7992_v31  ;;  %7432 = vmatpush3.bf16.msra.mxu0 %v7993_v32 }
0x1d48   :  { %7411 = vmatprep.subr.bf16.mxu1 %v7994_v38  ;;  %7433 = vmatprep.subr.bf16.mxu0 %v7995_v43 }
0x1d4b   :  { %7412 = vmatpush3.bf16.msra.mxu1 %v7996_v49  ;;  %7434 = vmatpush3.bf16.msra.mxu0 %v7997_v51 }
0x1d4c   :  { %7413 = vmatprep.subr.bf16.mxu1 %v7998_v57  ;;  %7435 = vmatprep.subr.bf16.mxu0 %v7999_v52 }
0x1d4f   :  { %7414 = vmatpush3.bf16.msra.mxu1 %v8000_v53  ;;  %7436 = vmatpush3.bf16.msra.mxu0 %v8001_v54  ;;  %v7022_v54 = vld [vmem:[%s9779_s15 + $0x1] ss:$0 sm:$0xff] }
0x1d50   :  { %7615 = vmatprep.subr.bf16.mxu1 %v8092_v0  ;;  %7623 = vmatprep.subr.bf16.mxu0 %v8092_v0 }
0x1dea   :  { %v7371_v58 = vpop.f32.mrf.mxu1  ;;  %v7393_v47 = vpop.f32.mrf.mxu0 }
0x1dec   :  { %v7372_v50 = vpop.f32.mrf.mxu1  ;;  %v7394_v62 = vpop.f32.mrf.mxu0 }
0x1ded   :  { %v7373_v63 = vadd.f32 %v7372_v50, %v7371_v58  ;;  %v7395_v1 = vadd.f32 %v7394_v62, %v7393_v47 }
0x1dee   :  { %v7374_v2 = vpop.f32.mrf.mxu1  ;;  %v7396_v3 = vpop.f32.mrf.mxu0 }
0x1def   :  { %v5377_v5 = vadd.f32 %v7395_v1, %v7373_v63 }
0x1df0   :  { %v7375_v6 = vpop.f32.mrf.mxu1  ;;  %v7397_v56 = vpop.f32.mrf.mxu0 }
0x1df1   :  { %v5383_v7 = vadd.f32 %v5377_v5, %v9577_v22  ;;  %v7376_v8 = vadd.f32 %v7375_v6, %v7374_v2  ;;  %v7398_v10 = vadd.f32 %v7397_v56, %v7396_v3 }
0x1df2   :  { %v5491_v12 = vpop.f32.mrf.mxu1  ;;  %v5534_v11 = vpop.f32.mrf.mxu0 }
0x1df3   :  { %v5380_v60 = vadd.f32 %v7398_v10, %v7376_v8  ;;  %v5492_v36 = vadd.f32 %v5491_v12, %v5400_v14  ;;  %v5535_v19 = vadd.f32 %v5534_v11, %v5408_v16 }
0x1df4   :  { %v5493_v41 = vpop.f32.mrf.mxu1  ;;  %v5536_v29 = vpop.f32.mrf.mxu0 }
0x1df5   :  { %v5384_v22 = vadd.f32 %v5380_v60, %v9586_v42  ;;  %v5494_v18 = vadd.f32 %v5493_v41, %v5404_v55  ;;  %v5537_v23 = vadd.f32 %v5536_v29, %v5412_v34  ;;  %v5543_v9 = vmax.f32 %v5492_v36, 0.0  ;;  %v8005_v41 = vld [vmem:[%s9783_s18] sm:$0xff]  }
0x1df6   :  { %v5495_v17 = vpop.f32.mrf.mxu1  ;;  %v5538_v45 = vpop.f32.mrf.mxu0  ;;  %v5545_v42 = vmax.f32 %v5535_v19, 0.0 }
0x1df7   :  { %v5496_v37 = vadd.f32 %v5495_v17, %v5400_v14  ;;  %v5539_v35 = vadd.f32 %v5538_v45, %v5408_v16  ;;  %v5544_v21 = vmax.f32 %v5494_v18, 0.0  ;;  %v5546_v48 = vmax.f32 %v5537_v23, 0.0  ;;  %v8003_v14 = vld [vmem:[%s9783_s18 + $0x8] sm:$0xff]   ;;  %v8004_v16 = vld [vmem:[%s9782_s16] sm:$0xff]  }
0x1df8   :  { %v5497_v24 = vpop.f32.mrf.mxu1  ;;  %v5540_v44 = vpop.f32.mrf.mxu0 }
0x1df9   :  { %v5498_v15 = vadd.f32 %v5497_v24, %v5404_v55  ;;  %v5541_v33 = vadd.f32 %v5540_v44, %v5412_v34  ;;  %v5547_v20 = vmax.f32 %v5496_v37, 0.0  ;;  %v5549_v46 = vmax.f32 %v5539_v35, 0.0  ;;  %v7025_v35 = vld [vmem:[%s9780_s10 + $0x1] ss:$0 sm:$0xff] }
0x1dfb   :  { %v5548_v4 = vmax.f32 %v5498_v15, 0.0  ;;  %v5550_v25 = vmax.f32 %v5541_v33, 0.0  ;;  %v5551_v13 = vpack.c.bf16 %v5547_v20, %v5543_v9  ;;  %v5553_v28 = vpack.c.bf16 %v5549_v46, %v5545_v42 }
0x1dfd   :  { %v5552_v27 = vpack.c.bf16 %v5548_v4, %v5544_v21  ;;  %v5554_v61 = vpack.c.bf16 %v5550_v25, %v5546_v48 }
0x1dff   :  { %5844 = vmatprep.mubr.bf16.mxu1 %v5552_v27  ;;  %5885 = vmatprep.mubr.bf16.mxu0 %v5554_v61  ;;  %v7027_v61 = vld [vmem:[%s9784_s17] ss:$0 sm:$0xff] }
0x1e00   :  { %5845 = vmatmul.mubr.bf16.vlgmr.msra.gmra.mxu1 %v5551_v13  ;;  %5886 = vmatmul.mubr.bf16.vlgmr.msra.gmra.mxu0 %v5553_v28 }
0x1e01   :  { %7619 = vmatprep.mubr.msk.bf16.mxu1 %vm8093_vm0, %v8092_v0  ;;  %7627 = vmatprep.mubr.msk.bf16.mxu0 %vm8093_vm0, %v8092_v0 }
0x1e02   :  { %7624 = vmatpush3.bf16.msra.mxu0 %v8003_v14 }
0x1e03   :  { %7625 = vmatprep.subr.bf16.mxu0 %v8092_v0 }
0x1e06   :  { %7626 = vmatpush3.bf16.msra.mxu0 %v8005_v41 }
0x1ec0   :  { %v7415_v30 = vpop.f32.mrf.mxu1  ;;  %v7437_v59 = vpop.f32.mrf.mxu0 }
0x1ec2   :  { %v7416_v31 = vpop.f32.mrf.mxu1  ;;  %v7438_v32 = vpop.f32.mrf.mxu0 }
0x1ec3   :  { %v7417_v38 = vadd.f32 %v7416_v31, %v7415_v30  ;;  %v7439_v43 = vadd.f32 %v7438_v32, %v7437_v59 }
0x1ec4   :  { %v7418_v49 = vpop.f32.mrf.mxu1  ;;  %v7440_v51 = vpop.f32.mrf.mxu0 }
0x1ec5   :  { %v5888_v57 = vadd.f32 %v7439_v43, %v7417_v38 }
0x1ec6   :  { %v7419_v52 = vpop.f32.mrf.mxu1  ;;  %v7441_v53 = vpop.f32.mrf.mxu0 }
0x1ec7   :  { %v5894_v58 = vadd.f32 %v5888_v57, %v5383_v7  ;;  %v7420_v47 = vadd.f32 %v7419_v52, %v7418_v49  ;;  %v7442_v50 = vadd.f32 %v7441_v53, %v7440_v51 }
0x1ec9   :  { %v5891_v62 = vadd.f32 %v7442_v50, %v7420_v47  ;;  %v5904_v63 = vadd.f32 %v7022_v54, %v5894_v58  ;;  %v7031_v50 = vld [vmem:[%s9785_s19] ss:$0 sm:$0xff] }
0x1ecb   :  { %v5895_v1 = vadd.f32 %v5891_v62, %v5384_v22  ;;  %v5906_v2 = vadd.f32 %v5904_v63, %v9185_v39 }
0x1ecd   :  { %v5912_v3 = vsel %vm150_vm2, %v5906_v2, 0.0  ;;  %v5905_v5 = vadd.f32 %v7022_v54, %v5895_v1 }
0x1ece   :  { %5913 = vadd.xlane.f32.xlu1 %v5912_v3 }
0x1ecf   :  { %v5907_v6 = vadd.f32 %v5905_v5, %v9187_v40  ;;  %v8002_v40 = vld [vmem:[%s9782_s16 + $0x8] sm:$0xff]  }
0x1ed0   :  { %7616 = vmatpush3.bf16.msra.mxu1 %v8002_v40 }
0x1ed1   :  { %v5915_v56 = vsel %vm150_vm2, %v5907_v6, 0.0  ;;  %7617 = vmatprep.subr.bf16.mxu1 %v8092_v0  ;;  %v7026_v0 = vld [vmem:[%s9781_s11 + $0x1] ss:$0 sm:$0xff] }
0x1ed2   :  { %5916 = vadd.xlane.f32.xlu0 %v5915_v56 }
0x1ed4   :  { %7618 = vmatpush3.bf16.msra.mxu1 %v8004_v16 }
0x1f57   :  { %v5914_v8 = vpop.xlane.xlu1 %5913 }
0x1f58   :  { %v5918_v10 = vmul.f32 0.03125, %v5914_v8 }
0x1f5a   :  { %v5920_v26 = vsub.f32 %v5906_v2, %v5918_v10 }
0x1f5b   :  { %v5917_v7 = vpop.xlane.xlu0 %5916 }
0x1f5c   :  { %v5919_v12 = vmul.f32 0.03125, %v5917_v7  ;;  %v5922_v11 = vmul.f32 %v5920_v26, %v5920_v26 }
0x1f5e   :  { %v5921_v60 = vsub.f32 %v5907_v6, %v5919_v12  ;;  %v5924_v55 = vsel %vm150_vm2, %v5922_v11, 0.0 }
0x1f5f   :  { %5925 = vadd.xlane.f32.xlu0 %v5924_v55 }
0x1f60   :  { %v5923_v39 = vmul.f32 %v5921_v60, %v5921_v60 }
0x1f62   :  { %v5927_v34 = vsel %vm150_vm2, %v5923_v39, 0.0 }
0x1f63   :  { %5928 = vadd.xlane.f32.xlu0 %v5927_v34 }
0x1fe8   :  { %v5926_v29 = vpop.xlane.xlu0 %5925 }
0x1fe9   :  { %v5930_v22 = vmul.f32 0.03125, %v5926_v29 }
0x1feb   :  { %v5932_v17 = vadd.f32 1e-05, %v5930_v22 }
0x1fec   :  { %v5929_v45 = vpop.xlane.xlu0 %5928 }
0x1fed   :  { %8082 = vrsqrt.f32 %v5932_v17  ;;  %v5931_v18 = vmul.f32 0.03125, %v5929_v45 }
0x1fef   :  { %v5933_v23 = vadd.f32 1e-05, %v5931_v18 }
0x1ff1   :  { %8084 = vrsqrt.f32 %v5933_v23 }
0x1ffa   :  { %v8083_v37 = vpop.eup %8082 }
0x1ffb   :  { %v5936_v36 = vmul.f32 %v8083_v37, %v5920_v26 }
0x1ffd   :  { %v5944_v19 = vmul.f32 %v7025_v35, %v5936_v36 }
0x1ffe   :  { %v8085_v24 = vpop.eup %8084 }
0x1fff   :  { %v5952_v44 = vadd.f32 %v7026_v0, %v5944_v19  ;;  %v5937_v15 = vmul.f32 %v8085_v24, %v5921_v60 }
0x2001   :  { %v5954_v33 = vpack.c.bf16 %v5952_v44, %v5952_v44  ;;  %v5945_v20 = vmul.f32 %v7025_v35, %v5937_v15 }
0x2003   :  { %v5953_v46 = vadd.f32 %v7026_v0, %v5945_v20  ;;  %v5969_v21 = vunpack.c.l.b16 %v5954_v33 }
0x2005   :  { %v5955_v48 = vpack.c.bf16 %v5953_v46, %v5953_v46  ;;  %v5971_v25 = vrot.slane %v5969_v21, 7 }
0x2007   :  { %v5970_v4 = vunpack.c.l.b16 %v5955_v48 }
0x2009   :  { %v5972_v9 = vrot.slane %v5970_v4, 6 }
0x200b   :  { %v5974_v42 = vsel %vm5973_vm5, %v5972_v9, %v5971_v25 }
0x200c   :  { %v5975_v27 = vpack.c.b16 %v5974_v42, %v5974_v42 }
0x200e   :  { %7620 = vmatmul.mubr.msk.bf16.vlgmr.msra.gmra.mxu1 %vm150_vm2, %v5975_v27  ;;  %7628 = vmatmul.mubr.msk.bf16.vlgmr.msra.gmra.mxu0 %vm150_vm2, %v5975_v27 }
0x20ce   :  { %v6025_v13 = vpop.f32.mrf.mxu1  ;;  %v6100_v28 = vpop.f32.mrf.mxu0 }
0x20cf   :  { %v6026_v30 = vadd.f32 %v7027_v61, %v6025_v13  ;;  %v6101_v63 = vadd.f32 %v7031_v50, %v6100_v28 }
0x20d0   :  { %v7621_v59 = vpop.f32.mrf.mxu1  ;;  %v7629_v31 = vpop.f32.mrf.mxu0 }
0x20d1   :  { %v6032_v32 = vsel %vm6031_vm6, %v6026_v30, -inf }
0x20d2   :  { %v6103_v38 = vpop.f32.mrf.mxu0  ;;  %6033 = vmax.xlane.f32.xlu0 %v6032_v32  ;;  %v6028_v43 = vpop.f32.mrf.mxu1 }
0x20d4   :  { %v7622_v49 = vpop.f32.mrf.mxu1  ;;  %v7630_v51 = vpop.f32.mrf.mxu0 }
0x215b   :  { %v6034_v57 = vpop.xlane.xlu0 %6033 }
0x215c   :  { %v6035_v52 = vsub.f32 %v6026_v30, %v6034_v57 }
0x215e   :  { %v6036_v53 = vmul.f32 1.442695, %v6035_v52 }
0x2160   :  { %8086 = vpow2.f32 %v6036_v53 }
0x216d   :  { %v8087_v54 = vpop.eup %8086 }
0x216e   :  { %v6038_v58 = vsel %vm6031_vm6, %v8087_v54, 0.0 }
0x216f   :  { %6039 = vadd.xlane.f32.xlu0 %v6038_v58 }
0x21f8   :  { %v6040_v47 = vpop.xlane.xlu0 %6039 }
0x21f9   :  { %8088 = vrcp.f32 %v6040_v47 }
0x2206   :  { %v8089_v62 = vpop.eup %8088 }
0x2207   :  { %v6042_v1 = vmul.f32 %v8089_v62, %v8087_v54 }
0x2209   :  { %v6106_v2 = vmul.f32 %v6101_v63, %v6042_v1 }
0x220b   :  { %v6107_v3 = vsel %vm6031_vm6, %v6106_v2, 0.0 }
0x220c   :  { %6108 = vadd.xlane.f32.xlu0 %v6107_v3 }
0x2295   :  { %v6109_v5 = vpop.xlane.xlu0 %6108 }
0x2296   :  { %6111 = vst.msk [vmem:[%s9786_s20] sm:$0x3] %vm6110_vm7, %v6109_v5 }

</bundles_post_ra>
